<compile_context>
chip_gen: v7x
topology: tpu7x:2x2x1
jax: 0.10.0
libtpu: 0.0.40
codegen_flags: <defaults>
</compile_context>

<pallas_src>
import numpy as np
import jax
import jax.numpy as jnp
from jax.experimental import pallas as pl
from jax.experimental.pallas import tpu as pltpu

EPSILON = 1e-4      # BiFPN fusion epsilon (module adds it AFTER the division)
BN_EPS = 4e-5       # BatchNorm eps from DepthwiseConvBlock


def _nearest_gt(hs, ws, hd, wd):
    """Constant 0/1 selection matrix Gt of shape (hs*ws, hd*wd) so that, on a
    channel-major (C, H*W) tensor of ONE batch element,  dst = src @ Gt
    reproduces F.interpolate(mode='nearest', size=(hd, wd)):
    src index = floor(dst * in / out)."""
    hi = (np.arange(hd) * hs) // hd
    wi = (np.arange(wd) * ws) // wd
    src = (hi[:, None] * ws + wi[None, :]).reshape(-1)
    gt = np.zeros((hs * ws, hd * wd), np.float32)
    gt[src, np.arange(hd * wd)] = 1.0
    return jnp.asarray(gt, jnp.bfloat16)


# ----------------------------------------------------------------------------
# The single fused BiFPN kernel (straight-line body, one batch element per
# grid step, channel-major (C, H*W) tiles).
# ----------------------------------------------------------------------------
def _bifpn_kernel(
    w_ref,                                        # (5,3) normalized fusion weights (SMEM)
    p1_ref, p2_ref, p3_ref, p4_ref,               # raw inputs  (C_in, H*W), f32
    win1, win2, win3, win4,                       # ch_in_adj   (64, C_in), bf16
    pw1t, b1t, pw2t, b2t, pw3t, b3t, pw4t, b4t,   # p*_td folded DW+PW+BN: (64,64)/(64,1)
    pw1o, b1o, pw2o, b2o, pw3o, b3o, pw4o, b4o,   # p*_out folded DW+PW+BN
    wout1, wout2, wout3, wout4,                   # ch_out_adj  (C_out, 64), bf16
    g43, g32, g21, g12, g23, g34,                 # nearest-resize selection mats, bf16
    o1_ref, o2_ref, o3_ref, o4_ref,               # outputs (C_out, H*W), f32
):
    def mm(a, b):
        return jnp.dot(a.astype(jnp.bfloat16), b.astype(jnp.bfloat16),
                       preferred_element_type=jnp.float32)

    def dwblock(pw_ref, b_ref, x):
        # DepthwiseConvBlock(kernel_size=1): depthwise + pointwise + BN(eval)
        # + ReLU, with depthwise and BN scales folded into pw_ref offline.
        return jnp.maximum(mm(pw_ref[...], x) + b_ref[...], 0.0)

    # ---- 1x1 input channel adjustment (channel-major matmuls) --------------
    p1_in = mm(win1[...], p1_ref[...])
    p2_in = mm(win2[...], p2_ref[...])
    p3_in = mm(win3[...], p3_ref[...])
    p4_in = mm(win4[...], p4_ref[...])

    # ---- top-down path ------------------------------------------------------
    p4_td = dwblock(pw4t, b4t, p4_in)
    p3_td = dwblock(pw3t, b3t,
                    w_ref[0, 0] * p3_in + w_ref[1, 0] * mm(p4_td, g43[...]))
    p2_td = dwblock(pw2t, b2t,
                    w_ref[0, 1] * p2_in + w_ref[1, 1] * mm(p3_td, g32[...]))
    p1_td = dwblock(pw1t, b1t,
                    w_ref[0, 2] * p1_in + w_ref[1, 2] * mm(p2_td, g21[...]))

    # ---- bottom-up path + 1x1 output channel adjustment --------------------
    p1_out = dwblock(pw1o, b1o, p1_td)
    o1_ref[...] = mm(wout1[...], p1_out)

    p2_out = dwblock(pw2o, b2o,
                     w_ref[2, 0] * p2_in + w_ref[3, 0] * p2_td
                     + w_ref[4, 0] * mm(p1_out, g12[...]))
    o2_ref[...] = mm(wout2[...], p2_out)

    p3_out = dwblock(pw3o, b3o,
                     w_ref[2, 1] * p3_in + w_ref[3, 1] * p3_td
                     + w_ref[4, 1] * mm(p2_out, g23[...]))
    o3_ref[...] = mm(wout3[...], p3_out)

    p4_out = dwblock(pw4o, b4o,
                     w_ref[2, 2] * p4_in + w_ref[3, 2] * p4_td
                     + w_ref[4, 2] * mm(p3_out, g34[...]))
    o4_ref[...] = mm(wout4[...], p4_out)


# ----------------------------------------------------------------------------
# Wrapper: layout (free reshapes only), constants, and the single pallas_call.
# ----------------------------------------------------------------------------
def bifpn_block(params, p4, p3, p2, p1):
    B, c1, H1, W1 = p1.shape
    _, c2, H2, W2 = p2.shape
    _, c3, H3, W3 = p3.shape
    _, c4, H4, W4 = p4.shape
    hw1, hw2, hw3, hw4 = H1 * W1, H2 * W2, H3 * W3, H4 * W4
    co1, co2, co3, co4 = (params['wout1'].shape[0], params['wout2'].shape[0],
                          params['wout3'].shape[0], params['wout4'].shape[0])

    # Free reshapes only: NCHW -> (B, C, H*W). Channels on sublanes, pixels on lanes.
    r1 = p1.reshape(B, c1, hw1)
    r2 = p2.reshape(B, c2, hw2)
    r3 = p3.reshape(B, c3, hw3)
    r4 = p4.reshape(B, c4, hw4)

    # Fusion weights: module does  w1 / sum(w1, dim=0) + eps  (NO relu on w1).
    w1n = params['w1'] / jnp.sum(params['w1'], axis=0) + EPSILON

    # Constant nearest-resize selection matrices (per batch element).
    g43 = _nearest_gt(H4, W4, H3, W3)   # p4_td  -> p3 grid
    g32 = _nearest_gt(H3, W3, H2, W2)   # p3_td  -> p2 grid
    g21 = _nearest_gt(H2, W2, H1, W1)   # p2_td  -> p1 grid
    g12 = _nearest_gt(H1, W1, H2, W2)   # p1_out -> p2 grid
    g23 = _nearest_gt(H2, W2, H3, W3)   # p2_out -> p3 grid
    g34 = _nearest_gt(H3, W3, H4, W4)   # p3_out -> p4 grid

    inputs = [
        w1n,
        r1, r2, r3, r4,
        params['win1'], params['win2'], params['win3'], params['win4'],
        params['td1'][0], params['td1'][1], params['td2'][0], params['td2'][1],
        params['td3'][0], params['td3'][1], params['td4'][0], params['td4'][1],
        params['out1'][0], params['out1'][1], params['out2'][0], params['out2'][1],
        params['out3'][0], params['out3'][1], params['out4'][0], params['out4'][1],
        params['wout1'], params['wout2'], params['wout3'], params['wout4'],
        g43, g32, g21, g12, g23, g34,
    ]

    def bspec(c, hw):
        # one batch element per grid step; batch dim squeezed out of the ref
        return pl.BlockSpec((None, c, hw), lambda b: (b, 0, 0))

    def wspec(a):
        zeros = (0,) * a.ndim
        return pl.BlockSpec(a.shape, lambda b: zeros)

    in_specs = ([pl.BlockSpec(memory_space=pltpu.MemorySpace.SMEM)]
                + [bspec(c1, hw1), bspec(c2, hw2), bspec(c3, hw3), bspec(c4, hw4)]
                + [wspec(a) for a in inputs[5:]])

    out_shape = (jax.ShapeDtypeStruct((B, co1, hw1), jnp.float32),
                 jax.ShapeDtypeStruct((B, co2, hw2), jnp.float32),
                 jax.ShapeDtypeStruct((B, co3, hw3), jnp.float32),
                 jax.ShapeDtypeStruct((B, co4, hw4), jnp.float32))
    out_specs = (bspec(co1, hw1), bspec(co2, hw2), bspec(co3, hw3), bspec(co4, hw4))

    o1, o2, o3, o4 = pl.pallas_call(
        _bifpn_kernel,
        out_shape=out_shape,
        grid=(B,),
        in_specs=in_specs,
        out_specs=out_specs,
        compiler_params=pltpu.CompilerParams(
            dimension_semantics=("parallel",)),   # batch shards across TCs on v7x
    )(*inputs)

    return (o4.reshape(B, co4, H4, W4), o3.reshape(B, co3, H3, W3),
            o2.reshape(B, co2, H2, W2), o1.reshape(B, co1, H1, W1))


bifpn_forward = jax.jit(bifpn_block)


# ----------------------------------------------------------------------------
# Deterministic parameter construction.  Depthwise scale + BatchNorm scale are
# folded into the pointwise weight offline; only the BN shift stays as a bias.
# ----------------------------------------------------------------------------
def _init_dwblock(key, C):
    k1, k2, k3, k4, k5, k6 = jax.random.split(key, 6)
    dw = 1.0 + 0.1 * jax.random.normal(k1, (C,), jnp.float32)        # depthwise 1x1
    pw = 0.05 * jax.random.normal(k2, (C, C), jnp.float32)           # (Cin, Cout)
    gamma = jax.random.uniform(k3, (C,), jnp.float32, minval=0.9, maxval=1.1)
    beta = 0.05 * jax.random.normal(k4, (C,), jnp.float32)
    mean = 0.05 * jax.random.normal(k5, (C,), jnp.float32)
    var = jax.random.uniform(k6, (C,), jnp.float32, minval=0.5, maxval=1.5)
    scale = gamma / jnp.sqrt(var + BN_EPS)                           # (C,)
    shift = (beta - mean * scale).reshape(C, 1)                      # (Cout, 1), f32
    # channel-major folded weight:  y = relu(pw_eff_t @ x + shift)
    pw_eff_t = (scale[:, None] * pw.T * dw[None, :]).astype(jnp.bfloat16)  # (Cout, Cin)
    return pw_eff_t, shift


def init_bifpn_params(key, feature_size=64, adj_channels=(936, 312, 104, 36)):
    keys = jax.random.split(key, 17)
    p = {'w1': jax.random.uniform(keys[0], (5, 3), jnp.float32,
                                  minval=0.5, maxval=1.5)}
    for i, c in enumerate(adj_channels):                              # levels p1..p4
        p[f'win{i + 1}'] = (0.05 * jax.random.normal(
            keys[1 + i], (feature_size, c), jnp.float32)).astype(jnp.bfloat16)
        p[f'wout{i + 1}'] = (0.05 * jax.random.normal(
            keys[5 + i], (c, feature_size), jnp.float32)).astype(jnp.bfloat16)
    for i in range(4):
        p[f'td{i + 1}'] = _init_dwblock(keys[9 + i], feature_size)
        p[f'out{i + 1}'] = _init_dwblock(keys[13 + i], feature_size)
    return p


# ----------------------------------------------------------------------------
# Pure-JAX mirror of the kernel math (same precision policy) for validation.
# ----------------------------------------------------------------------------
def reference_forward(params, p4, p3, p2, p1):
    bf16, f32 = jnp.bfloat16, jnp.float32
    B, _, H1, W1 = p1.shape
    _, _, H2, W2 = p2.shape
    _, _, H3, W3 = p3.shape
    _, _, H4, W4 = p4.shape

    def cm(x):
        b, c, h, w = x.shape
        return x.reshape(b, c, h * w)

    def mmw(w, x):           # (m,k) @ (B,k,n)
        return jnp.einsum('mk,bkn->bmn', w.astype(bf16), x.astype(bf16),
                          preferred_element_type=f32)

    def mmg(x, g):           # (B,c,k) @ (k,n)
        return jnp.einsum('bck,kn->bcn', x.astype(bf16), g.astype(bf16),
                          preferred_element_type=f32)

    def dwb(p, x):
        pw_t, b = p
        return jnp.maximum(mmw(pw_t, x) + b[None], 0.0)

    w = params['w1'] / jnp.sum(params['w1'], axis=0) + EPSILON
    g43 = _nearest_gt(H4, W4, H3, W3); g32 = _nearest_gt(H3, W3, H2, W2)
    g21 = _nearest_gt(H2, W2, H1, W1); g12 = _nearest_gt(H1, W1, H2, W2)
    g23 = _nearest_gt(H2, W2, H3, W3); g34 = _nearest_gt(H3, W3, H4, W4)

    p1_in = mmw(params['win1'], cm(p1)); p2_in = mmw(params['win2'], cm(p2))
    p3_in = mmw(params['win3'], cm(p3)); p4_in = mmw(params['win4'], cm(p4))

    p4_td = dwb(params['td4'], p4_in)
    p3_td = dwb(params['td3'], w[0, 0] * p3_in + w[1, 0] * mmg(p4_td, g43))
    p2_td = dwb(params['td2'], w[0, 1] * p2_in + w[1, 1] * mmg(p3_td, g32))
    p1_td = dwb(params['td1'], w[0, 2] * p1_in + w[1, 2] * mmg(p2_td, g21))

    p1_out = dwb(params['out1'], p1_td)
    p2_out = dwb(params['out2'],
                 w[2, 0] * p2_in + w[3, 0] * p2_td + w[4, 0] * mmg(p1_out, g12))
    p3_out = dwb(params['out3'],
                 w[2, 1] * p3_in + w[3, 1] * p3_td + w[4, 1] * mmg(p2_out, g23))
    p4_out = dwb(params['out4'],
                 w[2, 2] * p4_in + w[3, 2] * p4_td + w[4, 2] * mmg(p3_out, g34))

    o1 = mmw(params['wout1'], p1_out).reshape(B, -1, H1, W1)
    o2 = mmw(params['wout2'], p2_out).reshape(B, -1, H2, W2)
    o3 = mmw(params['wout3'], p3_out).reshape(B, -1, H3, W3)
    o4 = mmw(params['wout4'], p4_out).reshape(B, -1, H4, W4)
    return o4, o3, o2, o1


# ----------------------------------------------------------------------------
if __name__ == "__main__":
    key = jax.random.PRNGKey(0)
    kp, k1, k2, k3, k4 = jax.random.split(key, 5)

    feature_size = 64
    params = init_bifpn_params(kp, feature_size=feature_size)

    # Small pyramid consistent with the module's hard-coded adj channel counts.
    p1 = jax.random.normal(k1, (2, 936, 16, 16), jnp.float32)
    p2 = jax.random.normal(k2, (2, 312, 8, 8), jnp.float32)
    p3 = jax.random.normal(k3, (2, 104, 4, 4), jnp.float32)
    p4 = jax.random.normal(k4, (2, 36, 2, 2), jnp.float32)

    outs = bifpn_forward(params, p4, p3, p2, p1)
    jax.block_until_ready(outs)
    p4_o, p3_o, p2_o, p1_o = outs

    assert p4_o.shape == (2, 36, 2, 2)
    assert p3_o.shape == (2, 104, 4, 4)
    assert p2_o.shape == (2, 312, 8, 8)
    assert p1_o.shape == (2, 936, 16, 16)

    ref = reference_forward(params, p4, p3, p2, p1)
    for got, want in zip(outs, ref):
        assert bool(jnp.all(jnp.isfinite(got)))
        np.testing.assert_allclose(np.asarray(got), np.asarray(want),
                                   rtol=2e-2, atol=2e-3)
    print("KERNEL_OK")
</pallas_src>

<mosaic_0001>
module attributes {stable_mosaic.version = 11 : i64} {
  func.func @_bifpn_kernel(%arg0: i32, %arg1: memref<5x3xf32, #tpu.memory_space<smem>>, %arg2: memref<1x936x256xf32, #tpu.memory_space<vmem>>, %arg3: memref<1x312x64xf32, #tpu.memory_space<vmem>>, %arg4: memref<1x104x16xf32, #tpu.memory_space<vmem>>, %arg5: memref<1x36x4xf32, #tpu.memory_space<vmem>>, %arg6: memref<64x936xbf16, #tpu.memory_space<vmem>>, %arg7: memref<64x312xbf16, #tpu.memory_space<vmem>>, %arg8: memref<64x104xbf16, #tpu.memory_space<vmem>>, %arg9: memref<64x36xbf16, #tpu.memory_space<vmem>>, %arg10: memref<64x64xbf16, #tpu.memory_space<vmem>>, %arg11: memref<64x1xf32, #tpu.memory_space<vmem>>, %arg12: memref<64x64xbf16, #tpu.memory_space<vmem>>, %arg13: memref<64x1xf32, #tpu.memory_space<vmem>>, %arg14: memref<64x64xbf16, #tpu.memory_space<vmem>>, %arg15: memref<64x1xf32, #tpu.memory_space<vmem>>, %arg16: memref<64x64xbf16, #tpu.memory_space<vmem>>, %arg17: memref<64x1xf32, #tpu.memory_space<vmem>>, %arg18: memref<64x64xbf16, #tpu.memory_space<vmem>>, %arg19: memref<64x1xf32, #tpu.memory_space<vmem>>, %arg20: memref<64x64xbf16, #tpu.memory_space<vmem>>, %arg21: memref<64x1xf32, #tpu.memory_space<vmem>>, %arg22: memref<64x64xbf16, #tpu.memory_space<vmem>>, %arg23: memref<64x1xf32, #tpu.memory_space<vmem>>, %arg24: memref<64x64xbf16, #tpu.memory_space<vmem>>, %arg25: memref<64x1xf32, #tpu.memory_space<vmem>>, %arg26: memref<936x64xbf16, #tpu.memory_space<vmem>>, %arg27: memref<312x64xbf16, #tpu.memory_space<vmem>>, %arg28: memref<104x64xbf16, #tpu.memory_space<vmem>>, %arg29: memref<36x64xbf16, #tpu.memory_space<vmem>>, %arg30: memref<4x16xbf16, #tpu.memory_space<vmem>>, %arg31: memref<16x64xbf16, #tpu.memory_space<vmem>>, %arg32: memref<64x256xbf16, #tpu.memory_space<vmem>>, %arg33: memref<256x64xbf16, #tpu.memory_space<vmem>>, %arg34: memref<64x16xbf16, #tpu.memory_space<vmem>>, %arg35: memref<16x4xbf16, #tpu.memory_space<vmem>>, %arg36: memref<1x936x256xf32, #tpu.memory_space<vmem>>, %arg37: memref<1x312x64xf32, #tpu.memory_space<vmem>>, %arg38: memref<1x104x16xf32, #tpu.memory_space<vmem>>, %arg39: memref<1x36x4xf32, #tpu.memory_space<vmem>>) attributes {dimension_semantics = [#tpu.dimension_semantics<parallel>], iteration_bounds = array<i64: 2>, scalar_prefetch = 0 : i64, scratch_operands = 0 : i64, tpu.core_type = #tpu.core_type<tc>, window_params = [{transform_indices = @transform_0, window_bounds = array<i64: 5, 3>}, {transform_indices = @transform_1, window_bounds = array<i64: 1, 936, 256>}, {transform_indices = @transform_2, window_bounds = array<i64: 1, 312, 64>}, {transform_indices = @transform_3, window_bounds = array<i64: 1, 104, 16>}, {transform_indices = @transform_4, window_bounds = array<i64: 1, 36, 4>}, {pipeline_mode = #tpu.pipeline_mode<synchronous>, transform_indices = @transform_5, window_bounds = array<i64: 64, 936>}, {pipeline_mode = #tpu.pipeline_mode<synchronous>, transform_indices = @transform_6, window_bounds = array<i64: 64, 312>}, {pipeline_mode = #tpu.pipeline_mode<synchronous>, transform_indices = @transform_7, window_bounds = array<i64: 64, 104>}, {pipeline_mode = #tpu.pipeline_mode<synchronous>, transform_indices = @transform_8, window_bounds = array<i64: 64, 36>}, {pipeline_mode = #tpu.pipeline_mode<synchronous>, transform_indices = @transform_9, window_bounds = array<i64: 64, 64>}, {pipeline_mode = #tpu.pipeline_mode<synchronous>, transform_indices = @transform_10, window_bounds = array<i64: 64, 1>}, {pipeline_mode = #tpu.pipeline_mode<synchronous>, transform_indices = @transform_11, window_bounds = array<i64: 64, 64>}, {pipeline_mode = #tpu.pipeline_mode<synchronous>, transform_indices = @transform_12, window_bounds = array<i64: 64, 1>}, {pipeline_mode = #tpu.pipeline_mode<synchronous>, transform_indices = @transform_13, window_bounds = array<i64: 64, 64>}, {pipeline_mode = #tpu.pipeline_mode<synchronous>, transform_indices = @transform_14, window_bounds = array<i64: 64, 1>}, {pipeline_mode = #tpu.pipeline_mode<synchronous>, transform_indices = @transform_15, window_bounds = array<i64: 64, 64>}, {pipeline_mode = #tpu.pipeline_mode<synchronous>, transform_indices = @transform_16, window_bounds = array<i64: 64, 1>}, {pipeline_mode = #tpu.pipeline_mode<synchronous>, transform_indices = @transform_17, window_bounds = array<i64: 64, 64>}, {pipeline_mode = #tpu.pipeline_mode<synchronous>, transform_indices = @transform_18, window_bounds = array<i64: 64, 1>}, {pipeline_mode = #tpu.pipeline_mode<synchronous>, transform_indices = @transform_19, window_bounds = array<i64: 64, 64>}, {pipeline_mode = #tpu.pipeline_mode<synchronous>, transform_indices = @transform_20, window_bounds = array<i64: 64, 1>}, {pipeline_mode = #tpu.pipeline_mode<synchronous>, transform_indices = @transform_21, window_bounds = array<i64: 64, 64>}, {pipeline_mode = #tpu.pipeline_mode<synchronous>, transform_indices = @transform_22, window_bounds = array<i64: 64, 1>}, {pipeline_mode = #tpu.pipeline_mode<synchronous>, transform_indices = @transform_23, window_bounds = array<i64: 64, 64>}, {pipeline_mode = #tpu.pipeline_mode<synchronous>, transform_indices = @transform_24, window_bounds = array<i64: 64, 1>}, {pipeline_mode = #tpu.pipeline_mode<synchronous>, transform_indices = @transform_25, window_bounds = array<i64: 936, 64>}, {pipeline_mode = #tpu.pipeline_mode<synchronous>, transform_indices = @transform_26, window_bounds = array<i64: 312, 64>}, {pipeline_mode = #tpu.pipeline_mode<synchronous>, transform_indices = @transform_27, window_bounds = array<i64: 104, 64>}, {pipeline_mode = #tpu.pipeline_mode<synchronous>, transform_indices = @transform_28, window_bounds = array<i64: 36, 64>}, {pipeline_mode = #tpu.pipeline_mode<synchronous>, transform_indices = @transform_29, window_bounds = array<i64: 4, 16>}, {pipeline_mode = #tpu.pipeline_mode<synchronous>, transform_indices = @transform_30, window_bounds = array<i64: 16, 64>}, {pipeline_mode = #tpu.pipeline_mode<synchronous>, transform_indices = @transform_31, window_bounds = array<i64: 64, 256>}, {pipeline_mode = #tpu.pipeline_mode<synchronous>, transform_indices = @transform_32, window_bounds = array<i64: 256, 64>}, {pipeline_mode = #tpu.pipeline_mode<synchronous>, transform_indices = @transform_33, window_bounds = array<i64: 64, 16>}, {pipeline_mode = #tpu.pipeline_mode<synchronous>, transform_indices = @transform_34, window_bounds = array<i64: 16, 4>}, {transform_indices = @transform_35, window_bounds = array<i64: 1, 936, 256>}, {transform_indices = @transform_36, window_bounds = array<i64: 1, 312, 64>}, {transform_indices = @transform_37, window_bounds = array<i64: 1, 104, 16>}, {transform_indices = @transform_38, window_bounds = array<i64: 1, 36, 4>}]} {
    %c0 = arith.constant 0 : index
    %c0_0 = arith.constant 0 : index
    %0 = vector.load %arg6[%c0, %c0_0] : memref<64x936xbf16, #tpu.memory_space<vmem>>, vector<64x936xbf16>
    %c0_1 = arith.constant 0 : index
    %c0_2 = arith.constant 0 : index
    %c0_3 = arith.constant 0 : index
    %1 = vector.load %arg2[%c0_1, %c0_2, %c0_3] : memref<1x936x256xf32, #tpu.memory_space<vmem>>, vector<1x936x256xf32>
    %2 = vector.shape_cast %1 : vector<1x936x256xf32> to vector<936x256xf32>
    %3 = arith.truncf %2 : vector<936x256xf32> to vector<936x256xbf16>
    %cst = arith.constant dense<0.000000e+00> : vector<64x256xf32>
    %4 = tpu.matmul %0, %3, %cst {dimension_numbers = #tpu.dot_dimension_numbers<[1], [0], [0], [1], [0, 0, 1, 1], [], []>} : vector<64x936xbf16>, vector<936x256xbf16>, vector<64x256xf32> -> vector<64x256xf32>
    %c0_4 = arith.constant 0 : index
    %c0_5 = arith.constant 0 : index
    %5 = vector.load %arg7[%c0_4, %c0_5] : memref<64x312xbf16, #tpu.memory_space<vmem>>, vector<64x312xbf16>
    %c0_6 = arith.constant 0 : index
    %c0_7 = arith.constant 0 : index
    %c0_8 = arith.constant 0 : index
    %6 = vector.load %arg3[%c0_6, %c0_7, %c0_8] : memref<1x312x64xf32, #tpu.memory_space<vmem>>, vector<1x312x64xf32>
    %7 = vector.shape_cast %6 : vector<1x312x64xf32> to vector<312x64xf32>
    %8 = arith.truncf %7 : vector<312x64xf32> to vector<312x64xbf16>
    %cst_9 = arith.constant dense<0.000000e+00> : vector<64x64xf32>
    %9 = tpu.matmul %5, %8, %cst_9 {dimension_numbers = #tpu.dot_dimension_numbers<[1], [0], [0], [1], [0, 0, 1, 1], [], []>} : vector<64x312xbf16>, vector<312x64xbf16>, vector<64x64xf32> -> vector<64x64xf32>
    %c0_10 = arith.constant 0 : index
    %c0_11 = arith.constant 0 : index
    %10 = vector.load %arg8[%c0_10, %c0_11] : memref<64x104xbf16, #tpu.memory_space<vmem>>, vector<64x104xbf16>
    %c0_12 = arith.constant 0 : index
    %c0_13 = arith.constant 0 : index
    %c0_14 = arith.constant 0 : index
    %11 = vector.load %arg4[%c0_12, %c0_13, %c0_14] : memref<1x104x16xf32, #tpu.memory_space<vmem>>, vector<1x104x16xf32>
    %12 = vector.shape_cast %11 : vector<1x104x16xf32> to vector<104x16xf32>
    %13 = arith.truncf %12 : vector<104x16xf32> to vector<104x16xbf16>
    %cst_15 = arith.constant dense<0.000000e+00> : vector<64x16xf32>
    %14 = tpu.matmul %10, %13, %cst_15 {dimension_numbers = #tpu.dot_dimension_numbers<[1], [0], [0], [1], [0, 0, 1, 1], [], []>} : vector<64x104xbf16>, vector<104x16xbf16>, vector<64x16xf32> -> vector<64x16xf32>
    %c0_16 = arith.constant 0 : index
    %c0_17 = arith.constant 0 : index
    %15 = vector.load %arg9[%c0_16, %c0_17] : memref<64x36xbf16, #tpu.memory_space<vmem>>, vector<64x36xbf16>
    %c0_18 = arith.constant 0 : index
    %c0_19 = arith.constant 0 : index
    %c0_20 = arith.constant 0 : index
    %16 = vector.load %arg5[%c0_18, %c0_19, %c0_20] : memref<1x36x4xf32, #tpu.memory_space<vmem>>, vector<1x36x4xf32>
    %17 = vector.shape_cast %16 : vector<1x36x4xf32> to vector<36x4xf32>
    %18 = arith.truncf %17 : vector<36x4xf32> to vector<36x4xbf16>
    %cst_21 = arith.constant dense<0.000000e+00> : vector<64x4xf32>
    %19 = tpu.matmul %15, %18, %cst_21 {dimension_numbers = #tpu.dot_dimension_numbers<[1], [0], [0], [1], [0, 0, 1, 1], [], []>} : vector<64x36xbf16>, vector<36x4xbf16>, vector<64x4xf32> -> vector<64x4xf32>
    %c0_22 = arith.constant 0 : index
    %c0_23 = arith.constant 0 : index
    %20 = vector.load %arg16[%c0_22, %c0_23] : memref<64x64xbf16, #tpu.memory_space<vmem>>, vector<64x64xbf16>
    %21 = arith.truncf %19 : vector<64x4xf32> to vector<64x4xbf16>
    %cst_24 = arith.constant dense<0.000000e+00> : vector<64x4xf32>
    %22 = tpu.matmul %20, %21, %cst_24 {dimension_numbers = #tpu.dot_dimension_numbers<[1], [0], [0], [1], [0, 0, 1, 1], [], []>} : vector<64x64xbf16>, vector<64x4xbf16>, vector<64x4xf32> -> vector<64x4xf32>
    %c0_25 = arith.constant 0 : index
    %c0_26 = arith.constant 0 : index
    %23 = vector.load %arg17[%c0_25, %c0_26] : memref<64x1xf32, #tpu.memory_space<vmem>>, vector<64x1xf32>
    %24 = vector.broadcast %23 : vector<64x1xf32> to vector<64x4xf32>
    %25 = arith.addf %22, %24 : vector<64x4xf32>
    %cst_27 = arith.constant 0.000000e+00 : f32
    %26 = vector.broadcast %cst_27 : f32 to vector<64x4xf32>
    %27 = arith.maximumf %25, %26 : vector<64x4xf32>
    %c0_28 = arith.constant 0 : index
    %c0_29 = arith.constant 0 : index
    %28 = memref.load %arg1[%c0_28, %c0_29] : memref<5x3xf32, #tpu.memory_space<smem>>
    %29 = vector.broadcast %28 : f32 to vector<64x16xf32>
    %30 = arith.mulf %29, %14 : vector<64x16xf32>
    %c1 = arith.constant 1 : index
    %c0_30 = arith.constant 0 : index
    %31 = memref.load %arg1[%c1, %c0_30] : memref<5x3xf32, #tpu.memory_space<smem>>
    %c0_31 = arith.constant 0 : index
    %c0_32 = arith.constant 0 : index
    %32 = vector.load %arg30[%c0_31, %c0_32] : memref<4x16xbf16, #tpu.memory_space<vmem>>, vector<4x16xbf16>
    %33 = arith.truncf %27 : vector<64x4xf32> to vector<64x4xbf16>
    %cst_33 = arith.constant dense<0.000000e+00> : vector<64x16xf32>
    %34 = tpu.matmul %33, %32, %cst_33 {dimension_numbers = #tpu.dot_dimension_numbers<[1], [0], [0], [1], [0, 0, 1, 1], [], []>} : vector<64x4xbf16>, vector<4x16xbf16>, vector<64x16xf32> -> vector<64x16xf32>
    %35 = vector.broadcast %31 : f32 to vector<64x16xf32>
    %36 = arith.mulf %35, %34 : vector<64x16xf32>
    %37 = arith.addf %30, %36 : vector<64x16xf32>
    %c0_34 = arith.constant 0 : index
    %c0_35 = arith.constant 0 : index
    %38 = vector.load %arg14[%c0_34, %c0_35] : memref<64x64xbf16, #tpu.memory_space<vmem>>, vector<64x64xbf16>
    %39 = arith.truncf %37 : vector<64x16xf32> to vector<64x16xbf16>
    %cst_36 = arith.constant dense<0.000000e+00> : vector<64x16xf32>
    %40 = tpu.matmul %38, %39, %cst_36 {dimension_numbers = #tpu.dot_dimension_numbers<[1], [0], [0], [1], [0, 0, 1, 1], [], []>} : vector<64x64xbf16>, vector<64x16xbf16>, vector<64x16xf32> -> vector<64x16xf32>
    %c0_37 = arith.constant 0 : index
    %c0_38 = arith.constant 0 : index
    %41 = vector.load %arg15[%c0_37, %c0_38] : memref<64x1xf32, #tpu.memory_space<vmem>>, vector<64x1xf32>
    %42 = vector.broadcast %41 : vector<64x1xf32> to vector<64x16xf32>
    %43 = arith.addf %40, %42 : vector<64x16xf32>
    %cst_39 = arith.constant 0.000000e+00 : f32
    %44 = vector.broadcast %cst_39 : f32 to vector<64x16xf32>
    %45 = arith.maximumf %43, %44 : vector<64x16xf32>
    %c0_40 = arith.constant 0 : index
    %c1_41 = arith.constant 1 : index
    %46 = memref.load %arg1[%c0_40, %c1_41] : memref<5x3xf32, #tpu.memory_space<smem>>
    %47 = vector.broadcast %46 : f32 to vector<64x64xf32>
    %48 = arith.mulf %47, %9 : vector<64x64xf32>
    %c1_42 = arith.constant 1 : index
    %c1_43 = arith.constant 1 : index
    %49 = memref.load %arg1[%c1_42, %c1_43] : memref<5x3xf32, #tpu.memory_space<smem>>
    %c0_44 = arith.constant 0 : index
    %c0_45 = arith.constant 0 : index
    %50 = vector.load %arg31[%c0_44, %c0_45] : memref<16x64xbf16, #tpu.memory_space<vmem>>, vector<16x64xbf16>
    %51 = arith.truncf %45 : vector<64x16xf32> to vector<64x16xbf16>
    %cst_46 = arith.constant dense<0.000000e+00> : vector<64x64xf32>
    %52 = tpu.matmul %51, %50, %cst_46 {dimension_numbers = #tpu.dot_dimension_numbers<[1], [0], [0], [1], [0, 0, 1, 1], [], []>} : vector<64x16xbf16>, vector<16x64xbf16>, vector<64x64xf32> -> vector<64x64xf32>
    %53 = vector.broadcast %49 : f32 to vector<64x64xf32>
    %54 = arith.mulf %53, %52 : vector<64x64xf32>
    %55 = arith.addf %48, %54 : vector<64x64xf32>
    %c0_47 = arith.constant 0 : index
    %c0_48 = arith.constant 0 : index
    %56 = vector.load %arg12[%c0_47, %c0_48] : memref<64x64xbf16, #tpu.memory_space<vmem>>, vector<64x64xbf16>
    %57 = arith.truncf %55 : vector<64x64xf32> to vector<64x64xbf16>
    %cst_49 = arith.constant dense<0.000000e+00> : vector<64x64xf32>
    %58 = tpu.matmul %56, %57, %cst_49 {dimension_numbers = #tpu.dot_dimension_numbers<[1], [0], [0], [1], [0, 0, 1, 1], [], []>} : vector<64x64xbf16>, vector<64x64xbf16>, vector<64x64xf32> -> vector<64x64xf32>
    %c0_50 = arith.constant 0 : index
    %c0_51 = arith.constant 0 : index
    %59 = vector.load %arg13[%c0_50, %c0_51] : memref<64x1xf32, #tpu.memory_space<vmem>>, vector<64x1xf32>
    %60 = vector.broadcast %59 : vector<64x1xf32> to vector<64x64xf32>
    %61 = arith.addf %58, %60 : vector<64x64xf32>
    %cst_52 = arith.constant 0.000000e+00 : f32
    %62 = vector.broadcast %cst_52 : f32 to vector<64x64xf32>
    %63 = arith.maximumf %61, %62 : vector<64x64xf32>
    %c0_53 = arith.constant 0 : index
    %c2 = arith.constant 2 : index
    %64 = memref.load %arg1[%c0_53, %c2] : memref<5x3xf32, #tpu.memory_space<smem>>
    %65 = vector.broadcast %64 : f32 to vector<64x256xf32>
    %66 = arith.mulf %65, %4 : vector<64x256xf32>
    %c1_54 = arith.constant 1 : index
    %c2_55 = arith.constant 2 : index
    %67 = memref.load %arg1[%c1_54, %c2_55] : memref<5x3xf32, #tpu.memory_space<smem>>
    %c0_56 = arith.constant 0 : index
    %c0_57 = arith.constant 0 : index
    %68 = vector.load %arg32[%c0_56, %c0_57] : memref<64x256xbf16, #tpu.memory_space<vmem>>, vector<64x256xbf16>
    %69 = arith.truncf %63 : vector<64x64xf32> to vector<64x64xbf16>
    %cst_58 = arith.constant dense<0.000000e+00> : vector<64x256xf32>
    %70 = tpu.matmul %69, %68, %cst_58 {dimension_numbers = #tpu.dot_dimension_numbers<[1], [0], [0], [1], [0, 0, 1, 1], [], []>} : vector<64x64xbf16>, vector<64x256xbf16>, vector<64x256xf32> -> vector<64x256xf32>
    %71 = vector.broadcast %67 : f32 to vector<64x256xf32>
    %72 = arith.mulf %71, %70 : vector<64x256xf32>
    %73 = arith.addf %66, %72 : vector<64x256xf32>
    %c0_59 = arith.constant 0 : index
    %c0_60 = arith.constant 0 : index
    %74 = vector.load %arg10[%c0_59, %c0_60] : memref<64x64xbf16, #tpu.memory_space<vmem>>, vector<64x64xbf16>
    %75 = arith.truncf %73 : vector<64x256xf32> to vector<64x256xbf16>
    %cst_61 = arith.constant dense<0.000000e+00> : vector<64x256xf32>
    %76 = tpu.matmul %74, %75, %cst_61 {dimension_numbers = #tpu.dot_dimension_numbers<[1], [0], [0], [1], [0, 0, 1, 1], [], []>} : vector<64x64xbf16>, vector<64x256xbf16>, vector<64x256xf32> -> vector<64x256xf32>
    %c0_62 = arith.constant 0 : index
    %c0_63 = arith.constant 0 : index
    %77 = vector.load %arg11[%c0_62, %c0_63] : memref<64x1xf32, #tpu.memory_space<vmem>>, vector<64x1xf32>
    %78 = vector.broadcast %77 : vector<64x1xf32> to vector<64x256xf32>
    %79 = arith.addf %76, %78 : vector<64x256xf32>
    %cst_64 = arith.constant 0.000000e+00 : f32
    %80 = vector.broadcast %cst_64 : f32 to vector<64x256xf32>
    %81 = arith.maximumf %79, %80 : vector<64x256xf32>
    %c0_65 = arith.constant 0 : index
    %c0_66 = arith.constant 0 : index
    %82 = vector.load %arg18[%c0_65, %c0_66] : memref<64x64xbf16, #tpu.memory_space<vmem>>, vector<64x64xbf16>
    %83 = arith.truncf %81 : vector<64x256xf32> to vector<64x256xbf16>
    %cst_67 = arith.constant dense<0.000000e+00> : vector<64x256xf32>
    %84 = tpu.matmul %82, %83, %cst_67 {dimension_numbers = #tpu.dot_dimension_numbers<[1], [0], [0], [1], [0, 0, 1, 1], [], []>} : vector<64x64xbf16>, vector<64x256xbf16>, vector<64x256xf32> -> vector<64x256xf32>
    %c0_68 = arith.constant 0 : index
    %c0_69 = arith.constant 0 : index
    %85 = vector.load %arg19[%c0_68, %c0_69] : memref<64x1xf32, #tpu.memory_space<vmem>>, vector<64x1xf32>
    %86 = vector.broadcast %85 : vector<64x1xf32> to vector<64x256xf32>
    %87 = arith.addf %84, %86 : vector<64x256xf32>
    %cst_70 = arith.constant 0.000000e+00 : f32
    %88 = vector.broadcast %cst_70 : f32 to vector<64x256xf32>
    %89 = arith.maximumf %87, %88 : vector<64x256xf32>
    %c0_71 = arith.constant 0 : index
    %c0_72 = arith.constant 0 : index
    %90 = vector.load %arg26[%c0_71, %c0_72] : memref<936x64xbf16, #tpu.memory_space<vmem>>, vector<936x64xbf16>
    %91 = arith.truncf %89 : vector<64x256xf32> to vector<64x256xbf16>
    %cst_73 = arith.constant dense<0.000000e+00> : vector<936x256xf32>
    %92 = tpu.matmul %90, %91, %cst_73 {dimension_numbers = #tpu.dot_dimension_numbers<[1], [0], [0], [1], [0, 0, 1, 1], [], []>} : vector<936x64xbf16>, vector<64x256xbf16>, vector<936x256xf32> -> vector<936x256xf32>
    %c0_74 = arith.constant 0 : index
    %c0_75 = arith.constant 0 : index
    %c0_76 = arith.constant 0 : index
    %93 = vector.load %arg36[%c0_74, %c0_75, %c0_76] : memref<1x936x256xf32, #tpu.memory_space<vmem>>, vector<1x936x256xf32>
    %94 = vector.shape_cast %93 : vector<1x936x256xf32> to vector<936x256xf32>
    %95 = vector.shape_cast %92 : vector<936x256xf32> to vector<1x936x256xf32>
    tpu.vector_store %arg36[%c0_74, %c0_75, %c0_76], %95 {strides = array<i32>} : memref<1x936x256xf32, #tpu.memory_space<vmem>>, vector<1x936x256xf32>,
    %c2_77 = arith.constant 2 : index
    %c0_78 = arith.constant 0 : index
    %96 = memref.load %arg1[%c2_77, %c0_78] : memref<5x3xf32, #tpu.memory_space<smem>>
    %97 = vector.broadcast %96 : f32 to vector<64x64xf32>
    %98 = arith.mulf %97, %9 : vector<64x64xf32>
    %c3 = arith.constant 3 : index
    %c0_79 = arith.constant 0 : index
    %99 = memref.load %arg1[%c3, %c0_79] : memref<5x3xf32, #tpu.memory_space<smem>>
    %100 = vector.broadcast %99 : f32 to vector<64x64xf32>
    %101 = arith.mulf %100, %63 : vector<64x64xf32>
    %102 = arith.addf %98, %101 : vector<64x64xf32>
    %c4 = arith.constant 4 : index
    %c0_80 = arith.constant 0 : index
    %103 = memref.load %arg1[%c4, %c0_80] : memref<5x3xf32, #tpu.memory_space<smem>>
    %c0_81 = arith.constant 0 : index
    %c0_82 = arith.constant 0 : index
    %104 = vector.load %arg33[%c0_81, %c0_82] : memref<256x64xbf16, #tpu.memory_space<vmem>>, vector<256x64xbf16>
    %105 = arith.truncf %89 : vector<64x256xf32> to vector<64x256xbf16>
    %cst_83 = arith.constant dense<0.000000e+00> : vector<64x64xf32>
    %106 = tpu.matmul %105, %104, %cst_83 {dimension_numbers = #tpu.dot_dimension_numbers<[1], [0], [0], [1], [0, 0, 1, 1], [], []>} : vector<64x256xbf16>, vector<256x64xbf16>, vector<64x64xf32> -> vector<64x64xf32>
    %107 = vector.broadcast %103 : f32 to vector<64x64xf32>
    %108 = arith.mulf %107, %106 : vector<64x64xf32>
    %109 = arith.addf %102, %108 : vector<64x64xf32>
    %c0_84 = arith.constant 0 : index
    %c0_85 = arith.constant 0 : index
    %110 = vector.load %arg20[%c0_84, %c0_85] : memref<64x64xbf16, #tpu.memory_space<vmem>>, vector<64x64xbf16>
    %111 = arith.truncf %109 : vector<64x64xf32> to vector<64x64xbf16>
    %cst_86 = arith.constant dense<0.000000e+00> : vector<64x64xf32>
    %112 = tpu.matmul %110, %111, %cst_86 {dimension_numbers = #tpu.dot_dimension_numbers<[1], [0], [0], [1], [0, 0, 1, 1], [], []>} : vector<64x64xbf16>, vector<64x64xbf16>, vector<64x64xf32> -> vector<64x64xf32>
    %c0_87 = arith.constant 0 : index
    %c0_88 = arith.constant 0 : index
    %113 = vector.load %arg21[%c0_87, %c0_88] : memref<64x1xf32, #tpu.memory_space<vmem>>, vector<64x1xf32>
    %114 = vector.broadcast %113 : vector<64x1xf32> to vector<64x64xf32>
    %115 = arith.addf %112, %114 : vector<64x64xf32>
    %cst_89 = arith.constant 0.000000e+00 : f32
    %116 = vector.broadcast %cst_89 : f32 to vector<64x64xf32>
    %117 = arith.maximumf %115, %116 : vector<64x64xf32>
    %c0_90 = arith.constant 0 : index
    %c0_91 = arith.constant 0 : index
    %118 = vector.load %arg27[%c0_90, %c0_91] : memref<312x64xbf16, #tpu.memory_space<vmem>>, vector<312x64xbf16>
    %119 = arith.truncf %117 : vector<64x64xf32> to vector<64x64xbf16>
    %cst_92 = arith.constant dense<0.000000e+00> : vector<312x64xf32>
    %120 = tpu.matmul %118, %119, %cst_92 {dimension_numbers = #tpu.dot_dimension_numbers<[1], [0], [0], [1], [0, 0, 1, 1], [], []>} : vector<312x64xbf16>, vector<64x64xbf16>, vector<312x64xf32> -> vector<312x64xf32>
    %c0_93 = arith.constant 0 : index
    %c0_94 = arith.constant 0 : index
    %c0_95 = arith.constant 0 : index
    %121 = vector.load %arg37[%c0_93, %c0_94, %c0_95] : memref<1x312x64xf32, #tpu.memory_space<vmem>>, vector<1x312x64xf32>
    %122 = vector.shape_cast %121 : vector<1x312x64xf32> to vector<312x64xf32>
    %123 = vector.shape_cast %120 : vector<312x64xf32> to vector<1x312x64xf32>
    tpu.vector_store %arg37[%c0_93, %c0_94, %c0_95], %123 {strides = array<i32>} : memref<1x312x64xf32, #tpu.memory_space<vmem>>, vector<1x312x64xf32>,
    %c2_96 = arith.constant 2 : index
    %c1_97 = arith.constant 1 : index
    %124 = memref.load %arg1[%c2_96, %c1_97] : memref<5x3xf32, #tpu.memory_space<smem>>
    %125 = vector.broadcast %124 : f32 to vector<64x16xf32>
    %126 = arith.mulf %125, %14 : vector<64x16xf32>
    %c3_98 = arith.constant 3 : index
    %c1_99 = arith.constant 1 : index
    %127 = memref.load %arg1[%c3_98, %c1_99] : memref<5x3xf32, #tpu.memory_space<smem>>
    %128 = vector.broadcast %127 : f32 to vector<64x16xf32>
    %129 = arith.mulf %128, %45 : vector<64x16xf32>
    %130 = arith.addf %126, %129 : vector<64x16xf32>
    %c4_100 = arith.constant 4 : index
    %c1_101 = arith.constant 1 : index
    %131 = memref.load %arg1[%c4_100, %c1_101] : memref<5x3xf32, #tpu.memory_space<smem>>
    %c0_102 = arith.constant 0 : index
    %c0_103 = arith.constant 0 : index
    %132 = vector.load %arg34[%c0_102, %c0_103] : memref<64x16xbf16, #tpu.memory_space<vmem>>, vector<64x16xbf16>
    %133 = arith.truncf %117 : vector<64x64xf32> to vector<64x64xbf16>
    %cst_104 = arith.constant dense<0.000000e+00> : vector<64x16xf32>
    %134 = tpu.matmul %133, %132, %cst_104 {dimension_numbers = #tpu.dot_dimension_numbers<[1], [0], [0], [1], [0, 0, 1, 1], [], []>} : vector<64x64xbf16>, vector<64x16xbf16>, vector<64x16xf32> -> vector<64x16xf32>
    %135 = vector.broadcast %131 : f32 to vector<64x16xf32>
    %136 = arith.mulf %135, %134 : vector<64x16xf32>
    %137 = arith.addf %130, %136 : vector<64x16xf32>
    %c0_105 = arith.constant 0 : index
    %c0_106 = arith.constant 0 : index
    %138 = vector.load %arg22[%c0_105, %c0_106] : memref<64x64xbf16, #tpu.memory_space<vmem>>, vector<64x64xbf16>
    %139 = arith.truncf %137 : vector<64x16xf32> to vector<64x16xbf16>
    %cst_107 = arith.constant dense<0.000000e+00> : vector<64x16xf32>
    %140 = tpu.matmul %138, %139, %cst_107 {dimension_numbers = #tpu.dot_dimension_numbers<[1], [0], [0], [1], [0, 0, 1, 1], [], []>} : vector<64x64xbf16>, vector<64x16xbf16>, vector<64x16xf32> -> vector<64x16xf32>
    %c0_108 = arith.constant 0 : index
    %c0_109 = arith.constant 0 : index
    %141 = vector.load %arg23[%c0_108, %c0_109] : memref<64x1xf32, #tpu.memory_space<vmem>>, vector<64x1xf32>
    %142 = vector.broadcast %141 : vector<64x1xf32> to vector<64x16xf32>
    %143 = arith.addf %140, %142 : vector<64x16xf32>
    %cst_110 = arith.constant 0.000000e+00 : f32
    %144 = vector.broadcast %cst_110 : f32 to vector<64x16xf32>
    %145 = arith.maximumf %143, %144 : vector<64x16xf32>
    %c0_111 = arith.constant 0 : index
    %c0_112 = arith.constant 0 : index
    %146 = vector.load %arg28[%c0_111, %c0_112] : memref<104x64xbf16, #tpu.memory_space<vmem>>, vector<104x64xbf16>
    %147 = arith.truncf %145 : vector<64x16xf32> to vector<64x16xbf16>
    %cst_113 = arith.constant dense<0.000000e+00> : vector<104x16xf32>
    %148 = tpu.matmul %146, %147, %cst_113 {dimension_numbers = #tpu.dot_dimension_numbers<[1], [0], [0], [1], [0, 0, 1, 1], [], []>} : vector<104x64xbf16>, vector<64x16xbf16>, vector<104x16xf32> -> vector<104x16xf32>
    %c0_114 = arith.constant 0 : index
    %c0_115 = arith.constant 0 : index
    %c0_116 = arith.constant 0 : index
    %149 = vector.load %arg38[%c0_114, %c0_115, %c0_116] : memref<1x104x16xf32, #tpu.memory_space<vmem>>, vector<1x104x16xf32>
    %150 = vector.shape_cast %149 : vector<1x104x16xf32> to vector<104x16xf32>
    %151 = vector.shape_cast %148 : vector<104x16xf32> to vector<1x104x16xf32>
    tpu.vector_store %arg38[%c0_114, %c0_115, %c0_116], %151 {strides = array<i32>} : memref<1x104x16xf32, #tpu.memory_space<vmem>>, vector<1x104x16xf32>,
    %c2_117 = arith.constant 2 : index
    %c2_118 = arith.constant 2 : index
    %152 = memref.load %arg1[%c2_117, %c2_118] : memref<5x3xf32, #tpu.memory_space<smem>>
    %153 = vector.broadcast %152 : f32 to vector<64x4xf32>
    %154 = arith.mulf %153, %19 : vector<64x4xf32>
    %c3_119 = arith.constant 3 : index
    %c2_120 = arith.constant 2 : index
    %155 = memref.load %arg1[%c3_119, %c2_120] : memref<5x3xf32, #tpu.memory_space<smem>>
    %156 = vector.broadcast %155 : f32 to vector<64x4xf32>
    %157 = arith.mulf %156, %27 : vector<64x4xf32>
    %158 = arith.addf %154, %157 : vector<64x4xf32>
    %c4_121 = arith.constant 4 : index
    %c2_122 = arith.constant 2 : index
    %159 = memref.load %arg1[%c4_121, %c2_122] : memref<5x3xf32, #tpu.memory_space<smem>>
    %c0_123 = arith.constant 0 : index
    %c0_124 = arith.constant 0 : index
    %160 = vector.load %arg35[%c0_123, %c0_124] : memref<16x4xbf16, #tpu.memory_space<vmem>>, vector<16x4xbf16>
    %161 = arith.truncf %145 : vector<64x16xf32> to vector<64x16xbf16>
    %cst_125 = arith.constant dense<0.000000e+00> : vector<64x4xf32>
    %162 = tpu.matmul %161, %160, %cst_125 {dimension_numbers = #tpu.dot_dimension_numbers<[1], [0], [0], [1], [0, 0, 1, 1], [], []>} : vector<64x16xbf16>, vector<16x4xbf16>, vector<64x4xf32> -> vector<64x4xf32>
    %163 = vector.broadcast %159 : f32 to vector<64x4xf32>
    %164 = arith.mulf %163, %162 : vector<64x4xf32>
    %165 = arith.addf %158, %164 : vector<64x4xf32>
    %c0_126 = arith.constant 0 : index
    %c0_127 = arith.constant 0 : index
    %166 = vector.load %arg24[%c0_126, %c0_127] : memref<64x64xbf16, #tpu.memory_space<vmem>>, vector<64x64xbf16>
    %167 = arith.truncf %165 : vector<64x4xf32> to vector<64x4xbf16>
    %cst_128 = arith.constant dense<0.000000e+00> : vector<64x4xf32>
    %168 = tpu.matmul %166, %167, %cst_128 {dimension_numbers = #tpu.dot_dimension_numbers<[1], [0], [0], [1], [0, 0, 1, 1], [], []>} : vector<64x64xbf16>, vector<64x4xbf16>, vector<64x4xf32> -> vector<64x4xf32>
    %c0_129 = arith.constant 0 : index
    %c0_130 = arith.constant 0 : index
    %169 = vector.load %arg25[%c0_129, %c0_130] : memref<64x1xf32, #tpu.memory_space<vmem>>, vector<64x1xf32>
    %170 = vector.broadcast %169 : vector<64x1xf32> to vector<64x4xf32>
    %171 = arith.addf %168, %170 : vector<64x4xf32>
    %cst_131 = arith.constant 0.000000e+00 : f32
    %172 = vector.broadcast %cst_131 : f32 to vector<64x4xf32>
    %173 = arith.maximumf %171, %172 : vector<64x4xf32>
    %c0_132 = arith.constant 0 : index
    %c0_133 = arith.constant 0 : index
    %174 = vector.load %arg29[%c0_132, %c0_133] : memref<36x64xbf16, #tpu.memory_space<vmem>>, vector<36x64xbf16>
    %175 = arith.truncf %173 : vector<64x4xf32> to vector<64x4xbf16>
    %cst_134 = arith.constant dense<0.000000e+00> : vector<36x4xf32>
    %176 = tpu.matmul %174, %175, %cst_134 {dimension_numbers = #tpu.dot_dimension_numbers<[1], [0], [0], [1], [0, 0, 1, 1], [], []>} : vector<36x64xbf16>, vector<64x4xbf16>, vector<36x4xf32> -> vector<36x4xf32>
    %c0_135 = arith.constant 0 : index
    %c0_136 = arith.constant 0 : index
    %c0_137 = arith.constant 0 : index
    %177 = vector.load %arg39[%c0_135, %c0_136, %c0_137] : memref<1x36x4xf32, #tpu.memory_space<vmem>>, vector<1x36x4xf32>
    %178 = vector.shape_cast %177 : vector<1x36x4xf32> to vector<36x4xf32>
    %179 = vector.shape_cast %176 : vector<36x4xf32> to vector<1x36x4xf32>
    tpu.vector_store %arg39[%c0_135, %c0_136, %c0_137], %179 {strides = array<i32>} : memref<1x36x4xf32, #tpu.memory_space<vmem>>, vector<1x36x4xf32>,
    return
  }
  func.func @transform_0(%arg0: i32) -> (i32, i32) {
    %c0_i32 = arith.constant 0 : i32
    %c0_i32_0 = arith.constant 0 : i32
    %c0_i32_1 = arith.constant 0 : i32
    return %c0_i32, %c0_i32_0 : i32, i32
  }
  func.func @transform_1(%arg0: i32) -> (i32, i32, i32) {
    %c0_i32 = arith.constant 0 : i32
    %c0_i32_0 = arith.constant 0 : i32
    %c0_i32_1 = arith.constant 0 : i32
    return %arg0, %c0_i32, %c0_i32_0 : i32, i32, i32
  }
  func.func @transform_2(%arg0: i32) -> (i32, i32, i32) {
    %c0_i32 = arith.constant 0 : i32
    %c0_i32_0 = arith.constant 0 : i32
    %c0_i32_1 = arith.constant 0 : i32
    return %arg0, %c0_i32, %c0_i32_0 : i32, i32, i32
  }
  func.func @transform_3(%arg0: i32) -> (i32, i32, i32) {
    %c0_i32 = arith.constant 0 : i32
    %c0_i32_0 = arith.constant 0 : i32
    %c0_i32_1 = arith.constant 0 : i32
    return %arg0, %c0_i32, %c0_i32_0 : i32, i32, i32
  }
  func.func @transform_4(%arg0: i32) -> (i32, i32, i32) {
    %c0_i32 = arith.constant 0 : i32
    %c0_i32_0 = arith.constant 0 : i32
    %c0_i32_1 = arith.constant 0 : i32
    return %arg0, %c0_i32, %c0_i32_0 : i32, i32, i32
  }
  func.func @transform_5(%arg0: i32) -> (i32, i32) {
    %c0_i32 = arith.constant 0 : i32
    %c0_i32_0 = arith.constant 0 : i32
    %c0_i32_1 = arith.constant 0 : i32
    return %c0_i32, %c0_i32_0 : i32, i32
  }
  func.func @transform_6(%arg0: i32) -> (i32, i32) {
    %c0_i32 = arith.constant 0 : i32
    %c0_i32_0 = arith.constant 0 : i32
    %c0_i32_1 = arith.constant 0 : i32
    return %c0_i32, %c0_i32_0 : i32, i32
  }
  func.func @transform_7(%arg0: i32) -> (i32, i32) {
    %c0_i32 = arith.constant 0 : i32
    %c0_i32_0 = arith.constant 0 : i32
    %c0_i32_1 = arith.constant 0 : i32
    return %c0_i32, %c0_i32_0 : i32, i32
  }
  func.func @transform_8(%arg0: i32) -> (i32, i32) {
    %c0_i32 = arith.constant 0 : i32
    %c0_i32_0 = arith.constant 0 : i32
    %c0_i32_1 = arith.constant 0 : i32
    return %c0_i32, %c0_i32_0 : i32, i32
  }
  func.func @transform_9(%arg0: i32) -> (i32, i32) {
    %c0_i32 = arith.constant 0 : i32
    %c0_i32_0 = arith.constant 0 : i32
    %c0_i32_1 = arith.constant 0 : i32
    return %c0_i32, %c0_i32_0 : i32, i32
  }
  func.func @transform_10(%arg0: i32) -> (i32, i32) {
    %c0_i32 = arith.constant 0 : i32
    %c0_i32_0 = arith.constant 0 : i32
    %c0_i32_1 = arith.constant 0 : i32
    return %c0_i32, %c0_i32_0 : i32, i32
  }
  func.func @transform_11(%arg0: i32) -> (i32, i32) {
    %c0_i32 = arith.constant 0 : i32
    %c0_i32_0 = arith.constant 0 : i32
    %c0_i32_1 = arith.constant 0 : i32
    return %c0_i32, %c0_i32_0 : i32, i32
  }
  func.func @transform_12(%arg0: i32) -> (i32, i32) {
    %c0_i32 = arith.constant 0 : i32
    %c0_i32_0 = arith.constant 0 : i32
    %c0_i32_1 = arith.constant 0 : i32
    return %c0_i32, %c0_i32_0 : i32, i32
  }
  func.func @transform_13(%arg0: i32) -> (i32, i32) {
    %c0_i32 = arith.constant 0 : i32
    %c0_i32_0 = arith.constant 0 : i32
    %c0_i32_1 = arith.constant 0 : i32
    return %c0_i32, %c0_i32_0 : i32, i32
  }
  func.func @transform_14(%arg0: i32) -> (i32, i32) {
    %c0_i32 = arith.constant 0 : i32
    %c0_i32_0 = arith.constant 0 : i32
    %c0_i32_1 = arith.constant 0 : i32
    return %c0_i32, %c0_i32_0 : i32, i32
  }
  func.func @transform_15(%arg0: i32) -> (i32, i32) {
    %c0_i32 = arith.constant 0 : i32
    %c0_i32_0 = arith.constant 0 : i32
    %c0_i32_1 = arith.constant 0 : i32
    return %c0_i32, %c0_i32_0 : i32, i32
  }
  func.func @transform_16(%arg0: i32) -> (i32, i32) {
    %c0_i32 = arith.constant 0 : i32
    %c0_i32_0 = arith.constant 0 : i32
    %c0_i32_1 = arith.constant 0 : i32
    return %c0_i32, %c0_i32_0 : i32, i32
  }
  func.func @transform_17(%arg0: i32) -> (i32, i32) {
    %c0_i32 = arith.constant 0 : i32
    %c0_i32_0 = arith.constant 0 : i32
    %c0_i32_1 = arith.constant 0 : i32
    return %c0_i32, %c0_i32_0 : i32, i32
  }
  func.func @transform_18(%arg0: i32) -> (i32, i32) {
    %c0_i32 = arith.constant 0 : i32
    %c0_i32_0 = arith.constant 0 : i32
    %c0_i32_1 = arith.constant 0 : i32
    return %c0_i32, %c0_i32_0 : i32, i32
  }
  func.func @transform_19(%arg0: i32) -> (i32, i32) {
    %c0_i32 = arith.constant 0 : i32
    %c0_i32_0 = arith.constant 0 : i32
    %c0_i32_1 = arith.constant 0 : i32
    return %c0_i32, %c0_i32_0 : i32, i32
  }
  func.func @transform_20(%arg0: i32) -> (i32, i32) {
    %c0_i32 = arith.constant 0 : i32
    %c0_i32_0 = arith.constant 0 : i32
    %c0_i32_1 = arith.constant 0 : i32
    return %c0_i32, %c0_i32_0 : i32, i32
  }
  func.func @transform_21(%arg0: i32) -> (i32, i32) {
    %c0_i32 = arith.constant 0 : i32
    %c0_i32_0 = arith.constant 0 : i32
    %c0_i32_1 = arith.constant 0 : i32
    return %c0_i32, %c0_i32_0 : i32, i32
  }
  func.func @transform_22(%arg0: i32) -> (i32, i32) {
    %c0_i32 = arith.constant 0 : i32
    %c0_i32_0 = arith.constant 0 : i32
    %c0_i32_1 = arith.constant 0 : i32
    return %c0_i32, %c0_i32_0 : i32, i32
  }
  func.func @transform_23(%arg0: i32) -> (i32, i32) {
    %c0_i32 = arith.constant 0 : i32
    %c0_i32_0 = arith.constant 0 : i32
    %c0_i32_1 = arith.constant 0 : i32
    return %c0_i32, %c0_i32_0 : i32, i32
  }
  func.func @transform_24(%arg0: i32) -> (i32, i32) {
    %c0_i32 = arith.constant 0 : i32
    %c0_i32_0 = arith.constant 0 : i32
    %c0_i32_1 = arith.constant 0 : i32
    return %c0_i32, %c0_i32_0 : i32, i32
  }
  func.func @transform_25(%arg0: i32) -> (i32, i32) {
    %c0_i32 = arith.constant 0 : i32
    %c0_i32_0 = arith.constant 0 : i32
    %c0_i32_1 = arith.constant 0 : i32
    return %c0_i32, %c0_i32_0 : i32, i32
  }
  func.func @transform_26(%arg0: i32) -> (i32, i32) {
    %c0_i32 = arith.constant 0 : i32
    %c0_i32_0 = arith.constant 0 : i32
    %c0_i32_1 = arith.constant 0 : i32
    return %c0_i32, %c0_i32_0 : i32, i32
  }
  func.func @transform_27(%arg0: i32) -> (i32, i32) {
    %c0_i32 = arith.constant 0 : i32
    %c0_i32_0 = arith.constant 0 : i32
    %c0_i32_1 = arith.constant 0 : i32
    return %c0_i32, %c0_i32_0 : i32, i32
  }
  func.func @transform_28(%arg0: i32) -> (i32, i32) {
    %c0_i32 = arith.constant 0 : i32
    %c0_i32_0 = arith.constant 0 : i32
    %c0_i32_1 = arith.constant 0 : i32
    return %c0_i32, %c0_i32_0 : i32, i32
  }
  func.func @transform_29(%arg0: i32) -> (i32, i32) {
    %c0_i32 = arith.constant 0 : i32
    %c0_i32_0 = arith.constant 0 : i32
    %c0_i32_1 = arith.constant 0 : i32
    return %c0_i32, %c0_i32_0 : i32, i32
  }
  func.func @transform_30(%arg0: i32) -> (i32, i32) {
    %c0_i32 = arith.constant 0 : i32
    %c0_i32_0 = arith.constant 0 : i32
    %c0_i32_1 = arith.constant 0 : i32
    return %c0_i32, %c0_i32_0 : i32, i32
  }
  func.func @transform_31(%arg0: i32) -> (i32, i32) {
    %c0_i32 = arith.constant 0 : i32
    %c0_i32_0 = arith.constant 0 : i32
    %c0_i32_1 = arith.constant 0 : i32
    return %c0_i32, %c0_i32_0 : i32, i32
  }
  func.func @transform_32(%arg0: i32) -> (i32, i32) {
    %c0_i32 = arith.constant 0 : i32
    %c0_i32_0 = arith.constant 0 : i32
    %c0_i32_1 = arith.constant 0 : i32
    return %c0_i32, %c0_i32_0 : i32, i32
  }
  func.func @transform_33(%arg0: i32) -> (i32, i32) {
    %c0_i32 = arith.constant 0 : i32
    %c0_i32_0 = arith.constant 0 : i32
    %c0_i32_1 = arith.constant 0 : i32
    return %c0_i32, %c0_i32_0 : i32, i32
  }
  func.func @transform_34(%arg0: i32) -> (i32, i32) {
    %c0_i32 = arith.constant 0 : i32
    %c0_i32_0 = arith.constant 0 : i32
    %c0_i32_1 = arith.constant 0 : i32
    return %c0_i32, %c0_i32_0 : i32, i32
  }
  func.func @transform_35(%arg0: i32) -> (i32, i32, i32) {
    %c0_i32 = arith.constant 0 : i32
    %c0_i32_0 = arith.constant 0 : i32
    %c0_i32_1 = arith.constant 0 : i32
    return %arg0, %c0_i32, %c0_i32_0 : i32, i32, i32
  }
  func.func @transform_36(%arg0: i32) -> (i32, i32, i32) {
    %c0_i32 = arith.constant 0 : i32
    %c0_i32_0 = arith.constant 0 : i32
    %c0_i32_1 = arith.constant 0 : i32
    return %arg0, %c0_i32, %c0_i32_0 : i32, i32, i32
  }
  func.func @transform_37(%arg0: i32) -> (i32, i32, i32) {
    %c0_i32 = arith.constant 0 : i32
    %c0_i32_0 = arith.constant 0 : i32
    %c0_i32_1 = arith.constant 0 : i32
    return %arg0, %c0_i32, %c0_i32_0 : i32, i32, i32
  }
  func.func @transform_38(%arg0: i32) -> (i32, i32, i32) {
    %c0_i32 = arith.constant 0 : i32
    %c0_i32_0 = arith.constant 0 : i32
    %c0_i32_1 = arith.constant 0 : i32
    return %arg0, %c0_i32, %c0_i32_0 : i32, i32, i32
  }
}

</mosaic_0001>

<bundles_post_ra>
// kernel: bifpn_block.1
= control target key start
LH: loop header
LB: loop body
LE: loop exit
PB: predicated region body
PF: predicated region fallthrough
CT: control target
= control target key end

     0   :  { %s8582_s6 = smov 1   ;;  %s8583_s10 = smov 2   ;;  %s10399_s0 = inlined_call_operand.smem [shape: u32[39], index: -1, kind: input, shape index: {}] }
   0x1   :  { %s8632_s5 = sld [smem:[%s10399_s0]]   ;;  %s8584_s14 = smov 3  }
   0x2   :  { %s8637_s9 = sld [smem:[%s10399_s0 + %s8582_s6]]   ;;  %s8585_s18 = smov 4  }
   0x3   :  { %s8642_s13 = sld [smem:[%s10399_s0 + %s8583_s10]]   ;;  %s8586_s22 = smov 5  }
   0x4   :  { %s8647_s17 = sld [smem:[%s10399_s0 + %s8584_s14]]   ;;  %s8587_s26 = smov 6  }
   0x5   :  { %s8652_s21 = sld [smem:[%s10399_s0 + %s8585_s18]]   ;;  %s8588_s30 = smov 7  }
   0x6   :  { %s8657_s25 = sld [smem:[%s10399_s0 + %s8586_s22]]   ;;  %s8589_s4 = smov 8  }
   0x7   :  { %10431 = sst [smem:[#allocation5_spill]] %s8632_s5  ;;  %s8590_s10 = smov 9  }
   0x8   :  { %10432 = sst [smem:[#allocation6_spill]] %s8637_s9  ;;  %s8591_s15 = smov 10  }
   0x9   :  { %s8662_s29 = sld [smem:[%s10399_s0 + %s8587_s26]]   ;;  %s8592_s20 = smov 11  }
   0xa   :  { %s8667_s3 = sld [smem:[%s10399_s0 + %s8588_s30]]   ;;  %s8593_s26 = smov 12  }
   0xb   :  { %s8672_s8 = sld [smem:[%s10399_s0 + %s8589_s4]]   ;;  %s8594_s1 = smov 13  }
   0xc   :  { %10433 = sst [smem:[#allocation7_spill]] %s8657_s25  ;;  %s8595_s7 = smov 14  }
   0xd   :  { %s8677_s14 = sld [smem:[%s10399_s0 + %s8590_s10]]   ;;  %s8597_s22 = smov 16  }
   0xe   :  { %s8682_s19 = sld [smem:[%s10399_s0 + %s8591_s15]]   ;;  %s8596_s15 = smov 15  }
   0xf   :  { %s8687_s24 = sld [smem:[%s10399_s0 + %s8592_s20]]   ;;  %s8598_s28 = smov 17  }
  0x10   :  { %10434 = sst [smem:[#allocation8_spill]] %s8667_s3 }
  0x11   :  { %s8692_s30 = sld [smem:[%s10399_s0 + %s8593_s26]]  }
  0x12   :  { %s8697_s6 = sld [smem:[%s10399_s0 + %s8594_s1]]  }
  0x13   :  { %10435 = sst [smem:[#allocation9_spill]] %s8677_s14 }
  0x14   :  { %s8702_s12 = sld [smem:[%s10399_s0 + %s8595_s7]]   ;;  %s8599_s7 = smov 18  }
  0x15   :  { %10436 = sst [smem:[#allocation10_spill]] %s8687_s24 }
  0x16   :  { %s8707_s20 = sld [smem:[%s10399_s0 + %s8596_s15]]   ;;  %s8600_s15 = smov 19  }
  0x17   :  { %s8712_s27 = sld [smem:[%s10399_s0 + %s8597_s22]]   ;;  %s8601_s22 = smov 20  }
  0x18   :  { %10437 = sst [smem:[#allocation11_spill]] %s8697_s6 }
  0x19   :  { %s8717_s4 = sld [smem:[%s10399_s0 + %s8598_s28]]   ;;  %s8602_s28 = smov 21  }
  0x1a   :  { %s8722_s14 = sld [smem:[%s10399_s0 + %s8599_s7]]   ;;  %s8603_s7 = smov 22  }
  0x1b   :  { %s8727_s24 = sld [smem:[%s10399_s0 + %s8600_s15]]   ;;  %s8604_s15 = smov 23  }
  0x1c   :  { %s8732_s25 = sld [smem:[%s10399_s0 + %s8601_s22]]   ;;  %s8605_s22 = smov 24  }
  0x1d   :  { %s8742_s9 = sld [smem:[%s10399_s0 + %s8603_s7]]   ;;  %s8607_s7 = smov 26  }
  0x1e   :  { %s8752_s6 = sld [smem:[%s10399_s0 + %s8605_s22]]   ;;  %s8609_s22 = smov 28  }
  0x1f   :  { %10438 = sst [smem:[#allocation12_spill]] %s8717_s4 }
  0x20   :  { %s8737_s4 = sld [smem:[%s10399_s0 + %s8602_s28]]   ;;  %s8606_s28 = smov 25  }
  0x21   :  { %10439 = sst [smem:[#allocation13_spill]] %s8727_s24 }
  0x22   :  { %s8747_s24 = sld [smem:[%s10399_s0 + %s8604_s15]]   ;;  %s8608_s15 = smov 27  }
  0x23   :  { %10441 = sst [smem:[#allocation15_spill]] %s8742_s9 }
  0x24   :  { %10443 = sst [smem:[#allocation17_spill]] %s8752_s6 }
  0x25   :  { %s8762_s9 = sld [smem:[%s10399_s0 + %s8607_s7]]   ;;  %s8611_s7 = smov 30  }
  0x26   :  { %10440 = sst [smem:[#allocation14_spill]] %s8737_s4 }
  0x27   :  { %s8757_s4 = sld [smem:[%s10399_s0 + %s8606_s28]]   ;;  %s8610_s28 = smov 29  }
  0x28   :  { %10442 = sst [smem:[#allocation16_spill]] %s8747_s24 }
  0x29   :  { %s8767_s24 = sld [smem:[%s10399_s0 + %s8608_s15]]   ;;  %s8612_s15 = smov 31  }
  0x2a   :  { %s8772_s6 = sld [smem:[%s10399_s0 + %s8609_s22]]   ;;  %s8613_s22 = smov 32  }
  0x2b   :  { %10445 = sst [smem:[#allocation19_spill]] %s8762_s9 }
  0x2c   :  { %s8782_s9 = sld [smem:[%s10399_s0 + %s8611_s7]]   ;;  %s8615_s7 = smov 34  }
  0x2d   :  { %10444 = sst [smem:[#allocation18_spill]] %s8757_s4 }
  0x2e   :  { %s8777_s4 = sld [smem:[%s10399_s0 + %s8610_s28]]   ;;  %s8614_s28 = smov 33  }
  0x2f   :  { %10446 = sst [smem:[#allocation20_spill]] %s8767_s24 }
  0x30   :  { %10447 = sst [smem:[#allocation21_spill]] %s8772_s6 }
  0x31   :  { %s8787_s24 = sld [smem:[%s10399_s0 + %s8612_s15]]   ;;  %s8616_s15 = smov 35  }
  0x32   :  { %10449 = sst [smem:[#allocation23_spill]] %s8782_s9 }
  0x33   :  { %s8792_s6 = sld [smem:[%s10399_s0 + %s8613_s22]]   ;;  %s8617_s22 = smov 36  }
  0x34   :  { %10448 = sst [smem:[#allocation22_spill]] %s8777_s4 }
  0x35   :  { %s8797_s4 = sld [smem:[%s10399_s0 + %s8614_s28]]   ;;  %s8618_s28 = smov 37  }
  0x36   :  { %s8802_s9 = sld [smem:[%s10399_s0 + %s8615_s7]]   ;;  %s8619_s7 = smov 38  }
  0x37   :  { %10450 = sst [smem:[#allocation24_spill]] %s8787_s24 }
  0x38   :  { %s8807_s24 = sld [smem:[%s10399_s0 + %s8616_s15]]  }
  0x39   :  { %10451 = sst [smem:[#allocation25_spill]] %s8792_s6 }
  0x3a   :  { %s8812_s6 = sld [smem:[%s10399_s0 + %s8617_s22]]  }
  0x3b   :  { %10452 = sst [smem:[#allocation26_spill]] %s8797_s4 }
  0x3c   :  { %10453 = sst [smem:[#allocation27_spill]] %s8802_s9 }
  0x3d   :  { %s8817_s4 = sld [smem:[%s10399_s0 + %s8618_s28]]  }
  0x3e   :  { %s8822_s9 = sld [smem:[%s10399_s0 + %s8619_s7]]  }
  0x3f   :  { %83 = vsyncpa [#allocation3], 0  ;;  %s8824_s15 = smov 0  }
  0x40 LB: > { %s10454_s3 = sld [smem:[#allocation8_spill]]  ;;  %s10455_s5 = sld [smem:[#allocation5_spill]]  ;;  %s8580_s15 = sphi %s8824_s15, %s89_s15  }
  0x41   : > { %s7341_s16 = sadd.s32 4294967295, %s8580_s15   ;;  %p7343_p0 = scmp.ge.s32.totalorder %s8580_s15, 1 }
  0x42   : > { %p953_p1 = scmp.lt.s32.totalorder %s8580_s15, 3  ;;  %p8322_p3 = scmp.eq.s32.totalorder %s7341_s16, 0 }
  0x44   : > { %p8833_p2 = pnand %p7343_p0, %p953_p1 }
  0x46   : > { %s966_s18 = sshll.u32 %s10455_s5, 4  ;;  %p8318_p4 = pneg %p8833_p2  ;;  %s967_s18 = int_to_ptr.vmem [resolvable:$true] %s966_s18 }
  0x47   : > { %s8555_s0 = scalar_lea.vmem %s967_s18, 128  ;;  %p8563_p10 = scmp.lt.s32.totalorder %s967_s18, %s967_s18 }
  0x48   : > { %p8319_p5 = pnand %p8322_p3, %p8318_p4  ;;  %p8556_p6 = scmp.ne.s32.totalorder %s967_s18, %s8555_s0 }
  0x49   : > { %p8564_p11 = scmp.lt.s32.totalorder %s8555_s0, %s8555_s0 }
  0x4a   : > { %p8557_p7 = pneg %p8319_p5 }
  0x4b   : > { %p8565_p12 = por %p8564_p11, %p8563_p10 }
  0x4c   : > { %p8558_p8 = pnand %p8557_p7, %p8556_p6 }
  0x4e   : > { %p8559_p9 = pneg %p8558_p8 }
  0x50   : > { %p8566_p13 = pnand %p8565_p12, %p8559_p9 }
  0x52   : > { %8569 = shalt.err (!%p8566_p13)
}
  0x53   : > { %s8620_s23 = smov [#allocation2]   ;;  %1101 = sbr.rel (%p8833_p2) target bundleno = 4210 (0x1072), region = 160 }
  0x54   : > { %8321 = dma.vmem_to_smem (!%p8319_p5), %s967_s18, 128, %s8620_s23, [#allocation3]  }
  0x5a   : > { %8575 = dma.done.wait (%p8322_p3), [#allocation3], 128  }
  0x5b   : > { %8577 = vsyncadd (%p8322_p3), [#allocation3], 4294967168 }
  0x5c   : > { %1107 = sfence }
  0x5d   : > { %p1226_p0 = scmp.lt.s32.totalorder %s7341_s16, 1  ;;  %v8378_v0 = vld [vmem:[%s8662_s29 + $0x4] ss:$12 sps:$4 sm:$0xff]   ;;  %vm1820_vm0 = vcmask 1043456   ;;  %vm2578_vm1 = vcmask 1041408   ;;  %vm2254_vm2 = vcmask 457728  }
  0x5e   : > { %2302 = vmatprep.mubr.bf16.mxu1 %v8378_v0  ;;  %v8376_v53 = vld [vmem:[%s8662_s29] ss:$12 sps:$4 sm:$0xff]   ;;  %v8379_v56 = vld [vmem:[%s8662_s29 + $0x1c] ss:$12 sps:$4 sm:$0xff]   ;;  %vm2448_vm3 = vcmask 850944   ;;  %vm2565_vm4 = vcmask 293888  }
  0x5f   : > { %s10486_s16 = smov (!%p1226_p0, %s7341_s16), 1  ;;  %vm2727_vm5 = vcmask 523264   ;;  %s10457_s11 = sld [smem:[#allocation15_spill]]  ;;  %vm2829_vm6 = vcmask 31744   ;;  %vm3115_vm7 = vcmask 130048   ;;  %vm1807_vm8 = vcmask 326656  }
  0x60   : > { %s10421_s26 = smul.u32 312, %s10486_s16  ;;  %s10458_s18 = sld [smem:[#allocation17_spill]]  ;;  %vm8623_vm9 = vmmov 0   ;;  %vm7099_vm10 = vcmask 27648  }
  0x61   : > { %s10420_s1 = smul.u32 104, %s10486_s16  ;;  %s10459_s22 = sld [smem:[#allocation22_spill]] }
  0x62   : > { %s8851_s28 = scalar_lea.vmem %s8642_s13, %s10421_s26  ;;  %s10417_s2 = smul.u32 40, %s10486_s16 }
  0x63   : > { %v2151_v1 = vld [vmem:[%s8851_s28 + $0x80] sm:$0xff]  ;;  %v2152_v2 = vld [vmem:[%s8851_s28 + $0x88] sm:$0xff]  ;;  %v2153_v6 = vld [vmem:[%s8851_s28 + $0x90] sm:$0xff]  ;;  %s8896_s7 = scalar_lea.vmem %s8647_s17, %s10420_s1  ;;  %s7709_s0 = sld [smem:[#allocation2 + $0x102]] }
  0x64   : > { %v2135_v3 = vld [vmem:[%s8851_s28] sm:$0xff]  ;;  %v2182_v4 = vpack.c.bf16 %v2152_v2, %v2151_v1  ;;  %v2136_v5 = vld [vmem:[%s8851_s28 + $0x8] sm:$0xff]  ;;  %v2154_v7 = vld [vmem:[%s8851_s28 + $0x98] sm:$0xff]  ;;  %s8901_s10 = scalar_lea.vmem %s8652_s21, %s10417_s2  ;;  %s7710_s23 = sld [smem:[#allocation2 + $0x182]] }
  0x65   : > { %v2174_v8 = vpack.c.bf16 %v2136_v5, %v2135_v3  ;;  %v2183_v9 = vpack.c.bf16 %v2154_v7, %v2153_v6  ;;  %v2137_v10 = vld [vmem:[%s8851_s28 + $0x10] sm:$0xff]  ;;  %v2138_v11 = vld [vmem:[%s8851_s28 + $0x18] sm:$0xff]  ;;  %v2155_v12 = vld [vmem:[%s8851_s28 + $0xa0] sm:$0xff]  ;;  %s7610_s2 = sld [smem:[#allocation2 + $0x180]]  ;;  %s10470_s1 = sld [smem:[#allocation25_spill]] }
  0x66   : > { %7733 = vmatprep.subr.bf16.mxu1 %v2182_v4  ;;  %v2156_v13 = vld [vmem:[%s8851_s28 + $0xa8] sm:$0xff]  ;;  %v2175_v14 = vpack.c.bf16 %v2138_v11, %v2137_v10  ;;  %v2139_v16 = vld [vmem:[%s8851_s28 + $0x20] sm:$0xff]  ;;  %v2157_v18 = vld [vmem:[%s8851_s28 + $0xb0] sm:$0xff]  ;;  %s10471_s26 = sld [smem:[#allocation18_spill]] }
  0x67   : > { %7734 = vmatpush3.bf16.msra.mxu1 %v2174_v8  ;;  %v2184_v15 = vpack.c.bf16 %v2156_v13, %v2155_v12  ;;  %v2140_v17 = vld [vmem:[%s8851_s28 + $0x28] sm:$0xff]  ;;  %v2158_v19 = vld [vmem:[%s8851_s28 + $0xb8] sm:$0xff]  ;;  %v2141_v22 = vld [vmem:[%s8851_s28 + $0x30] sm:$0xff] }
  0x68   : > { %7735 = vmatprep.subr.bf16.mxu1 %v2183_v9  ;;  %v2176_v20 = vpack.c.bf16 %v2140_v17, %v2139_v16  ;;  %v2185_v21 = vpack.c.bf16 %v2158_v19, %v2157_v18  ;;  %v2142_v23 = vld [vmem:[%s8851_s28 + $0x38] sm:$0xff]  ;;  %v2159_v24 = vld [vmem:[%s8851_s28 + $0xc0] sm:$0xff]  ;;  %v2160_v25 = vld [vmem:[%s8851_s28 + $0xc8] sm:$0xff] }
  0x69   : > { %v2177_v26 = vpack.c.bf16 %v2142_v23, %v2141_v22  ;;  %v2186_v27 = vpack.c.bf16 %v2160_v25, %v2159_v24  ;;  %v2143_v28 = vld [vmem:[%s8851_s28 + $0x40] sm:$0xff]  ;;  %v2144_v29 = vld [vmem:[%s8851_s28 + $0x48] sm:$0xff]  ;;  %v2161_v30 = vld [vmem:[%s8851_s28 + $0xd0] sm:$0xff] }
  0x6a   : > { %v2162_v31 = vld [vmem:[%s8851_s28 + $0xd8] sm:$0xff]  ;;  %v2178_v32 = vpack.c.bf16 %v2144_v29, %v2143_v28  ;;  %v2145_v34 = vld [vmem:[%s8851_s28 + $0x50] sm:$0xff]  ;;  %v2163_v36 = vld [vmem:[%s8851_s28 + $0xe0] sm:$0xff] }
  0x6b   : > { %7736 = vmatpush3.bf16.msra.mxu1 %v2175_v14  ;;  %v2187_v33 = vpack.c.bf16 %v2162_v31, %v2161_v30  ;;  %v2146_v35 = vld [vmem:[%s8851_s28 + $0x58] sm:$0xff]  ;;  %v2164_v37 = vld [vmem:[%s8851_s28 + $0xe8] sm:$0xff]  ;;  %v2147_v38 = vld [vmem:[%s8851_s28 + $0x60] sm:$0xff] }
  0x6c   : > { %7737 = vmatprep.subr.bf16.mxu1 %v2184_v15  ;;  %v2179_v39 = vpack.c.bf16 %v2146_v35, %v2145_v34  ;;  %v2148_v40 = vld [vmem:[%s8851_s28 + $0x68] sm:$0xff]  ;;  %v2188_v41 = vpack.c.bf16 %v2164_v37, %v2163_v36  ;;  %v2165_v42 = vld [vmem:[%s8851_s28 + $0xf0] sm:$0xff]  ;;  %v2166_v43 = vld [vmem:[%s8851_s28 + $0xf8] sm:$0xff] }
  0x6d   : > { %v2149_v44 = vld [vmem:[%s8851_s28 + $0x70] sm:$0xff]  ;;  %v2180_v45 = vpack.c.bf16 %v2148_v40, %v2147_v38  ;;  %v2150_v46 = vld [vmem:[%s8851_s28 + $0x78] sm:$0xff]  ;;  %v2189_v47 = vpack.c.bf16 %v2166_v43, %v2165_v42  ;;  %v2167_v48 = vld [vmem:[%s8851_s28 + $0x100] sm:$0xff] }
  0x6e   : > { %v2168_v49 = vld [vmem:[%s8851_s28 + $0x108] sm:$0xff]  ;;  %v2181_v50 = vpack.c.bf16 %v2150_v46, %v2149_v44  ;;  %v2169_v51 = vld [vmem:[%s8851_s28 + $0x110] sm:$0xff]  ;;  %v2170_v52 = vld [vmem:[%s8851_s28 + $0x118] sm:$0xff] }
  0x6f   : > { %7738 = vmatpush3.bf16.msra.mxu1 %v2176_v20  ;;  %v2190_v54 = vpack.c.bf16 %v2168_v49, %v2167_v48  ;;  %v2173_v55 = vld [vmem:[%s8851_s28 + $0x130] sm:$0xff]  ;;  %v2420_v57 = vld [vmem:[%s8896_s7 + $0x60] sm:$0xff]  ;;  %v2172_v60 = vld [vmem:[%s8851_s28 + $0x128] sm:$0xff]  ;;  %v2191_v61 = vpack.c.bf16 %v2170_v52, %v2169_v51  ;;  %v10418_v48 = vmov 0  }
  0x70   : > { %7739 = vmatprep.subr.bf16.mxu1 %v2185_v21  ;;  %v2541_v58 = vld [vmem:[%s8901_s10 + $0x20] sm:$0xf]  ;;  %v2193_v62 = vpack.c.bf16 %v2173_v55, %v2173_v55  ;;  %v8908_v63 = vpack.c.bf16 %v2420_v57, %v2420_v57  ;;  %v8381_v1 = vld [vmem:[%s8662_s29 + $0x18] ss:$12 sps:$4 sm:$0xff]   ;;  %v2409_v8 = vld [vmem:[%s8896_s7 + $0x8] sm:$0xff]  ;;  %8374 = vset.pattern.permute.xlu0 %v10418_v48 }
  0x71   : > { %v2171_v59 = vld [vmem:[%s8851_s28 + $0x120] sm:$0xff]  ;;  %v8910_v0 = vpack.c.bf16 %v2541_v58, %v2541_v58  ;;  %v8384_v9 = vld [vmem:[%s8662_s29 + $0x30] ss:$12 sps:$4 sm:$0xff]   ;;  %v8385_v11 = vld [vmem:[%s8662_s29 + $0x4c] ss:$12 sps:$4 sm:$0xff]   ;;  %8375 = vset.pattern.permute.xlu1 %v10418_v48  ;;  %s10460_s28 = sld [smem:[#allocation11_spill]] }
  0x72   : > { %v2192_v2 = vpack.c.bf16 %v2172_v60, %v2171_v59  ;;  %v8382_v3 = vld [vmem:[%s8662_s29 + $0x34] ss:$12 sps:$4 sm:$0xff]   ;;  %v2268_v4 = vsel %vm1820_vm0, %v2193_v62, 0  ;;  %v8917_v5 = vsel %vm1820_vm0, %v8908_v63, 0  ;;  %v2411_v15 = vld [vmem:[%s8896_s7 + $0x18] sm:$0xff]  ;;  %v2413_v19 = vld [vmem:[%s8896_s7 + $0x28] sm:$0xff] }
  0x73   : > { %7740 = vmatpush3.bf16.msra.mxu1 %v2177_v26  ;;  %v8921_v6 = vsel %vm2578_vm1, %v8910_v0, 0  ;;  %v2408_v7 = vld [vmem:[%s8896_s7] sm:$0xff]  ;;  %v8387_v12 = vld [vmem:[%s8662_s29 + $0x48] ss:$12 sps:$4 sm:$0xff]   ;;  %v2415_v22 = vld [vmem:[%s8896_s7 + $0x38] sm:$0xff] }
  0x74   : > { %7741 = vmatprep.subr.bf16.mxu1 %v2186_v27  ;;  %v2421_v10 = vpack.c.bf16 %v2409_v8, %v2408_v7  ;;  %v8388_v13 = vld [vmem:[%s8662_s29 + $0x8] ss:$12 sps:$4 sm:$0xff]   ;;  %v8389_v16 = vld [vmem:[%s8662_s29 + $0x20] ss:$12 sps:$4 sm:$0xff]   ;;  %v8390_v17 = vld [vmem:[%s8662_s29 + $0x38] ss:$12 sps:$4 sm:$0xff]  }
  0x75   : > { %v2410_v14 = vld [vmem:[%s8896_s7 + $0x10] sm:$0xff]  ;;  %v2412_v18 = vld [vmem:[%s8896_s7 + $0x20] sm:$0xff]  ;;  %v2417_v27 = vld [vmem:[%s8896_s7 + $0x48] sm:$0xff] }
  0x76   : > { %v2422_v20 = vpack.c.bf16 %v2411_v15, %v2410_v14  ;;  %v2414_v21 = vld [vmem:[%s8896_s7 + $0x30] sm:$0xff]  ;;  %v2423_v23 = vpack.c.bf16 %v2413_v19, %v2412_v18  ;;  %v8392_v25 = vld [vmem:[%s10454_s3] sm:$0xff]   ;;  %v2419_v30 = vld [vmem:[%s8896_s7 + $0x58] sm:$0xff] }
  0x77   : > { %7742 = vmatpush3.bf16.msra.mxu1 %v2178_v32  ;;  %v8391_v24 = vld [vmem:[%s8662_s29 + $0x50] ss:$12 sps:$4 sm:$0xff]   ;;  %v2416_v26 = vld [vmem:[%s8896_s7 + $0x40] sm:$0xff]  ;;  %v2424_v28 = vpack.c.bf16 %v2415_v22, %v2414_v21  ;;  %v2538_v34 = vld [vmem:[%s8901_s10 + $0x8] sm:$0xff] }
  0x78   : > { %7743 = vmatprep.subr.bf16.mxu1 %v2187_v33  ;;  %v2418_v29 = vld [vmem:[%s8896_s7 + $0x50] sm:$0xff]  ;;  %v2425_v31 = vpack.c.bf16 %v2417_v27, %v2416_v26  ;;  %v2537_v33 = vld [vmem:[%s8901_s10] sm:$0xff]  ;;  %v2540_v36 = vld [vmem:[%s8901_s10 + $0x18] sm:$0xff]  ;;  %s2813_s7 = sld [smem:[#allocation2]] }
  0x79   : > { %v2426_v32 = vpack.c.bf16 %v2419_v30, %v2418_v29  ;;  %v2539_v35 = vld [vmem:[%s8901_s10 + $0x10] sm:$0xff]  ;;  %v8393_v37 = vld [vmem:[%s10454_s3 + $0x8] sm:$0xff]   ;;  %v2542_v38 = vpack.c.bf16 %v2538_v34, %v2537_v33  ;;  %v8396_v42 = vld [vmem:[%s8672_s8] sm:$0xff]   ;;  %s7433_s10 = sld [smem:[#allocation2 + $0x80]] }
  0x7a   : > { %v2543_v40 = vpack.c.bf16 %v2540_v36, %v2539_v35  ;;  %v8397_v43 = vld [vmem:[%s8672_s8 + $0x8] sm:$0xff]   ;;  %v8398_v44 = vld [vmem:[%s8672_s8 + $0x10] sm:$0xff]   ;;  %v2659_v46 = vld [vmem:[%s8712_s27] sm:$0xff] }
  0x7b   : > { %7744 = vmatpush3.bf16.msra.mxu1 %v2179_v39  ;;  %v8394_v39 = vld [vmem:[%s10454_s3 + $0x10] sm:$0xff]   ;;  %2669 = vperm.xlu0 %8374, %v2659_v46   ;;  %v2660_v49 = vld [vmem:[%s8712_s27 + $0x8] sm:$0xff]  ;;  %v2663_v51 = vld [vmem:[%s8712_s27 + $0x20] sm:$0xff] }
  0x7c   : > { %7745 = vmatprep.subr.bf16.mxu1 %v2188_v41  ;;  %v8395_v41 = vld [vmem:[%s10454_s3 + $0x18] sm:$0xff]   ;;  %v2664_v52 = vld [vmem:[%s8712_s27 + $0x28] sm:$0xff]  ;;  %v2939_v55 = vld [vmem:[%s8702_s12] sm:$0xff]  ;;  %s10477_s3 = smul.u32 312, %s10486_s16 }
  0x7d   : > { %v2941_v57 = vld [vmem:[%s8702_s12 + $0x10] sm:$0xff]  ;;  %v2942_v58 = vld [vmem:[%s8702_s12 + $0x18] sm:$0xff]  ;;  %v2943_v59 = vld [vmem:[%s8702_s12 + $0x20] sm:$0xff] }
  0x7e   : > { %v2944_v60 = vld [vmem:[%s8702_s12 + $0x28] sm:$0xff]  ;;  %v3229_v7 = vld [vmem:[%s8692_s30 + $0x38] sm:$0xff]  ;;  %v3580_v8 = vld [vmem:[%s8682_s19] sm:$0xff]  ;;  %s9855_s5 = scalar_lea.vmem %s8812_s6, %s10477_s3  ;;  %s7678_s3 = sld [smem:[#allocation2 + $0x201]] }
  0x7f   : > { %7746 = vmatpush3.bf16.msra.mxu1 %v2180_v45  ;;  %v8399_v45 = vld [vmem:[%s8672_s8 + $0x18] sm:$0xff]   ;;  %2674 = vperm.xlu0 %8374, %v2660_v49   ;;  %v3586_v14 = vld [vmem:[%s8682_s19 + $0x30] sm:$0xff]  ;;  %v3770_v21 = vld [vmem:[%s8722_s14 + $0x28] sm:$0xff] }
  0x80   : > { %7747 = vmatprep.subr.bf16.mxu1 %v2189_v47  ;;  %v2661_v47 = vld [vmem:[%s8712_s27 + $0x10] sm:$0xff]  ;;  %v3587_v15 = vld [vmem:[%s8682_s19 + $0x38] sm:$0xff]  ;;  %v5635_v30 = vld [vmem:[%s8732_s25] sm:$0xff] }
  0x81   : > { %2679 = vperm.xlu1 %8375, %v2661_v47   ;;  %v3767_v18 = vld [vmem:[%s8722_s14 + $0x10] sm:$0xff]  ;;  %v3768_v19 = vld [vmem:[%s8722_s14 + $0x18] sm:$0xff] }
  0x82   : > { %v3771_v26 = vld [vmem:[%s8722_s14 + $0x30] sm:$0xff]  ;;  %v5642_v49 = vld [vmem:[%s8732_s25 + $0x38] sm:$0xff] }
  0x83   : > { %7748 = vmatpush3.bf16.msra.mxu1 %v2181_v50  ;;  %v2662_v50 = vld [vmem:[%s8712_s27 + $0x18] sm:$0xff]  ;;  %2689 = vperm.xlu0 %8374, %v2663_v51   ;;  %v5637_v36 = vld [vmem:[%s8732_s25 + $0x10] sm:$0xff]  ;;  %v6387_v51 = vld [vmem:[%s10457_s11] sm:$0xff] }
  0x84   : > { %7952 = vmatprep.subr.bf16.mxu1 %v2190_v54  ;;  %v5641_v46 = vld [vmem:[%s8732_s25 + $0x30] sm:$0xff] }
  0x85   : > { %2684 = vperm.xlu1 %8375, %v2662_v50  }
  0x86   : > { %2303 = vmatmul.mubr.bf16.vlgmr.msra.gmra.mrb[0].mxu1 %v8376_v53  ;;  %v2665_v53 = vld [vmem:[%s8712_s27 + $0x30] sm:$0xff] }
  0x87   : > { %7953 = vmatpush3.bf16.msra.mxu1 %v2190_v54  ;;  %2310 = vmatprep.mubr.bf16.mxu1 %v8379_v56  ;;  %v2666_v54 = vld [vmem:[%s8712_s27 + $0x38] sm:$0xff]  ;;  %v2940_v56 = vld [vmem:[%s8702_s12 + $0x8] sm:$0xff] }
  0x88   : > { %7954 = vmatprep.subr.bf16.mxu1 %v2191_v61  ;;  %2699 = vperm.xlu0 %8374, %v2665_v53  }
  0x89   : > { %2694 = vperm.xlu1 %8375, %v2664_v52   ;;  %v6388_v52 = vld [vmem:[%s10457_s11 + $0x8] sm:$0xff] }
  0x8b   : > { %7955 = vmatpush3.bf16.msra.mxu1 %v2191_v61  ;;  %v2945_v61 = vld [vmem:[%s8702_s12 + $0x30] sm:$0xff] }
  0x8c   : > { %7956 = vmatprep.subr.bf16.mxu1 %v2192_v2  ;;  %2949 = vperm.xlu0 %8374, %v2939_v55  }
  0x8d   : > { %2704 = vperm.xlu1 %8375, %v2666_v54  }
  0x8e   : > { %2311 = vmatmul.mubr.bf16.gmra.mrb[4].mxu1 %v8381_v1  ;;  %v3224_v1 = vld [vmem:[%s8692_s30 + $0x10] sm:$0xff] }
  0x8f   : > { %2318 = vmatprep.mubr.bf16.mxu1 %v8382_v3  ;;  %7957 = vmatpush3.bf16.msra.mxu1 %v2192_v2  ;;  %v3225_v2 = vld [vmem:[%s8692_s30 + $0x18] sm:$0xff]  ;;  %v3226_v3 = vld [vmem:[%s8692_s30 + $0x20] sm:$0xff] }
  0x90   : > { %8306 = vmatprep.subr.msk.bf16.mxu1 %vm1820_vm0, %v2193_v62  ;;  %2959 = vperm.xlu0 %8374, %v2941_v57   ;;  %v2946_v62 = vld [vmem:[%s8702_s12 + $0x38] sm:$0xff]  ;;  %v6389_v57 = vld [vmem:[%s10457_s11 + $0x10] sm:$0xff] }
  0x91   : > { %2954 = vperm.xlu1 %8375, %v2940_v56  }
  0x93   : > { %7959 = vmatpush3.bf16.msra.mxu1 %v2268_v4  ;;  %v8400_v4 = vld [vmem:[%s8707_s20] sm:$0xff]  }
  0x94   : > { %7968 = vmatprep.subr.bf16.mxu1 %v2421_v10  ;;  %2969 = vperm.xlu0 %8374, %v2943_v59   ;;  %v6390_v59 = vld [vmem:[%s10457_s11 + $0x18] sm:$0xff] }
  0x95   : > { %2964 = vperm.xlu1 %8375, %v2942_v58  }
  0x96   : > { %2319 = vmatmul.mubr.bf16.gmra.mrb[8].mxu1 %v8384_v9  ;;  %v3581_v9 = vld [vmem:[%s8682_s19 + $0x8] sm:$0xff] }
  0x97   : > { %2326 = vmatprep.mubr.bf16.mxu1 %v8385_v11  ;;  %v3583_v11 = vld [vmem:[%s8682_s19 + $0x18] sm:$0xff] }
  0x98   : > { %2979 = vperm.xlu0 %8374, %v2945_v61   ;;  %v6391_v61 = vld [vmem:[%s10457_s11 + $0x20] sm:$0xff] }
  0x99   : > { %2974 = vperm.xlu1 %8375, %v2944_v60  }
  0x9d   : > { %2984 = vperm.xlu1 %8375, %v2946_v62   ;;  %v6392_v62 = vld [vmem:[%s10457_s11 + $0x28] sm:$0xff] }
  0x9e   : > { %2327 = vmatmul.mubr.bf16.gmra.mrb[12].mxu1 %v8387_v12  ;;  %v3584_v12 = vld [vmem:[%s8682_s19 + $0x20] sm:$0xff] }
  0x9f   : > { %7960 = vmatprep.mubr.msk.bf16.mxu1 %vm2254_vm2, %v8388_v13  ;;  %v3585_v13 = vld [vmem:[%s8682_s19 + $0x28] sm:$0xff] }
  0xa6   : > { %7961 = vmatmul.mubr.msk.bf16.vlgmr.msra.gmra.mrb[16].mxu1 %vm2254_vm2, %v8389_v16  ;;  %v3765_v16 = vld [vmem:[%s8722_s14] sm:$0xff] }
  0xa7   : > { %7969 = vmatpush3.bf16.msra.mxu1 %v2421_v10  ;;  %7964 = vmatprep.mubr.msk.bf16.mxu1 %vm2254_vm2, %v8390_v17  ;;  %v3582_v10 = vld [vmem:[%s8682_s19 + $0x10] sm:$0xff]  ;;  %v3766_v17 = vld [vmem:[%s8722_s14 + $0x8] sm:$0xff] }
  0xa8   : > { %7970 = vmatprep.subr.bf16.mxu1 %v2422_v20 }
  0xab   : > { %7971 = vmatpush3.bf16.msra.mxu1 %v2422_v20  ;;  %v3769_v20 = vld [vmem:[%s8722_s14 + $0x20] sm:$0xff] }
  0xac   : > { %7972 = vmatprep.subr.bf16.mxu1 %v2423_v23 }
  0xae   : > { %7965 = vmatmul.mubr.msk.bf16.gmra.mrb[20].mxu1 %vm2254_vm2, %v8391_v24 }
  0xaf   : > { %7973 = vmatpush3.bf16.msra.mxu1 %v2423_v23  ;;  %7982 = vmatprep.mubr.msk.bf16.mxu1 %vm2448_vm3, %v8392_v25 }
  0xb0   : > { %7974 = vmatprep.subr.bf16.mxu1 %v2424_v28 }
  0xb3   : > { %7975 = vmatpush3.bf16.msra.mxu1 %v2424_v28  ;;  %v3772_v28 = vld [vmem:[%s8722_s14 + $0x38] sm:$0xff] }
  0xb4   : > { %7976 = vmatprep.subr.bf16.mxu1 %v2425_v31 }
  0xb7   : > { %7977 = vmatpush3.bf16.msra.mxu1 %v2425_v31  ;;  %v5636_v31 = vld [vmem:[%s8732_s25 + $0x8] sm:$0xff] }
  0xb8   : > { %7978 = vmatprep.subr.bf16.mxu1 %v2426_v32 }
  0xbb   : > { %7979 = vmatpush3.bf16.msra.mxu1 %v2426_v32 }
  0xbc   : > { %8307 = vmatprep.subr.msk.bf16.mxu1 %vm1820_vm0, %v8908_v63  ;;  %v3222_v63 = vld [vmem:[%s8692_s30] sm:$0xff] }
  0xbd   : > { %3232 = vperm.xlu0 %8374, %v3222_v63  }
  0xbf   : > { %7981 = vmatpush3.bf16.msra.mxu1 %v8917_v5  ;;  %v3227_v5 = vld [vmem:[%s8692_s30 + $0x28] sm:$0xff] }
  0xc0   : > { %7990 = vmatprep.subr.bf16.mxu1 %v2542_v38 }
  0xc1   : > { %3242 = vperm.xlu0 %8374, %v3224_v1  }
  0xc2   : > { %7983 = vmatmul.mubr.msk.bf16.vlgmr.msra.gmra.mrb[24].mxu1 %vm2448_vm3, %v8393_v37 }
  0xc3   : > { %7991 = vmatpush3.bf16.msra.mxu1 %v2542_v38  ;;  %7986 = vmatprep.mubr.msk.bf16.mxu1 %vm2448_vm3, %v8394_v39  ;;  %v5638_v38 = vld [vmem:[%s8732_s25 + $0x18] sm:$0xff] }
  0xc4   : > { %7992 = vmatprep.subr.bf16.mxu1 %v2543_v40 }
  0xc5   : > { %3252 = vperm.xlu0 %8374, %v3226_v3  }
  0xc7   : > { %7993 = vmatpush3.bf16.msra.mxu1 %v2543_v40  ;;  %v5639_v40 = vld [vmem:[%s8732_s25 + $0x20] sm:$0xff] }
  0xc8   : > { %8308 = vmatprep.subr.msk.bf16.mxu1 %vm2578_vm1, %v8910_v0  ;;  %v3223_v0 = vld [vmem:[%s8692_s30 + $0x8] sm:$0xff] }
  0xc9   : > { %3237 = vperm.xlu1 %8375, %v3223_v0  }
  0xca   : > { %7987 = vmatmul.mubr.msk.bf16.gmra.mrb[28].mxu1 %vm2448_vm3, %v8395_v41  ;;  %v5640_v41 = vld [vmem:[%s8732_s25 + $0x28] sm:$0xff] }
  0xcb   : > { %7995 = vmatpush3.bf16.msra.mxu1 %v8921_v6  ;;  %7996 = vmatprep.mubr.msk.bf16.mxu1 %vm2565_vm4, %v8396_v42  ;;  %v3228_v6 = vld [vmem:[%s8692_s30 + $0x30] sm:$0xff] }
  0xcc   : > { %3262 = vperm.xlu0 %8374, %v3228_v6  }
  0xcd   : > { %3247 = vperm.xlu1 %8375, %v3225_v2  }
  0xd0   : > { %3590 = vperm.xlu0 %8374, %v3580_v8  }
  0xd1   : > { %3257 = vperm.xlu1 %8375, %v3227_v5  }
  0xd2   : > { %7997 = vmatmul.mubr.msk.bf16.vlgmr.msra.gmra.mrb[32].mxu1 %vm2565_vm4, %v8397_v43 }
  0xd3   : > { %8000 = vmatprep.mubr.msk.bf16.mxu1 %vm2565_vm4, %v8398_v44 }
  0xd4   : > { %3600 = vperm.xlu0 %8374, %v3582_v10   ;;  %v6856_v10 = vld [vmem:[%s10458_s18 + $0x8] sm:$0xff] }
  0xd5   : > { %3267 = vperm.xlu1 %8375, %v3229_v7   ;;  %v6394_v7 = vld [vmem:[%s10457_s11 + $0x38] sm:$0xff] }
  0xd8   : > { %3610 = vperm.xlu0 %8374, %v3584_v12  }
  0xd9   : > { %3595 = vperm.xlu1 %8375, %v3581_v9   ;;  %v6855_v9 = vld [vmem:[%s10458_s18] sm:$0xff] }
  0xda   : > { %8001 = vmatmul.mubr.msk.bf16.gmra.mrb[36].mxu1 %vm2565_vm4, %v8399_v45 }
  0xdb   : > { %8012 = vmatprep.mubr.msk.bf16.mxu1 %vm2727_vm5, %v8400_v4  ;;  %v6393_v4 = vld [vmem:[%s10457_s11 + $0x30] sm:$0xff] }
  0xdc   : > { %3620 = vperm.xlu0 %8374, %v3586_v14  }
  0xdd   : > { %3605 = vperm.xlu1 %8375, %v3583_v11  }
  0xe0   : > { %3775 = vperm.xlu0 %8374, %v3765_v16   ;;  %v6857_v16 = vld [vmem:[%s10458_s18 + $0x10] sm:$0xff] }
  0xe1   : > { %3615 = vperm.xlu1 %8375, %v3585_v13  }
  0xe4   : > { %3785 = vperm.xlu0 %8374, %v3767_v18  }
  0xe5   : > { %3625 = vperm.xlu1 %8375, %v3587_v15  }
  0xe8   : > { %3795 = vperm.xlu0 %8374, %v3769_v20  }
  0xe9   : > { %3780 = vperm.xlu1 %8375, %v3766_v17  }
  0xec   : > { %3805 = vperm.xlu0 %8374, %v3771_v26  }
  0xed   : > { %3790 = vperm.xlu1 %8375, %v3768_v19   ;;  %v6858_v19 = vld [vmem:[%s10458_s18 + $0x18] sm:$0xff] }
  0xf0   : > { %5645 = vperm.xlu0 %8374, %v5635_v30  }
  0xf1   : > { %3800 = vperm.xlu1 %8375, %v3770_v21   ;;  %v6859_v21 = vld [vmem:[%s10458_s18 + $0x20] sm:$0xff] }
  0xf4   : > { %5655 = vperm.xlu0 %8374, %v5637_v36  }
  0xf5   : > { %3810 = vperm.xlu1 %8375, %v3772_v28  }
  0xf8   : > { %5665 = vperm.xlu0 %8374, %v5639_v40  }
  0xf9   : > { %5650 = vperm.xlu1 %8375, %v5636_v31  }
  0xfc   : > { %5675 = vperm.xlu0 %8374, %v5641_v46   ;;  %v8401_v46 = vld [vmem:[%s8707_s20 + $0x8] sm:$0xff]  }
  0xfd   : > { %5660 = vperm.xlu1 %8375, %v5638_v38  }
 0x100   : > { %6397 = vperm.xlu0 %8374, %v6387_v51   ;;  %v2670_v51 = vpop.permute.xlu0 %2669 }
 0x101   : > { %5670 = vperm.xlu1 %8375, %v5640_v41  }
 0x104   : > { %6407 = vperm.xlu0 %8374, %v6389_v57  }
 0x105   : > { %5680 = vperm.xlu1 %8375, %v5642_v49   ;;  %v8403_v49 = vld [vmem:[%s8707_s20 + $0x18] sm:$0xff]  }
 0x108   : > { %6417 = vperm.xlu0 %8374, %v6391_v61  }
 0x109   : > { %6402 = vperm.xlu1 %8375, %v6388_v52   ;;  %v2680_v52 = vpop.permute.xlu1 %2679 }
 0x10c   : > { %6427 = vperm.xlu0 %8374, %v6393_v4  }
 0x10d   : > { %6412 = vperm.xlu1 %8375, %v6390_v59  }
 0x110   : > { %6865 = vperm.xlu0 %8374, %v6855_v9  }
 0x111   : > { %6422 = vperm.xlu1 %8375, %v6392_v62  }
 0x114   : > { %6875 = vperm.xlu0 %8374, %v6857_v16  }
 0x115   : > { %6432 = vperm.xlu1 %8375, %v6394_v7  }
 0x118   : > { %6885 = vperm.xlu0 %8374, %v6859_v21  }
 0x119   : > { %6870 = vperm.xlu1 %8375, %v6856_v10  }
 0x11d   : > { %6880 = vperm.xlu1 %8375, %v6858_v19  }
 0x159   : > { %v7749_v22 = vpop.f32.mrb[0].mxu1 }
 0x15a   : > { %v7750_v23 = vpop.f32.mrb[1].mxu1 }
 0x15b   : > { %v7751_v24 = vadd.f32 %v7750_v23, %v7749_v22  ;;  %v7752_v25 = vpop.f32.mrb[2].mxu1  ;;  %v6860_v22 = vld [vmem:[%s10458_s18 + $0x28] sm:$0xff]  ;;  %v6861_v23 = vld [vmem:[%s10458_s18 + $0x30] sm:$0xff] }
 0x15c   : > { %v7753_v27 = vpop.f32.mrb[3].mxu1  ;;  %6890 = vperm.xlu1 %8375, %v6860_v22   ;;  %6895 = vperm.xlu0 %8374, %v6861_v23  }
 0x15d   : > { %v7754_v29 = vadd.f32 %v7753_v27, %v7752_v25 }
 0x161   : > { %v7755_v32 = vpop.f32.mrb[4].mxu1 }
 0x162   : > { %v7756_v33 = vpop.f32.mrb[5].mxu1 }
 0x163   : > { %v7757_v34 = vadd.f32 %v7756_v33, %v7755_v32  ;;  %v7758_v35 = vpop.f32.mrb[6].mxu1 }
 0x164   : > { %v7759_v37 = vpop.f32.mrb[7].mxu1 }
 0x165   : > { %v7760_v39 = vadd.f32 %v7759_v37, %v7758_v35 }
 0x169   : > { %v7761_v42 = vpop.f32.mrb[8].mxu1 }
 0x16a   : > { %v7762_v43 = vpop.f32.mrb[9].mxu1 }
 0x16b   : > { %v7763_v44 = vadd.f32 %v7762_v43, %v7761_v42  ;;  %v7764_v45 = vpop.f32.mrb[10].mxu1 }
 0x16c   : > { %v7765_v47 = vpop.f32.mrb[11].mxu1 }
 0x16d   : > { %v7766_v50 = vadd.f32 %v7765_v47, %v7764_v45  ;;  %v2824_v45 = vld [vmem:[%s10459_s22] sm:$0x3]  ;;  %v8402_v47 = vld [vmem:[%s8707_s20 + $0x10] sm:$0xff]   ;;  %s10462_s22 = sld [smem:[#allocation23_spill]] }
 0x171   : > { %v7767_v53 = vpop.f32.mrb[12].mxu1 }
 0x172   : > { %v7768_v54 = vpop.f32.mrb[13].mxu1 }
 0x173   : > { %v7769_v55 = vadd.f32 %v7768_v54, %v7767_v53  ;;  %v7770_v56 = vpop.f32.mrb[14].mxu1  ;;  %v2675_v53 = vpop.permute.xlu0 %2674 }
 0x174   : > { %v7771_v58 = vpop.f32.mrb[15].mxu1  ;;  %v2685_v54 = vpop.permute.xlu1 %2684 }
 0x175   : > { %v7772_v60 = vadd.f32 %v7771_v58, %v7770_v56  ;;  %v6713_v58 = vstv %s7709_s0  ;;  %s10463_s0 = sld [smem:[#allocation6_spill]] }
 0x177   : > { %v2690_v59 = vpop.permute.xlu0 %2689 }
 0x178   : > { %v2695_v4 = vpop.permute.xlu1 %2694 }
 0x179   : > { %v7962_v63 = vpop.f32.mrb[16].mxu1 }
 0x17a   : > { %v9031_v0 = vadd.f32 %v7962_v63, %v7757_v34  ;;  %v2369_v1 = vpop.f32.mrb[17].mxu1 }
 0x17b   : > { %v9033_v2 = vadd.f32 %v7751_v24, %v2369_v1  ;;  %v7963_v3 = vpop.f32.mrb[18].mxu1  ;;  %v6862_v24 = vld [vmem:[%s10458_s18 + $0x38] sm:$0xff] }
 0x17c   : > { %v9036_v5 = vadd.f32 %v7963_v3, %v7760_v39  ;;  %v2372_v6 = vpop.f32.mrb[19].mxu1  ;;  %6900 = vperm.xlu1 %8375, %v6862_v24   ;;  %v2700_v24 = vpop.permute.xlu0 %2699 }
 0x17d   : > { %v9039_v8 = vadd.f32 %v7754_v29, %v2372_v6 }
 0x181   : > { %v7966_v11 = vpop.f32.mrb[20].mxu1 }
 0x182   : > { %v9043_v12 = vadd.f32 %v7966_v11, %v7769_v55  ;;  %v2385_v13 = vpop.f32.mrb[21].mxu1 }
 0x183   : > { %v9045_v14 = vadd.f32 %v7763_v44, %v2385_v13  ;;  %v7967_v15 = vpop.f32.mrb[22].mxu1 }
 0x184   : > { %v9048_v17 = vadd.f32 %v7967_v15, %v7772_v60  ;;  %v2388_v18 = vpop.f32.mrb[23].mxu1  ;;  %v6723_v60 = vstv %s7710_s23  ;;  %s10464_s23 = sld [smem:[#allocation7_spill]] }
 0x185   : > { %v9051_v20 = vadd.f32 %v7766_v50, %v2388_v18  ;;  %v2843_v50 = vsel %vm2578_vm1, %v2824_v45, 0 }
 0x195   : > { %v9057_v25 = vpop.f32.mrb[24].mxu1 }
 0x196   : > { %v9059_v26 = vpop.f32.mrb[25].mxu1 }
 0x197   : > { %v9061_v27 = vpop.f32.mrb[26].mxu1 }
 0x198   : > { %v9063_v28 = vpop.f32.mrb[27].mxu1 }
 0x19d   : > { %v9065_v29 = vpop.f32.mrb[28].mxu1 }
 0x19e   : > { %v9067_v30 = vpop.f32.mrb[29].mxu1 }
 0x19f   : > { %v9069_v31 = vpop.f32.mrb[30].mxu1 }
 0x1a0   : > { %v9071_v32 = vpop.f32.mrb[31].mxu1 }
 0x1a5   : > { %v7998_v33 = vpop.f32.mrb[32].mxu1 }
 0x1a6   : > { %v2616_v34 = vpop.f32.mrb[33].mxu1  ;;  %v6716_v9 = vmul.f32 %v7998_v33, %v6713_v58 }
 0x1a7   : > { %v7999_v35 = vpop.f32.mrb[34].mxu1  ;;  %v6714_v13 = vmul.f32 %v6713_v58, %v2616_v34 }
 0x1a8   : > { %v2619_v36 = vpop.f32.mrb[35].mxu1  ;;  %v2656_v37 = vpack.c.bf16 %v7999_v35, %v7998_v33  ;;  %v6717_v15 = vmul.f32 %v7999_v35, %v6713_v58 }
 0x1a9   : > { %v2655_v38 = vpack.c.bf16 %v2619_v36, %v2616_v34  ;;  %v6715_v23 = vmul.f32 %v6713_v58, %v2619_v36  ;;  %v2705_v34 = vpop.permute.xlu1 %2704 }
 0x1ab   : > { %8004 = vmatprep.subr.bf16.mxu1 %v2655_v38 }
 0x1ac   : > { %8005 = vmatpush3.bf16.msra.mxu1 %v2655_v38 }
 0x1ad   : > { %v9073_v39 = vpop.f32.mrb[36].mxu1  ;;  %8006 = vmatprep.subr.bf16.mxu1 %v2656_v37 }
 0x1ae   : > { %v9075_v40 = vpop.f32.mrb[37].mxu1 }
 0x1af   : > { %v9077_v41 = vpop.f32.mrb[38].mxu1 }
 0x1b0   : > { %v9079_v42 = vpop.f32.mrb[39].mxu1  ;;  %8007 = vmatpush3.bf16.msra.mxu1 %v2656_v37  ;;  %v2658_v43 = vpack.c.bf16 %v9077_v41, %v9073_v39 }
 0x1b1   : > { %v2657_v44 = vpack.c.bf16 %v9079_v42, %v9075_v40 }
 0x1b3   : > { %8008 = vmatprep.subr.bf16.mxu1 %v2657_v44 }
 0x1b4   : > { %8009 = vmatpush3.bf16.msra.mxu1 %v2657_v44 }
 0x1b5   : > { %8010 = vmatprep.subr.bf16.mxu1 %v2658_v43 }
 0x1b8   : > { %8011 = vmatpush3.bf16.msra.mxu1 %v2658_v43 }
 0x1b9   : > { %8309 = vmatprep.subr.msk.bf16.mxu1 %vm2578_vm1, %v2824_v45 }
 0x1bb   : > { %8013 = vmatmul.mubr.msk.bf16.vlgmr.msra.gmra.mrb[40].mxu1 %vm2727_vm5, %v8401_v46 }
 0x1bc   : > { %8016 = vmatprep.mubr.msk.bf16.mxu1 %vm2727_vm5, %v8402_v47  ;;  %8021 = vmatpush3.bf16.msra.mxu1 %v2843_v50 }
 0x1c3   : > { %8017 = vmatmul.mubr.msk.bf16.gmra.mrb[44].mxu1 %vm2727_vm5, %v8403_v49 }
 0x28e   : > { %v8014_v55 = vpop.f32.mrb[40].mxu1 }
 0x28f   : > { %v2783_v56 = vadd.f32 %v8014_v55, %v2680_v52  ;;  %v2774_v57 = vpop.f32.mrb[41].mxu1 }
 0x290   : > { %v2775_v61 = vadd.f32 %v2774_v57, %v2670_v51  ;;  %v8015_v62 = vpop.f32.mrb[42].mxu1  ;;  %v6718_v57 = vmul.f32 %v6713_v58, %v9075_v40  ;;  %v8404_v40 = vld [vmem:[%s10460_s28] sm:$0xff]  }
 0x291   : > { %v2807_v63 = vmax.f32 %v2783_v56, 0.0  ;;  %v2786_v1 = vadd.f32 %v8015_v62, %v2685_v54  ;;  %v2777_v3 = vpop.f32.mrb[43].mxu1  ;;  %v6720_v54 = vmul.f32 %v9073_v39, %v6713_v58  ;;  %v6721_v62 = vmul.f32 %v9077_v41, %v6713_v58 }
 0x292   : > { %v2805_v6 = vmax.f32 %v2775_v61, 0.0  ;;  %v2778_v7 = vadd.f32 %v2777_v3, %v2675_v53  ;;  %v2814_v41 = vstv %s2813_s7  ;;  %s10422_s7 = smul.u32 1872, %s10486_s16 }
 0x293   : > { %v6726_v10 = vmul.f32 %v6723_v60, %v2807_v63  ;;  %v2808_v11 = vmax.f32 %v2786_v1, 0.0 }
 0x294   : > { %v6724_v16 = vmul.f32 %v6723_v60, %v2805_v6  ;;  %v2806_v18 = vmax.f32 %v2778_v7, 0.0 }
 0x295   : > { %v2826_v19 = vpack.c.bf16 %v2808_v11, %v2807_v63  ;;  %v6727_v21 = vmul.f32 %v6723_v60, %v2808_v11  ;;  %v9094_v22 = vadd.f32 %v6726_v10, %v6716_v9  ;;  %v2910_v11 = vstv %s7433_s10  ;;  %s9139_s10 = scalar_lea.vmem %s10463_s0, %s10422_s7  ;;  %s7677_s0 = sld [smem:[#allocation2 + $0x181]] }
 0x296   : > { %v2825_v37 = vpack.c.bf16 %v2806_v18, %v2805_v6  ;;  %v6725_v38 = vmul.f32 %v6723_v60, %v2806_v18  ;;  %v8018_v43 = vpop.f32.mrb[44].mxu1  ;;  %v9096_v44 = vadd.f32 %v6724_v16, %v6714_v13  ;;  %v6719_v6 = vmul.f32 %v6713_v58, %v9079_v42  ;;  %s10472_s7 = sld [smem:[#allocation13_spill]] }
 0x297   : > { %v2799_v45 = vadd.f32 %v8018_v43, %v2700_v24  ;;  %v2790_v33 = vpop.f32.mrb[45].mxu1  ;;  %v9098_v46 = vadd.f32 %v6727_v21, %v6717_v15  ;;  %v2817_v58 = vmul.f32 %v9057_v25, %v2814_v41  ;;  %v2815_v15 = vmul.f32 %v2814_v41, %v9059_v26 }
 0x298   : > { %v2791_v35 = vadd.f32 %v2790_v33, %v2690_v59  ;;  %v8019_v47 = vpop.f32.mrb[46].mxu1  ;;  %8022 = vmatprep.mubr.msk.bf16.mxu1 %vm2829_vm6, %v2825_v37  ;;  %v9101_v49 = vadd.f32 %v6725_v38, %v6715_v23  ;;  %v2816_v37 = vmul.f32 %v2814_v41, %v9063_v28 }
 0x299   : > { %v2811_v50 = vmax.f32 %v2799_v45, 0.0  ;;  %v2802_v51 = vadd.f32 %v8019_v47, %v2705_v34  ;;  %v2793_v36 = vpop.f32.mrb[47].mxu1  ;;  %8023 = vmatmul.mubr.msk.bf16.vlgmr.msra.gmra.mrb[48].mxu1 %vm2829_vm6, %v2826_v19  ;;  %v2818_v19 = vmul.f32 %v9061_v27, %v2814_v41 }
 0x29a   : > { %v2809_v52 = vmax.f32 %v2791_v35, 0.0  ;;  %v2794_v53 = vadd.f32 %v2793_v36, %v2695_v4 }
 0x29b   : > { %v6730_v55 = vmul.f32 %v6723_v60, %v2811_v50  ;;  %v2812_v56 = vmax.f32 %v2802_v51, 0.0 }
 0x29c   : > { %v6728_v59 = vmul.f32 %v6723_v60, %v2809_v52  ;;  %v2810_v61 = vmax.f32 %v2794_v53, 0.0 }
 0x29d   : > { %v2828_v63 = vpack.c.bf16 %v2812_v56, %v2811_v50  ;;  %v6731_v1 = vmul.f32 %v6723_v60, %v2812_v56  ;;  %v9107_v3 = vadd.f32 %v6730_v55, %v6720_v54  ;;  %v2821_v50 = vmul.f32 %v9065_v29, %v2814_v41 }
 0x29e   : > { %v2827_v7 = vpack.c.bf16 %v2810_v61, %v2809_v52  ;;  %v6729_v9 = vmul.f32 %v6723_v60, %v2810_v61  ;;  %v9110_v4 = vadd.f32 %v6728_v59, %v6718_v57  ;;  %v2819_v52 = vmul.f32 %v2814_v41, %v9067_v30 }
 0x29f   : > { %v9112_v39 = vadd.f32 %v6731_v1, %v6721_v62  ;;  %v2822_v56 = vmul.f32 %v9069_v31, %v2814_v41  ;;  %v2820_v62 = vmul.f32 %v2814_v41, %v9071_v32  ;;  %v8406_v41 = vld [vmem:[%s10460_s28 + $0x10] sm:$0xff]  }
 0x2a0   : > { %8026 = vmatprep.mubr.msk.bf16.mxu1 %vm2829_vm6, %v2827_v7  ;;  %v9115_v10 = vadd.f32 %v6729_v9, %v6719_v6 }
 0x2a1   : > { %8027 = vmatmul.mubr.msk.bf16.gmra.mrb[52].mxu1 %vm2829_vm6, %v2828_v63 }
 0x2a2   : > { %10461 = vst [vmem:[#allocation28_spill] sm:$0xff] %v9115_v10  ;;  %8038 = vmatprep.mubr.msk.bf16.mxu1 %vm2727_vm5, %v8404_v40  ;;  %v8408_v40 = vld [vmem:[%s10462_s22] sm:$0xff]   ;;  %s7676_s22 = sld [smem:[#allocation2 + $0x101]] }
 0x36c   : > { %v8024_v42 = vpop.f32.mrb[48].mxu1 }
 0x36d   : > { %v2913_v60 = vmul.f32 %v8024_v42, %v2910_v11  ;;  %v2879_v13 = vpop.f32.mrb[49].mxu1  ;;  %v8405_v42 = vld [vmem:[%s10460_s28 + $0x8] sm:$0xff]  }
 0x36e   : > { %v2911_v16 = vmul.f32 %v2910_v11, %v2879_v13  ;;  %v8025_v18 = vpop.f32.mrb[50].mxu1  ;;  %v1300_v13 = vld [vmem:[%s9139_s10 + $0x8] sm:$0xff] }
 0x36f   : > { %v2921_v21 = vadd.f32 %v2913_v60, %v2817_v58  ;;  %v2914_v23 = vmul.f32 %v8025_v18, %v2910_v11  ;;  %v2882_v24 = vpop.f32.mrb[51].mxu1  ;;  %v9142_v58 = vld [vmem:[%s10464_s23] sm:$0xff] }
 0x370   : > { %v2919_v38 = vadd.f32 %v2911_v16, %v2815_v15  ;;  %v2912_v43 = vmul.f32 %v2910_v11, %v2882_v24  ;;  %v9145_v60 = vld [vmem:[%s10464_s23 + $0x20] sm:$0xff]  ;;  %v1302_v15 = vld [vmem:[%s9139_s10 + $0x18] sm:$0xff]  ;;  %v1304_v24 = vld [vmem:[%s9139_s10 + $0x28] sm:$0xff] }
 0x371   : > { %v2922_v45 = vadd.f32 %v2914_v23, %v2818_v19  ;;  %v1299_v16 = vld [vmem:[%s9139_s10] sm:$0xff]  ;;  %v7356_v18 = vcombine.low %v9142_v58, %v9145_v60  ;;  %v7357_v19 = vcombine.high %v9142_v58, %v9145_v60  ;;  %v1301_v23 = vld [vmem:[%s9139_s10 + $0x10] sm:$0xff] }
 0x372   : > { %v2920_v33 = vadd.f32 %v2912_v43, %v2816_v37  ;;  %v1306_v37 = vld [vmem:[%s9139_s10 + $0x38] sm:$0xff] }
 0x373   : > { %v2936_v34 = vpack.c.bf16 %v2922_v45, %v2921_v21  ;;  %v1534_v21 = vpack.c.bf16 %v1302_v15, %v1300_v13  ;;  %v1536_v43 = vpack.c.bf16 %v1306_v37, %v1304_v24  ;;  %v1303_v45 = vld [vmem:[%s9139_s10 + $0x20] sm:$0xff]  ;;  %1859 = vmatprep.mubr.bf16.mxu0 %v7357_v19  ;;  %v1324_v13 = vld [vmem:[%s9139_s10 + $0xc8] sm:$0xff]  ;;  %v1326_v15 = vld [vmem:[%s9139_s10 + $0xd8] sm:$0xff] }
 0x374   : > { %v8028_v35 = vpop.f32.mrb[52].mxu1  ;;  %v2935_v47 = vpack.c.bf16 %v2920_v33, %v2919_v38  ;;  %v1533_v38 = vpack.c.bf16 %v1301_v23, %v1299_v16  ;;  %v1305_v33 = vld [vmem:[%s9139_s10 + $0x30] sm:$0xff]  ;;  %v1546_v19 = vpack.c.bf16 %v1326_v15, %v1324_v13  ;;  %v1328_v24 = vld [vmem:[%s9139_s10 + $0xe8] sm:$0xff]  ;;  %v1330_v37 = vld [vmem:[%s9139_s10 + $0xf8] sm:$0xff] }
 0x375   : > { %v2917_v51 = vmul.f32 %v8028_v35, %v2910_v11  ;;  %v2895_v36 = vpop.f32.mrb[53].mxu1  ;;  %1827 = vmatprep.subr.bf16.mxu0 %v1534_v21  ;;  %v1310_v35 = vld [vmem:[%s9139_s10 + $0x58] sm:$0xff]  ;;  %v1323_v21 = vld [vmem:[%s9139_s10 + $0xc0] sm:$0xff]  ;;  %v1325_v23 = vld [vmem:[%s9139_s10 + $0xd0] sm:$0xff] }
 0x376   : > { %v2915_v53 = vmul.f32 %v2910_v11, %v2895_v36  ;;  %v8029_v54 = vpop.f32.mrb[54].mxu1  ;;  %8030 = vmatprep.subr.bf16.mxu1 %v2935_v47  ;;  %1828 = vmatpush1.bf16.msra.mxu0 %v1533_v38  ;;  %v1309_v36 = vld [vmem:[%s9139_s10 + $0x50] sm:$0xff]  ;;  %v1545_v38 = vpack.c.bf16 %v1325_v23, %v1323_v21  ;;  %v1348_v13 = vld [vmem:[%s9139_s10 + $0x188] sm:$0xff]  ;;  %v1350_v15 = vld [vmem:[%s9139_s10 + $0x198] sm:$0xff] }
 0x377   : > { %v2925_v55 = vadd.f32 %v2917_v51, %v2821_v50  ;;  %v2918_v57 = vmul.f32 %v8029_v54, %v2910_v11  ;;  %v2898_v59 = vpop.f32.mrb[55].mxu1  ;;  %8031 = vmatpush3.bf16.msra.mxu1 %v2935_v47  ;;  %v1535_v47 = vpack.c.bf16 %v1305_v33, %v1303_v45  ;;  %1829 = vmatprep.subr.bf16.mxu0 %v1536_v43  ;;  %v1307_v51 = vld [vmem:[%s9139_s10 + $0x40] sm:$0xff]  ;;  %v1329_v33 = vld [vmem:[%s9139_s10 + $0xf0] sm:$0xff] }
 0x378   : > { %v2923_v61 = vadd.f32 %v2915_v53, %v2819_v52  ;;  %v2916_v63 = vmul.f32 %v2910_v11, %v2898_v59  ;;  %8032 = vmatprep.subr.bf16.mxu1 %v2936_v34  ;;  %v8407_v11 = vld [vmem:[%s10460_s28 + $0x18] sm:$0xff]   ;;  %v1312_v52 = vld [vmem:[%s9139_s10 + $0x68] sm:$0xff]  ;;  %v1537_v54 = vpack.c.bf16 %v1309_v36, %v1307_v51  ;;  %v1548_v43 = vpack.c.bf16 %v1330_v37, %v1328_v24  ;;  %v1327_v45 = vld [vmem:[%s9139_s10 + $0xe0] sm:$0xff] }
 0x379   : > { %v2926_v1 = vadd.f32 %v2918_v57, %v2822_v56  ;;  %v1314_v53 = vld [vmem:[%s9139_s10 + $0x78] sm:$0xff]  ;;  %v1311_v56 = vld [vmem:[%s9139_s10 + $0x60] sm:$0xff]  ;;  %v1313_v57 = vld [vmem:[%s9139_s10 + $0x70] sm:$0xff] }
 0x37a   : > { %v2924_v6 = vadd.f32 %v2916_v63, %v2820_v62  ;;  %1830 = vmatpush1.bf16.msra.mxu0 %v1535_v47  ;;  %v1316_v59 = vld [vmem:[%s9139_s10 + $0x88] sm:$0xff]  ;;  %v1539_v62 = vpack.c.bf16 %v1313_v57, %v1311_v56  ;;  %v1547_v47 = vpack.c.bf16 %v1329_v33, %v1327_v45  ;;  %v1331_v51 = vld [vmem:[%s9139_s10 + $0x100] sm:$0xff]  ;;  %v1333_v36 = vld [vmem:[%s9139_s10 + $0x110] sm:$0xff] }
 0x37b   : > { %8033 = vmatpush3.bf16.msra.mxu1 %v2936_v34  ;;  %v2938_v7 = vpack.c.bf16 %v2926_v1, %v2925_v55  ;;  %v1308_v34 = vld [vmem:[%s9139_s10 + $0x48] sm:$0xff]  ;;  %v1540_v55 = vpack.c.bf16 %v1314_v53, %v1312_v52  ;;  %v1315_v1 = vld [vmem:[%s9139_s10 + $0x80] sm:$0xff]  ;;  %v1338_v53 = vld [vmem:[%s9139_s10 + $0x138] sm:$0xff] }
 0x37c   : > { %v2937_v9 = vpack.c.bf16 %v2924_v6, %v2923_v61  ;;  %v1538_v50 = vpack.c.bf16 %v1310_v35, %v1308_v34  ;;  %v1318_v61 = vld [vmem:[%s9139_s10 + $0x98] sm:$0xff]  ;;  %v1317_v6 = vld [vmem:[%s9139_s10 + $0x90] sm:$0xff]  ;;  %v1332_v34 = vld [vmem:[%s9139_s10 + $0x108] sm:$0xff] }
 0x37d   : > { %v1542_v63 = vpack.c.bf16 %v1318_v61, %v1316_v59  ;;  %v1334_v35 = vld [vmem:[%s9139_s10 + $0x118] sm:$0xff]  ;;  %v1336_v52 = vld [vmem:[%s9139_s10 + $0x128] sm:$0xff]  ;;  %v1335_v56 = vld [vmem:[%s9139_s10 + $0x120] sm:$0xff] }
 0x37e   : > { %8034 = vmatprep.subr.bf16.mxu1 %v2937_v9  ;;  %1831 = vmatprep.subr.bf16.mxu0 %v1538_v50  ;;  %v1550_v50 = vpack.c.bf16 %v1334_v35, %v1332_v34  ;;  %v1337_v57 = vld [vmem:[%s9139_s10 + $0x130] sm:$0xff]  ;;  %v1340_v59 = vld [vmem:[%s9139_s10 + $0x148] sm:$0xff]  ;;  %v1342_v61 = vld [vmem:[%s9139_s10 + $0x158] sm:$0xff] }
 0x37f   : > { %8035 = vmatpush3.bf16.msra.mxu1 %v2937_v9  ;;  %1832 = vmatpush1.bf16.msra.mxu0 %v1537_v54  ;;  %v1322_v9 = vld [vmem:[%s9139_s10 + $0xb8] sm:$0xff]  ;;  %v1549_v54 = vpack.c.bf16 %v1333_v36, %v1331_v51  ;;  %v1347_v21 = vld [vmem:[%s9139_s10 + $0x180] sm:$0xff]  ;;  %v1349_v23 = vld [vmem:[%s9139_s10 + $0x190] sm:$0xff] }
 0x380   : > { %8036 = vmatprep.subr.bf16.mxu1 %v2938_v7  ;;  %1833 = vmatprep.subr.bf16.mxu0 %v1540_v55  ;;  %v1552_v55 = vpack.c.bf16 %v1338_v53, %v1336_v52  ;;  %v1352_v24 = vld [vmem:[%s9139_s10 + $0x1a8] sm:$0xff]  ;;  %v1354_v37 = vld [vmem:[%s9139_s10 + $0x1b8] sm:$0xff]  ;;  %v1351_v45 = vld [vmem:[%s9139_s10 + $0x1a0] sm:$0xff] }
 0x381   : > { %v1353_v33 = vld [vmem:[%s9139_s10 + $0x1b0] sm:$0xff]  ;;  %v1356_v34 = vld [vmem:[%s9139_s10 + $0x1c8] sm:$0xff]  ;;  %v1358_v35 = vld [vmem:[%s9139_s10 + $0x1d8] sm:$0xff] }
 0x382   : > { %v1355_v51 = vld [vmem:[%s9139_s10 + $0x1c0] sm:$0xff]  ;;  %v1357_v36 = vld [vmem:[%s9139_s10 + $0x1d0] sm:$0xff]  ;;  %v1360_v52 = vld [vmem:[%s9139_s10 + $0x1e8] sm:$0xff] }
 0x383   : > { %8037 = vmatpush3.bf16.msra.mxu1 %v2938_v7  ;;  %v1320_v7 = vld [vmem:[%s9139_s10 + $0xa8] sm:$0xff]  ;;  %1834 = vmatpush1.bf16.msra.mxu0 %v1539_v62  ;;  %v1551_v62 = vpack.c.bf16 %v1337_v57, %v1335_v56  ;;  %v1362_v53 = vld [vmem:[%s9139_s10 + $0x1f8] sm:$0xff]  ;;  %v1359_v56 = vld [vmem:[%s9139_s10 + $0x1e0] sm:$0xff] }
 0x384   : > { %8046 = vmatprep.subr.bf16.mxu1 %v8408_v40  ;;  %1835 = vmatprep.subr.bf16.mxu0 %v1542_v63  ;;  %v1554_v63 = vpack.c.bf16 %v1342_v61, %v1340_v59  ;;  %v1361_v57 = vld [vmem:[%s9139_s10 + $0x1f0] sm:$0xff]  ;;  %v1364_v59 = vld [vmem:[%s9139_s10 + $0x208] sm:$0xff]  ;;  %v1366_v61 = vld [vmem:[%s9139_s10 + $0x218] sm:$0xff] }
 0x386   : > { %8039 = vmatmul.mubr.msk.bf16.vlgmr.msra.gmra.mrb[56].mxu1 %vm2727_vm5, %v8405_v42  ;;  %v1544_v42 = vpack.c.bf16 %v1322_v9, %v1320_v7  ;;  %v1344_v7 = vld [vmem:[%s9139_s10 + $0x168] sm:$0xff]  ;;  %v1346_v9 = vld [vmem:[%s9139_s10 + $0x178] sm:$0xff] }
 0x387   : > { %8042 = vmatprep.mubr.msk.bf16.mxu1 %vm2727_vm5, %v8406_v41  ;;  %8047 = vmatpush3.bf16.msra.mxu1 %v8408_v40  ;;  %v1541_v40 = vpack.c.bf16 %v1317_v6, %v1315_v1  ;;  %v1319_v41 = vld [vmem:[%s9139_s10 + $0xa0] sm:$0xff]  ;;  %v1341_v6 = vld [vmem:[%s9139_s10 + $0x150] sm:$0xff] }
 0x388   : > { %v1339_v1 = vld [vmem:[%s9139_s10 + $0x140] sm:$0xff] }
 0x389   : > { %1836 = vmatpush1.bf16.msra.mxu0 %v1541_v40  ;;  %v1553_v40 = vpack.c.bf16 %v1341_v6, %v1339_v1  ;;  %v1566_v1 = vpack.c.bf16 %v1366_v61, %v1364_v59  ;;  %v1363_v6 = vld [vmem:[%s9139_s10 + $0x200] sm:$0xff]  ;;  %v1384_v59 = vld [vmem:[%s9139_s10 + $0x2a8] sm:$0xff]  ;;  %v1386_v61 = vld [vmem:[%s9139_s10 + $0x2b8] sm:$0xff] }
 0x38a   : > { %1837 = vmatprep.subr.bf16.mxu0 %v1544_v42  ;;  %v1556_v42 = vpack.c.bf16 %v1346_v9, %v1344_v7  ;;  %v1365_v7 = vld [vmem:[%s9139_s10 + $0x210] sm:$0xff]  ;;  %v1279_v9 = vld [vmem:[%s10464_s23 + $0x60] sm:$0xff] }
 0x38e   : > { %8043 = vmatmul.mubr.msk.bf16.gmra.mrb[60].mxu1 %vm2727_vm5, %v8407_v11  ;;  %v1321_v11 = vld [vmem:[%s9139_s10 + $0xb0] sm:$0xff] }
 0x38f   : > { %v1543_v16 = vpack.c.bf16 %v1321_v11, %v1319_v41  ;;  %v1343_v41 = vld [vmem:[%s9139_s10 + $0x160] sm:$0xff]  ;;  %v1345_v11 = vld [vmem:[%s9139_s10 + $0x170] sm:$0xff] }
 0x391   : > { %1838 = vmatpush1.bf16.msra.mxu0 %v1543_v16  ;;  %v1555_v16 = vpack.c.bf16 %v1345_v11, %v1343_v41  ;;  %v1565_v41 = vpack.c.bf16 %v1365_v7, %v1363_v6  ;;  %v1576_v6 = vpack.c.bf16 %v1386_v61, %v1384_v59  ;;  %v1383_v7 = vld [vmem:[%s9139_s10 + $0x2a0] sm:$0xff]  ;;  %v2955_v59 = vpop.permute.xlu1 %2954 }
 0x392   : > { %1839 = vmatprep.subr.bf16.mxu0 %v1546_v19  ;;  %v1558_v19 = vpack.c.bf16 %v1350_v15, %v1348_v13  ;;  %v1367_v15 = vld [vmem:[%s9139_s10 + $0x220] sm:$0xff] }
 0x395   : > { %1840 = vmatpush1.bf16.msra.mxu0 %v1545_v38  ;;  %v1557_v38 = vpack.c.bf16 %v1349_v23, %v1347_v21  ;;  %v1374_v21 = vld [vmem:[%s9139_s10 + $0x258] sm:$0xff] }
 0x396   : > { %1841 = vmatprep.subr.bf16.mxu0 %v1548_v43  ;;  %v1560_v43 = vpack.c.bf16 %v1354_v37, %v1352_v24  ;;  %v1371_v24 = vld [vmem:[%s9139_s10 + $0x240] sm:$0xff] }
 0x399   : > { %1842 = vmatpush1.bf16.msra.mxu0 %v1547_v47  ;;  %v1559_v47 = vpack.c.bf16 %v1353_v33, %v1351_v45  ;;  %v1287_v45 = vld [vmem:[%s10464_s23 + $0xa0] sm:$0xff]  ;;  %v1376_v33 = vld [vmem:[%s9139_s10 + $0x268] sm:$0xff] }
 0x39a   : > { %1843 = vmatprep.subr.bf16.mxu0 %v1550_v50  ;;  %v1562_v50 = vpack.c.bf16 %v1358_v35, %v1356_v34  ;;  %v1378_v34 = vld [vmem:[%s9139_s10 + $0x278] sm:$0xff] }
 0x39d   : > { %1844 = vmatpush1.bf16.msra.mxu0 %v1549_v54  ;;  %v1561_v54 = vpack.c.bf16 %v1357_v36, %v1355_v51  ;;  %v1380_v51 = vld [vmem:[%s9139_s10 + $0x288] sm:$0xff]  ;;  %v1382_v36 = vld [vmem:[%s9139_s10 + $0x298] sm:$0xff] }
 0x39e   : > { %1845 = vmatprep.subr.bf16.mxu0 %v1552_v55  ;;  %v1564_v55 = vpack.c.bf16 %v1362_v53, %v1360_v52  ;;  %v1379_v53 = vld [vmem:[%s9139_s10 + $0x280] sm:$0xff] }
 0x3a1   : > { %1846 = vmatpush1.bf16.msra.mxu0 %v1551_v62  ;;  %v1563_v62 = vpack.c.bf16 %v1361_v57, %v1359_v56  ;;  %v1291_v56 = vld [vmem:[%s10464_s23 + $0xc0] sm:$0xff] }
 0x3a2   : > { %1847 = vmatprep.subr.bf16.mxu0 %v1554_v63  ;;  %v1275_v63 = vld [vmem:[%s10464_s23 + $0x40] sm:$0xff] }
 0x3a3   : > { %v7365_v11 = vcombine.high %v1275_v63, %v1279_v9  ;;  %v7364_v35 = vcombine.low %v1275_v63, %v1279_v9  ;;  %v1295_v57 = vld [vmem:[%s10464_s23 + $0xe0] sm:$0xff]  ;;  %v1385_v9 = vld [vmem:[%s9139_s10 + $0x2b0] sm:$0xff] }
 0x3a5   : > { %1848 = vmatpush1.bf16.msra.mxu0 %v1553_v40  ;;  %v1368_v40 = vld [vmem:[%s9139_s10 + $0x228] sm:$0xff] }
 0x3a6   : > { %1849 = vmatprep.subr.bf16.mxu0 %v1556_v42  ;;  %v1370_v42 = vld [vmem:[%s9139_s10 + $0x238] sm:$0xff] }
 0x3a7   : > { %v1568_v13 = vpack.c.bf16 %v1370_v42, %v1368_v40  ;;  %v1388_v40 = vld [vmem:[%s9139_s10 + $0x2c8] sm:$0xff]  ;;  %v1390_v42 = vld [vmem:[%s9139_s10 + $0x2d8] sm:$0xff] }
 0x3a9   : > { %1850 = vmatpush1.bf16.msra.mxu0 %v1555_v16  ;;  %v1369_v16 = vld [vmem:[%s9139_s10 + $0x230] sm:$0xff] }
 0x3aa   : > { %1851 = vmatprep.subr.bf16.mxu0 %v1558_v19  ;;  %v1372_v19 = vld [vmem:[%s9139_s10 + $0x248] sm:$0xff]  ;;  %v1567_v23 = vpack.c.bf16 %v1369_v16, %v1367_v15  ;;  %v1389_v15 = vld [vmem:[%s9139_s10 + $0x2d0] sm:$0xff] }
 0x3ab   : > { %v1570_v37 = vpack.c.bf16 %v1374_v21, %v1372_v19  ;;  %v9253_v16 = vld [vmem:[%s10464_s23 + $0x8] sm:$0xff] }
 0x3ac   : > { %v9256_v19 = vld [vmem:[%s10464_s23 + $0x28] sm:$0xff] }
 0x3ad   : > { %1852 = vmatpush1.bf16.msra.mxu0 %v1557_v38  ;;  %v1373_v38 = vld [vmem:[%s9139_s10 + $0x250] sm:$0xff]  ;;  %v1392_v21 = vld [vmem:[%s9139_s10 + $0x2e8] sm:$0xff] }
 0x3ae   : > { %1853 = vmatprep.subr.bf16.mxu0 %v1560_v43  ;;  %v1283_v43 = vld [vmem:[%s10464_s23 + $0x80] sm:$0xff]  ;;  %v1569_v58 = vpack.c.bf16 %v1373_v38, %v1371_v24  ;;  %v7380_v24 = vcombine.low %v1291_v56, %v1295_v57  ;;  %v7359_v38 = vcombine.high %v9253_v16, %v9256_v19 }
 0x3af   : > { %v7373_v60 = vcombine.high %v1283_v43, %v1287_v45 }
 0x3b1   : > { %1854 = vmatpush1.bf16.msra.mxu0 %v1559_v47  ;;  %v1375_v47 = vld [vmem:[%s9139_s10 + $0x260] sm:$0xff] }
 0x3b2   : > { %1855 = vmatprep.subr.bf16.mxu0 %v1562_v50  ;;  %v1377_v50 = vld [vmem:[%s9139_s10 + $0x270] sm:$0xff] }
 0x3b3   : > { %v1571_v52 = vpack.c.bf16 %v1377_v50, %v1375_v47  ;;  %v1397_v47 = vld [vmem:[%s9139_s10 + $0x310] sm:$0xff]  ;;  %v1400_v50 = vld [vmem:[%s9139_s10 + $0x328] sm:$0xff] }
 0x3b5   : > { %1856 = vmatpush1.bf16.msra.mxu0 %v1561_v54  ;;  %v1574_v54 = vpack.c.bf16 %v1382_v36, %v1380_v51  ;;  %v1402_v51 = vld [vmem:[%s9139_s10 + $0x338] sm:$0xff] }
 0x3b6   : > { %1857 = vmatprep.subr.bf16.mxu0 %v1564_v55  ;;  %v1381_v55 = vld [vmem:[%s9139_s10 + $0x290] sm:$0xff] }
 0x3b7   : > { %v1573_v63 = vpack.c.bf16 %v1381_v55, %v1379_v53  ;;  %v1399_v53 = vld [vmem:[%s9139_s10 + $0x320] sm:$0xff]  ;;  %v2950_v55 = vpop.permute.xlu0 %2949 }
 0x3b9   : > { %1858 = vmatpush1.bf16.msra.mxu0 %v1563_v62  ;;  %v7372_v62 = vcombine.low %v1283_v43, %v1287_v45  ;;  %v1391_v45 = vld [vmem:[%s9139_s10 + $0x2e0] sm:$0xff] }
 0x3ba   : > { %1900 = vmatprep.subr.bf16.mxu0 %v1566_v1  ;;  %v7381_v1 = vcombine.high %v1291_v56, %v1295_v57  ;;  %v1404_v56 = vld [vmem:[%s9139_s10 + $0x348] sm:$0xff]  ;;  %v1406_v57 = vld [vmem:[%s9139_s10 + $0x358] sm:$0xff] }
 0x3bc   : > { %1860 = vmatmul.mubr.bf16.vlgmr.msra.gmra.mrb[0].mxu0 %v7356_v18  ;;  %v1572_v18 = vpack.c.bf16 %v1378_v34, %v1376_v33  ;;  %v1393_v33 = vld [vmem:[%s9139_s10 + $0x2f0] sm:$0xff]  ;;  %v1396_v34 = vld [vmem:[%s9139_s10 + $0x308] sm:$0xff] }
 0x3bd   : > { %1901 = vmatpush1.bf16.msra.mxu0 %v1565_v41  ;;  %1869 = vmatprep.mubr.bf16.mxu0 %v7365_v11  ;;  %v1575_v41 = vpack.c.bf16 %v1385_v9, %v1383_v7  ;;  %v1387_v11 = vld [vmem:[%s9139_s10 + $0x2c0] sm:$0xff]  ;;  %v1410_v7 = vld [vmem:[%s9139_s10 + $0x378] sm:$0xff]  ;;  %v2960_v9 = vpop.permute.xlu0 %2959 }
 0x3be   : > { %1902 = vmatprep.subr.bf16.mxu0 %v1568_v13  ;;  %v1578_v13 = vpack.c.bf16 %v1390_v42, %v1388_v40 }
 0x3c1   : > { %1903 = vmatpush1.bf16.msra.mxu0 %v1567_v23  ;;  %v1394_v23 = vld [vmem:[%s9139_s10 + $0x2f8] sm:$0xff] }
 0x3c2   : > { %1904 = vmatprep.subr.bf16.mxu0 %v1570_v37  ;;  %v1577_v37 = vpack.c.bf16 %v1389_v15, %v1387_v11  ;;  %v1580_v43 = vpack.c.bf16 %v1394_v23, %v1392_v21  ;;  %v1409_v11 = vld [vmem:[%s9139_s10 + $0x370] sm:$0xff]  ;;  %v1412_v15 = vld [vmem:[%s9139_s10 + $0x388] sm:$0xff]  ;;  %v1414_v21 = vld [vmem:[%s9139_s10 + $0x398] sm:$0xff] }
 0x3c4   : > { %1870 = vmatmul.mubr.bf16.gmra.mrb[4].mxu0 %v7364_v35  ;;  %v1398_v35 = vld [vmem:[%s9139_s10 + $0x318] sm:$0xff] }
 0x3c5   : > { %1905 = vmatpush1.bf16.msra.mxu0 %v1569_v58  ;;  %1879 = vmatprep.mubr.bf16.mxu0 %v7373_v60  ;;  %v1579_v58 = vpack.c.bf16 %v1393_v33, %v1391_v45  ;;  %v1582_v60 = vpack.c.bf16 %v1398_v35, %v1396_v34  ;;  %v1590_v45 = vpack.c.bf16 %v1414_v21, %v1412_v15  ;;  %v1411_v33 = vld [vmem:[%s9139_s10 + $0x380] sm:$0xff]  ;;  %v1413_v34 = vld [vmem:[%s9139_s10 + $0x390] sm:$0xff]  ;;  %v2970_v35 = vpop.permute.xlu0 %2969 }
 0x3c6   : > { %1906 = vmatprep.subr.bf16.mxu0 %v1572_v18  ;;  %v1395_v18 = vld [vmem:[%s9139_s10 + $0x300] sm:$0xff] }
 0x3c7   : > { %v1581_v36 = vpack.c.bf16 %v1397_v47, %v1395_v18  ;;  %v1416_v47 = vld [vmem:[%s9139_s10 + $0x3a8] sm:$0xff] }
 0x3c9   : > { %1907 = vmatpush1.bf16.msra.mxu0 %v1571_v52  ;;  %v1584_v52 = vpack.c.bf16 %v1402_v51, %v1400_v50  ;;  %v1418_v50 = vld [vmem:[%s9139_s10 + $0x3b8] sm:$0xff]  ;;  %v2980_v15 = vpop.permute.xlu0 %2979 }
 0x3ca   : > { %1908 = vmatprep.subr.bf16.mxu0 %v1574_v54  ;;  %v1401_v54 = vld [vmem:[%s9139_s10 + $0x330] sm:$0xff] }
 0x3cb   : > { %v1583_v61 = vpack.c.bf16 %v1401_v54, %v1399_v53 }
 0x3cc   : > { %1880 = vmatmul.mubr.bf16.gmra.mrb[8].mxu0 %v7372_v62  ;;  %v1586_v62 = vpack.c.bf16 %v1406_v57, %v1404_v56 }
 0x3cd   : > { %1909 = vmatpush1.bf16.msra.mxu0 %v1573_v63  ;;  %1889 = vmatprep.mubr.bf16.mxu0 %v7381_v1  ;;  %v1403_v63 = vld [vmem:[%s9139_s10 + $0x340] sm:$0xff]  ;;  %v1405_v1 = vld [vmem:[%s9139_s10 + $0x350] sm:$0xff] }
 0x3ce   : > { %1910 = vmatprep.subr.bf16.mxu0 %v1576_v6  ;;  %v1408_v6 = vld [vmem:[%s9139_s10 + $0x368] sm:$0xff]  ;;  %v1585_v40 = vpack.c.bf16 %v1405_v1, %v1403_v63  ;;  %v1592_v1 = vpack.c.bf16 %v1418_v50, %v1416_v47 }
 0x3cf   : > { %v1588_v42 = vpack.c.bf16 %v1410_v7, %v1408_v6  ;;  %v1415_v6 = vld [vmem:[%s9139_s10 + $0x3a0] sm:$0xff]  ;;  %v1417_v7 = vld [vmem:[%s9139_s10 + $0x3b0] sm:$0xff] }
 0x3d1   : > { %1911 = vmatpush1.bf16.msra.mxu0 %v1575_v41  ;;  %v1407_v41 = vld [vmem:[%s9139_s10 + $0x360] sm:$0xff] }
 0x3d2   : > { %1912 = vmatprep.subr.bf16.mxu0 %v1578_v13  ;;  %v2965_v13 = vpop.permute.xlu1 %2964 }
 0x3d4   : > { %1890 = vmatmul.mubr.bf16.gmra.mrb[12].mxu0 %v7380_v24  ;;  %v1587_v24 = vpack.c.bf16 %v1409_v11, %v1407_v41  ;;  %v1422_v41 = vld [vmem:[%s9139_s10 + $0x3d8] sm:$0xff] }
 0x3d5   : > { %1913 = vmatpush1.bf16.msra.mxu0 %v1577_v37  ;;  %1932 = vmatprep.mubr.bf16.mxu0 %v7359_v38  ;;  %v9282_v37 = vstv %s7676_s22  ;;  %s10465_s22 = sld [smem:[#allocation10_spill]] }
 0x3d6   : > { %1914 = vmatprep.subr.bf16.mxu0 %v1580_v43  ;;  %v6224_v53 = vmul.f32 %v9057_v25, %v9282_v37  ;;  %v2975_v54 = vpop.permute.xlu1 %2974  ;;  %v6225_v25 = vmul.f32 %v9061_v27, %v9282_v37 }
 0x3d9   : > { %1915 = vmatpush1.bf16.msra.mxu0 %v1579_v58  ;;  %v9286_v58 = vstv %s7677_s0  ;;  %s7447_s0 = sld [smem:[#allocation2 + $0x81]] }
 0x3da   : > { %1916 = vmatprep.subr.bf16.mxu0 %v1582_v60 }
 0x3dd   : > { %1917 = vmatpush1.bf16.msra.mxu0 %v1581_v36 }
 0x3de   : > { %1918 = vmatprep.subr.bf16.mxu0 %v1584_v52 }
 0x3e1   : > { %1919 = vmatpush1.bf16.msra.mxu0 %v1583_v61  ;;  %v1589_v61 = vpack.c.bf16 %v1413_v34, %v1411_v33  ;;  %v1419_v33 = vld [vmem:[%s9139_s10 + $0x3c0] sm:$0xff]  ;;  %v1421_v34 = vld [vmem:[%s9139_s10 + $0x3d0] sm:$0xff] }
 0x3e2   : > { %1920 = vmatprep.subr.bf16.mxu0 %v1586_v62 }
 0x3e5   : > { %1921 = vmatpush1.bf16.msra.mxu0 %v1585_v40 }
 0x3e6   : > { %1922 = vmatprep.subr.bf16.mxu0 %v1588_v42  ;;  %v1420_v42 = vld [vmem:[%s9139_s10 + $0x3c8] sm:$0xff] }
 0x3e9   : > { %1923 = vmatpush1.bf16.msra.mxu0 %v1587_v24 }
 0x3ea   : > { %1924 = vmatprep.subr.bf16.mxu0 %v1590_v45  ;;  %v1594_v45 = vpack.c.bf16 %v1422_v41, %v1420_v42  ;;  %v1428_v42 = vld [vmem:[%s9139_s10 + $0x408] sm:$0xff]  ;;  %v6227_v41 = vmul.f32 %v9282_v37, %v9071_v32  ;;  %v1429_v32 = vld [vmem:[%s9139_s10 + $0x410] sm:$0xff] }
 0x3ed   : > { %1925 = vmatpush1.bf16.msra.mxu0 %v1589_v61 }
 0x3ee   : > { %1926 = vmatprep.subr.bf16.mxu0 %v1592_v1 }
 0x459   : > { %v8040_v23 = vpop.f32.mrb[56].mxu1 }
 0x45a   : > { %v3062_v38 = vadd.f32 %v8040_v23, %v2960_v9  ;;  %v3053_v43 = vpop.f32.mrb[57].mxu1  ;;  %v6223_v9 = vmul.f32 %v9282_v37, %v9063_v28  ;;  %v1591_v28 = vpack.c.bf16 %v1417_v7, %v1415_v6  ;;  %v1423_v7 = vld [vmem:[%s9139_s10 + $0x3e0] sm:$0xff] }
 0x45b   : > { %v3054_v60 = vadd.f32 %v3053_v43, %v2950_v55  ;;  %v8041_v18 = vpop.f32.mrb[58].mxu1  ;;  %v6222_v55 = vmul.f32 %v9282_v37, %v9059_v26 }
 0x45c   : > { %v3086_v51 = vmax.f32 %v3062_v38, 0.0  ;;  %v3065_v36 = vadd.f32 %v8041_v18, %v2965_v13  ;;  %v3056_v52 = vpop.f32.mrb[59].mxu1  ;;  %v2985_v18 = vpop.permute.xlu1 %2984  ;;  %1927 = vmatpush1.bf16.msra.mxu0 %v1591_v28  ;;  %v1427_v28 = vld [vmem:[%s9139_s10 + $0x400] sm:$0xff] }
 0x45d   : > { %v3084_v56 = vmax.f32 %v3054_v60, 0.0  ;;  %v3057_v57 = vadd.f32 %v3056_v52, %v2955_v59  ;;  %1928 = vmatprep.subr.bf16.mxu0 %v1594_v45 }
 0x45e   : > { %v6234_v62 = vmul.f32 %v9286_v58, %v3086_v51  ;;  %v3087_v63 = vmax.f32 %v3065_v36, 0.0  ;;  %v1426_v36 = vld [vmem:[%s9139_s10 + $0x3f8] sm:$0xff] }
 0x45f   : > { %v6232_v59 = vmul.f32 %v9286_v58, %v3084_v56  ;;  %v3085_v40 = vmax.f32 %v3057_v57, 0.0 }
 0x460   : > { %v3106_v26 = vpack.c.bf16 %v3087_v63, %v3086_v51  ;;  %v6235_v11 = vmul.f32 %v9286_v58, %v3087_v63  ;;  %v9305_v13 = vadd.f32 %v6234_v62, %v6224_v53  ;;  %v1424_v51 = vld [vmem:[%s9139_s10 + $0x3e8] sm:$0xff]  ;;  %v6228_v62 = vmul.f32 %v9065_v29, %v9282_v37  ;;  %v1430_v29 = vld [vmem:[%s9139_s10 + $0x418] sm:$0xff] }
 0x461   : > { %v3105_v21 = vpack.c.bf16 %v3085_v40, %v3084_v56  ;;  %v6233_v27 = vmul.f32 %v9286_v58, %v3085_v40  ;;  %v8044_v23 = vpop.f32.mrb[60].mxu1  ;;  %v9308_v24 = vadd.f32 %v6232_v59, %v6222_v55  ;;  %v1596_v6 = vpack.c.bf16 %v1426_v36, %v1424_v51  ;;  %v1438_v51 = vld [vmem:[%s9139_s10 + $0x458] sm:$0xff] }
 0x462   : > { %v3078_v38 = vadd.f32 %v8044_v23, %v2980_v15  ;;  %v3069_v43 = vpop.f32.mrb[61].mxu1  ;;  %v9312_v60 = vadd.f32 %v6235_v11, %v6225_v25  ;;  %v1425_v25 = vld [vmem:[%s9139_s10 + $0x3f0] sm:$0xff]  ;;  %v6229_v59 = vmul.f32 %v9069_v31, %v9282_v37  ;;  %v1598_v23 = vpack.c.bf16 %v1430_v29, %v1428_v42  ;;  %v1447_v29 = vld [vmem:[%s9139_s10 + $0x4a0] sm:$0xff] }
 0x463   : > { %v3070_v47 = vadd.f32 %v3069_v43, %v2970_v35  ;;  %v8045_v50 = vpop.f32.mrb[62].mxu1  ;;  %8048 = vmatprep.mubr.msk.bf16.mxu1 %vm3115_vm7, %v3105_v21  ;;  %v9317_v52 = vadd.f32 %v6233_v27, %v6223_v9  ;;  %v1593_v35 = vpack.c.bf16 %v1421_v34, %v1419_v33  ;;  %v6226_v9 = vmul.f32 %v9282_v37, %v9067_v30  ;;  %v1434_v43 = vld [vmem:[%s9139_s10 + $0x438] sm:$0xff] }
 0x464   : > { %v3090_v53 = vmax.f32 %v3078_v38, 0.0  ;;  %v3081_v56 = vadd.f32 %v8045_v50, %v2985_v18  ;;  %v3072_v57 = vpop.f32.mrb[63].mxu1  ;;  %8049 = vmatmul.mubr.msk.bf16.vlgmr.msra.gmra.mrb[64].mxu1 %vm3115_vm7, %v3106_v26  ;;  %v1595_v21 = vpack.c.bf16 %v1425_v25, %v1423_v7  ;;  %v1432_v38 = vld [vmem:[%s9139_s10 + $0x428] sm:$0xff]  ;;  %v1597_v33 = vpack.c.bf16 %v1429_v32, %v1427_v28  ;;  %v1431_v18 = vld [vmem:[%s9139_s10 + $0x420] sm:$0xff]  ;;  %v1458_v32 = vld [vmem:[%s9139_s10 + $0x4f8] sm:$0xff] }
 0x465   : > { %v3088_v61 = vmax.f32 %v3070_v47, 0.0  ;;  %v3073_v55 = vadd.f32 %v3072_v57, %v2975_v54  ;;  %1929 = vmatpush1.bf16.msra.mxu0 %v1593_v35  ;;  %v1600_v34 = vpack.c.bf16 %v1434_v43, %v1432_v38  ;;  %v1433_v47 = vld [vmem:[%s9139_s10 + $0x430] sm:$0xff]  ;;  %v1436_v50 = vld [vmem:[%s9139_s10 + $0x448] sm:$0xff]  ;;  %v1442_v57 = vld [vmem:[%s9139_s10 + $0x478] sm:$0xff] }
 0x466   : > { %v6238_v63 = vmul.f32 %v9286_v58, %v3090_v53  ;;  %v3091_v1 = vmax.f32 %v3081_v56, 0.0  ;;  %1930 = vmatprep.subr.bf16.mxu0 %v1596_v6  ;;  %v1599_v36 = vpack.c.bf16 %v1433_v47, %v1431_v18  ;;  %v1440_v56 = vld [vmem:[%s9139_s10 + $0x468] sm:$0xff]  ;;  %v1439_v35 = vld [vmem:[%s9139_s10 + $0x460] sm:$0xff]  ;;  %v1462_v18 = vld [vmem:[%s9139_s10 + $0x518] sm:$0xff] }
 0x467   : > { %v6236_v54 = vmul.f32 %v9286_v58, %v3088_v61  ;;  %v3089_v40 = vmax.f32 %v3073_v55, 0.0  ;;  %v1604_v55 = vpack.c.bf16 %v1442_v57, %v1440_v56  ;;  %v1443_v25 = vld [vmem:[%s9139_s10 + $0x480] sm:$0xff]  ;;  %v1456_v28 = vld [vmem:[%s9139_s10 + $0x4e8] sm:$0xff] }
 0x468   : > { %v3108_v26 = vpack.c.bf16 %v3091_v1, %v3090_v53  ;;  %v6239_v11 = vmul.f32 %v9286_v58, %v3091_v1  ;;  %v9335_v15 = vadd.f32 %v6238_v63, %v6228_v62  ;;  %v1602_v53 = vpack.c.bf16 %v1438_v51, %v1436_v50  ;;  %v1441_v62 = vld [vmem:[%s9139_s10 + $0x470] sm:$0xff]  ;;  %v1444_v63 = vld [vmem:[%s9139_s10 + $0x488] sm:$0xff]  ;;  %v1446_v1 = vld [vmem:[%s9139_s10 + $0x498] sm:$0xff] }
 0x469   : > { %v3107_v30 = vpack.c.bf16 %v3089_v40, %v3088_v61  ;;  %v6237_v31 = vmul.f32 %v9286_v58, %v3089_v40  ;;  %v9338_v27 = vadd.f32 %v6236_v54, %v6226_v9  ;;  %v7358_v58 = vcombine.low %v9253_v16, %v9256_v19  ;;  %1931 = vmatpush1.bf16.msra.mxu0 %v1595_v21  ;;  %v1435_v16 = vld [vmem:[%s9139_s10 + $0x440] sm:$0xff]  ;;  %v1437_v19 = vld [vmem:[%s9139_s10 + $0x450] sm:$0xff]  ;;  %v1450_v54 = vld [vmem:[%s9139_s10 + $0x4b8] sm:$0xff] }
 0x46a   : > { %v9342_v37 = vadd.f32 %v6239_v11, %v6229_v59  ;;  %1973 = vmatprep.subr.bf16.mxu0 %v1598_v23  ;;  %v1601_v61 = vpack.c.bf16 %v1437_v19, %v1435_v16  ;;  %v1603_v6 = vpack.c.bf16 %v1441_v62, %v1439_v35  ;;  %v1606_v7 = vpack.c.bf16 %v1446_v1, %v1444_v63  ;;  %v1445_v9 = vld [vmem:[%s9139_s10 + $0x490] sm:$0xff]  ;;  %v1448_v59 = vld [vmem:[%s9139_s10 + $0x4a8] sm:$0xff]  ;;  %v1454_v11 = vld [vmem:[%s9139_s10 + $0x4d8] sm:$0xff] }
 0x46b   : > { %8052 = vmatprep.mubr.msk.bf16.mxu1 %vm3115_vm7, %v3107_v30  ;;  %v9347_v45 = vadd.f32 %v6237_v31, %v6227_v41  ;;  %v1605_v40 = vpack.c.bf16 %v1445_v9, %v1443_v25  ;;  %v1608_v42 = vpack.c.bf16 %v1450_v54, %v1448_v59  ;;  %v1449_v41 = vld [vmem:[%s9139_s10 + $0x4b0] sm:$0xff]  ;;  %v1451_v21 = vld [vmem:[%s9139_s10 + $0x4c0] sm:$0xff]  ;;  %v1612_v43 = vpack.c.bf16 %v1458_v32, %v1456_v28  ;;  %v1464_v16 = vld [vmem:[%s9139_s10 + $0x528] sm:$0xff] }
 0x46c   : > { %8053 = vmatmul.mubr.msk.bf16.gmra.mrb[68].mxu1 %vm3115_vm7, %v3108_v26  ;;  %1933 = vmatmul.mubr.bf16.vlgmr.msra.gmra.mrb[0].mxu0 %v7358_v58  ;;  %v1452_v26 = vld [vmem:[%s9139_s10 + $0x4c8] sm:$0xff]  ;;  %v1607_v30 = vpack.c.bf16 %v1449_v41, %v1447_v29  ;;  %v1453_v23 = vld [vmem:[%s9139_s10 + $0x4d0] sm:$0xff]  ;;  %v1455_v58 = vld [vmem:[%s9139_s10 + $0x4e0] sm:$0xff] }
 0x46d   : > { %1974 = vmatpush1.bf16.msra.mxu0 %v1597_v33  ;;  %v1610_v31 = vpack.c.bf16 %v1454_v11, %v1452_v26  ;;  %v1609_v38 = vpack.c.bf16 %v1453_v23, %v1451_v21  ;;  %v1457_v33 = vld [vmem:[%s9139_s10 + $0x4f0] sm:$0xff]  ;;  %v1459_v51 = vld [vmem:[%s9139_s10 + $0x500] sm:$0xff]  ;;  %v1466_v19 = vld [vmem:[%s9139_s10 + $0x538] sm:$0xff] }
 0x46e   : > { %1975 = vmatprep.subr.bf16.mxu0 %v1600_v34  ;;  %v1460_v34 = vld [vmem:[%s9139_s10 + $0x508] sm:$0xff]  ;;  %v1611_v47 = vpack.c.bf16 %v1457_v33, %v1455_v58  ;;  %v1616_v56 = vpack.c.bf16 %v1466_v19, %v1464_v16  ;;  %v1463_v57 = vld [vmem:[%s9139_s10 + $0x520] sm:$0xff]  ;;  %v1469_v25 = vld [vmem:[%s9139_s10 + $0x550] sm:$0xff] }
 0x46f   : > { %v1614_v50 = vpack.c.bf16 %v1462_v18, %v1460_v34  ;;  %v1276_v35 = vld [vmem:[%s10464_s23 + $0x48] sm:$0xff]  ;;  %v1471_v41 = vld [vmem:[%s9139_s10 + $0x560] sm:$0xff]  ;;  %v1473_v26 = vld [vmem:[%s9139_s10 + $0x570] sm:$0xff] }
 0x470   : > { %v1280_v62 = vld [vmem:[%s10464_s23 + $0x68] sm:$0xff]  ;;  %v1619_v11 = vpack.c.bf16 %v1473_v26, %v1471_v41  ;;  %v1478_v28 = vld [vmem:[%s9139_s10 + $0x598] sm:$0xff]  ;;  %v1475_v32 = vld [vmem:[%s9139_s10 + $0x580] sm:$0xff] }
 0x471   : > { %1976 = vmatpush1.bf16.msra.mxu0 %v1599_v36  ;;  %v1461_v36 = vld [vmem:[%s9139_s10 + $0x510] sm:$0xff]  ;;  %v1468_v63 = vld [vmem:[%s9139_s10 + $0x548] sm:$0xff]  ;;  %v7367_v1 = vcombine.high %v1276_v35, %v1280_v62  ;;  %v7366_v59 = vcombine.low %v1276_v35, %v1280_v62  ;;  %v1482_v18 = vld [vmem:[%s9139_s10 + $0x5b8] sm:$0xff] }
 0x472   : > { %1977 = vmatprep.subr.bf16.mxu0 %v1602_v53  ;;  %v1613_v53 = vpack.c.bf16 %v1461_v36, %v1459_v51  ;;  %v1476_v21 = vld [vmem:[%s9139_s10 + $0x588] sm:$0xff]  ;;  %v1481_v51 = vld [vmem:[%s9139_s10 + $0x5b0] sm:$0xff] }
 0x473   : > { %1942 = vmatprep.mubr.bf16.mxu0 %v7367_v1  ;;  %v1480_v34 = vld [vmem:[%s9139_s10 + $0x5a8] sm:$0xff] }
 0x474   : > { %1943 = vmatmul.mubr.bf16.gmra.mrb[4].mxu0 %v7366_v59  ;;  %v1296_v16 = vld [vmem:[%s10464_s23 + $0xe8] sm:$0xff]  ;;  %v1489_v59 = vld [vmem:[%s9139_s10 + $0x5f0] sm:$0xff] }
 0x475   : > { %1978 = vmatpush1.bf16.msra.mxu0 %v1601_v61  ;;  %v1465_v61 = vld [vmem:[%s9139_s10 + $0x530] sm:$0xff]  ;;  %v1484_v19 = vld [vmem:[%s9139_s10 + $0x5c8] sm:$0xff] }
 0x476   : > { %1979 = vmatprep.subr.bf16.mxu0 %v1604_v55  ;;  %v1615_v55 = vpack.c.bf16 %v1465_v61, %v1463_v57  ;;  %v1486_v57 = vld [vmem:[%s9139_s10 + $0x5d8] sm:$0xff]  ;;  %v1483_v61 = vld [vmem:[%s9139_s10 + $0x5c0] sm:$0xff]  ;;  %v1488_v1 = vld [vmem:[%s9139_s10 + $0x5e8] sm:$0xff] }
 0x477   : > { %v1626_v35 = vpack.c.bf16 %v1486_v57, %v1484_v19  ;;  %v1505_v57 = vld [vmem:[%s9139_s10 + $0x670] sm:$0xff] }
 0x479   : > { %1980 = vmatpush1.bf16.msra.mxu0 %v1603_v6  ;;  %v1470_v6 = vld [vmem:[%s9139_s10 + $0x558] sm:$0xff] }
 0x47a   : > { %1981 = vmatprep.subr.bf16.mxu0 %v1606_v7  ;;  %v1467_v7 = vld [vmem:[%s9139_s10 + $0x540] sm:$0xff]  ;;  %v1618_v9 = vpack.c.bf16 %v1470_v6, %v1468_v63  ;;  %v1490_v6 = vld [vmem:[%s9139_s10 + $0x5f8] sm:$0xff] }
 0x47b   : > { %v1617_v54 = vpack.c.bf16 %v1469_v25, %v1467_v7  ;;  %v1628_v7 = vpack.c.bf16 %v1490_v6, %v1488_v1  ;;  %v8409_v25 = vld [vmem:[%s10465_s22] sm:$0xff]  }
 0x47c   : > { %8064 = vmatprep.mubr.msk.bf16.mxu1 %vm2727_vm5, %v8409_v25  ;;  %v1507_v25 = vld [vmem:[%s9139_s10 + $0x680] sm:$0xff] }
 0x47d   : > { %1982 = vmatpush1.bf16.msra.mxu0 %v1605_v40  ;;  %v1472_v40 = vld [vmem:[%s9139_s10 + $0x568] sm:$0xff] }
 0x47e   : > { %1983 = vmatprep.subr.bf16.mxu0 %v1608_v42  ;;  %v1474_v42 = vld [vmem:[%s9139_s10 + $0x578] sm:$0xff] }
 0x47f   : > { %v1620_v29 = vpack.c.bf16 %v1474_v42, %v1472_v40  ;;  %v1269_v40 = vld [vmem:[%s10464_s23 + $0x10] sm:$0xff] }
 0x480   : > { %v1273_v42 = vld [vmem:[%s10464_s23 + $0x30] sm:$0xff] }
 0x481   : > { %1984 = vmatpush1.bf16.msra.mxu0 %v1607_v30  ;;  %v1284_v30 = vld [vmem:[%s10464_s23 + $0x88] sm:$0xff]  ;;  %v7360_v41 = vcombine.low %v1269_v40, %v1273_v42  ;;  %v7361_v26 = vcombine.high %v1269_v40, %v1273_v42  ;;  %v1285_v40 = vld [vmem:[%s10464_s23 + $0x90] sm:$0xff] }
 0x482   : > { %1985 = vmatprep.subr.bf16.mxu0 %v1610_v31  ;;  %v1288_v31 = vld [vmem:[%s10464_s23 + $0xa8] sm:$0xff]  ;;  %v1289_v42 = vld [vmem:[%s10464_s23 + $0xb0] sm:$0xff] }
 0x483   : > { %v7375_v23 = vcombine.high %v1284_v30, %v1288_v31  ;;  %v7374_v58 = vcombine.low %v1284_v30, %v1288_v31  ;;  %v1491_v30 = vld [vmem:[%s9139_s10 + $0x600] sm:$0xff]  ;;  %v1493_v31 = vld [vmem:[%s9139_s10 + $0x610] sm:$0xff] }
 0x485   : > { %1986 = vmatpush1.bf16.msra.mxu0 %v1609_v38  ;;  %v1477_v38 = vld [vmem:[%s9139_s10 + $0x590] sm:$0xff]  ;;  %1952 = vmatprep.mubr.bf16.mxu0 %v7375_v23  ;;  %v1629_v23 = vpack.c.bf16 %v1493_v31, %v1491_v30 }
 0x486   : > { %1987 = vmatprep.subr.bf16.mxu0 %v1612_v43  ;;  %v1622_v43 = vpack.c.bf16 %v1478_v28, %v1476_v21  ;;  %v1621_v33 = vpack.c.bf16 %v1477_v38, %v1475_v32  ;;  %1953 = vmatmul.mubr.bf16.gmra.mrb[8].mxu0 %v7374_v58  ;;  %v1496_v28 = vld [vmem:[%s9139_s10 + $0x628] sm:$0xff]  ;;  %v1498_v32 = vld [vmem:[%s9139_s10 + $0x638] sm:$0xff]  ;;  %v1497_v58 = vld [vmem:[%s9139_s10 + $0x630] sm:$0xff] }
 0x487   : > { %v1632_v38 = vpack.c.bf16 %v1498_v32, %v1496_v28  ;;  %v1513_v30 = vld [vmem:[%s9139_s10 + $0x6b0] sm:$0xff]  ;;  %v7376_v32 = vcombine.low %v1285_v40, %v1289_v42 }
 0x488   : > { %v1293_v31 = vld [vmem:[%s10464_s23 + $0xd0] sm:$0xff] }
 0x489   : > { %1988 = vmatpush1.bf16.msra.mxu0 %v1611_v47  ;;  %v1624_v47 = vpack.c.bf16 %v1482_v18, %v1480_v34  ;;  %v1500_v34 = vld [vmem:[%s9139_s10 + $0x648] sm:$0xff]  ;;  %v1502_v18 = vld [vmem:[%s9139_s10 + $0x658] sm:$0xff]  ;;  %v1297_v28 = vld [vmem:[%s10464_s23 + $0xf0] sm:$0xff] }
 0x48a   : > { %1989 = vmatprep.subr.bf16.mxu0 %v1614_v50  ;;  %v1479_v50 = vld [vmem:[%s9139_s10 + $0x5a0] sm:$0xff] }
 0x48b   : > { %v1623_v36 = vpack.c.bf16 %v1481_v51, %v1479_v50  ;;  %v1634_v50 = vpack.c.bf16 %v1502_v18, %v1500_v34  ;;  %v1501_v51 = vld [vmem:[%s9139_s10 + $0x650] sm:$0xff]  ;;  %v1520_v18 = vld [vmem:[%s9139_s10 + $0x6e8] sm:$0xff] }
 0x48c   : > { %v1517_v34 = vld [vmem:[%s9139_s10 + $0x6d0] sm:$0xff] }
 0x48d   : > { %1990 = vmatpush1.bf16.msra.mxu0 %v1613_v53  ;;  %v1292_v53 = vld [vmem:[%s10464_s23 + $0xc8] sm:$0xff] }
 0x48e   : > { %1991 = vmatprep.subr.bf16.mxu0 %v1616_v56  ;;  %v7383_v56 = vcombine.high %v1292_v53, %v1296_v16  ;;  %v7382_v62 = vcombine.low %v1292_v53, %v1296_v16  ;;  %v1506_v53 = vld [vmem:[%s9139_s10 + $0x678] sm:$0xff] }
 0x490   : > { %1962 = vmatprep.mubr.bf16.mxu0 %v7383_v56  ;;  %v1503_v56 = vld [vmem:[%s9139_s10 + $0x660] sm:$0xff] }
 0x491   : > { %1992 = vmatpush1.bf16.msra.mxu0 %v1615_v55  ;;  %v1485_v55 = vld [vmem:[%s9139_s10 + $0x5d0] sm:$0xff] }
 0x492   : > { %1993 = vmatprep.subr.bf16.mxu0 %v1618_v9  ;;  %v1625_v63 = vpack.c.bf16 %v1485_v55, %v1483_v61  ;;  %1963 = vmatmul.mubr.bf16.gmra.mrb[12].mxu0 %v7382_v62  ;;  %v1487_v9 = vld [vmem:[%s9139_s10 + $0x5e0] sm:$0xff]  ;;  %v1508_v61 = vld [vmem:[%s9139_s10 + $0x688] sm:$0xff]  ;;  %v1510_v55 = vld [vmem:[%s9139_s10 + $0x698] sm:$0xff] }
 0x493   : > { %2005 = vmatprep.mubr.bf16.mxu0 %v7361_v26  ;;  %v1281_v62 = vld [vmem:[%s10464_s23 + $0x70] sm:$0xff] }
 0x495   : > { %1994 = vmatpush1.bf16.msra.mxu0 %v1617_v54  ;;  %v1627_v54 = vpack.c.bf16 %v1489_v59, %v1487_v9  ;;  %v1509_v9 = vld [vmem:[%s9139_s10 + $0x690] sm:$0xff]  ;;  %v1512_v59 = vld [vmem:[%s9139_s10 + $0x6a8] sm:$0xff] }
 0x496   : > { %1995 = vmatprep.subr.bf16.mxu0 %v1620_v29  ;;  %v1492_v29 = vld [vmem:[%s9139_s10 + $0x608] sm:$0xff] }
 0x499   : > { %1996 = vmatpush1.bf16.msra.mxu0 %v1619_v11  ;;  %v1494_v11 = vld [vmem:[%s9139_s10 + $0x618] sm:$0xff] }
 0x49a   : > { %1997 = vmatprep.subr.bf16.mxu0 %v1622_v43  ;;  %v1630_v21 = vpack.c.bf16 %v1494_v11, %v1492_v29  ;;  %v1495_v43 = vld [vmem:[%s9139_s10 + $0x620] sm:$0xff]  ;;  %v7377_v29 = vcombine.high %v1285_v40, %v1289_v42  ;;  %v1532_v40 = vld [vmem:[%s9139_s10 + $0x748] sm:$0xff] }
 0x49b   : > { %v1511_v11 = vld [vmem:[%s9139_s10 + $0x6a0] sm:$0xff] }
 0x49c   : > { %v1531_v42 = vld [vmem:[%s9139_s10 + $0x740] sm:$0xff] }
 0x49d   : > { %1998 = vmatpush1.bf16.msra.mxu0 %v1621_v33  ;;  %v1631_v33 = vpack.c.bf16 %v1497_v58, %v1495_v43  ;;  %v7385_v43 = vcombine.high %v1293_v31, %v1297_v28 }
 0x49e   : > { %1999 = vmatprep.subr.bf16.mxu0 %v1624_v47  ;;  %v1499_v47 = vld [vmem:[%s9139_s10 + $0x640] sm:$0xff] }
 0x49f   : > { %v1633_v16 = vpack.c.bf16 %v1501_v51, %v1499_v47  ;;  %v1522_v47 = vld [vmem:[%s9139_s10 + $0x6f8] sm:$0xff]  ;;  %v1519_v51 = vld [vmem:[%s9139_s10 + $0x6e0] sm:$0xff] }
 0x4a1   : > { %2000 = vmatpush1.bf16.msra.mxu0 %v1623_v36  ;;  %v1504_v36 = vld [vmem:[%s9139_s10 + $0x668] sm:$0xff] }
 0x4a2   : > { %2001 = vmatprep.subr.bf16.mxu0 %v1626_v35  ;;  %v1636_v19 = vpack.c.bf16 %v1506_v53, %v1504_v36  ;;  %v1277_v35 = vld [vmem:[%s10464_s23 + $0x50] sm:$0xff]  ;;  %v1644_v36 = vpack.c.bf16 %v1522_v47, %v1520_v18 }
 0x4a3   : > { %v7369_v1 = vcombine.high %v1277_v35, %v1281_v62  ;;  %v7368_v6 = vcombine.low %v1277_v35, %v1281_v62  ;;  %v1521_v53 = vld [vmem:[%s9139_s10 + $0x6f0] sm:$0xff] }
 0x4a5   : > { %2002 = vmatpush1.bf16.msra.mxu0 %v1625_v63  ;;  %v1635_v63 = vpack.c.bf16 %v1505_v57, %v1503_v56  ;;  %v1524_v56 = vld [vmem:[%s9139_s10 + $0x708] sm:$0xff]  ;;  %v1526_v57 = vld [vmem:[%s9139_s10 + $0x718] sm:$0xff] }
 0x4a6   : > { %2003 = vmatprep.subr.bf16.mxu0 %v1628_v7  ;;  %v1638_v7 = vpack.c.bf16 %v1510_v55, %v1508_v61  ;;  %v7384_v61 = vcombine.low %v1293_v31, %v1297_v28  ;;  %v1643_v55 = vpack.c.bf16 %v1521_v53, %v1519_v51  ;;  %v1646_v62 = vpack.c.bf16 %v1526_v57, %v1524_v56  ;;  %v1282_v31 = vld [vmem:[%s10464_s23 + $0x78] sm:$0xff] }
 0x4a7   : > { %v1286_v28 = vld [vmem:[%s10464_s23 + $0x98] sm:$0xff]  ;;  %v3193_v51 = vstv %s7447_s0  ;;  %s7609_s0 = sld [smem:[#allocation2 + $0x100]] }
 0x4a9   : > { %2004 = vmatpush1.bf16.msra.mxu0 %v1627_v54  ;;  %v1514_v54 = vld [vmem:[%s9139_s10 + $0x6b8] sm:$0xff] }
 0x4aa   : > { %2046 = vmatprep.subr.bf16.mxu0 %v1630_v21  ;;  %v1640_v26 = vpack.c.bf16 %v1514_v54, %v1512_v59  ;;  %v1516_v21 = vld [vmem:[%s9139_s10 + $0x6c8] sm:$0xff]  ;;  %v1527_v59 = vld [vmem:[%s9139_s10 + $0x720] sm:$0xff]  ;;  %v1529_v54 = vld [vmem:[%s9139_s10 + $0x730] sm:$0xff] }
 0x4ac   : > { %2006 = vmatmul.mubr.bf16.vlgmr.msra.gmra.mrb[0].mxu0 %v7360_v41  ;;  %v1637_v41 = vpack.c.bf16 %v1509_v9, %v1507_v25 }
 0x4ad   : > { %2047 = vmatpush1.bf16.msra.mxu0 %v1629_v23  ;;  %2015 = vmatprep.mubr.bf16.mxu0 %v7369_v1  ;;  %v1518_v23 = vld [vmem:[%s9139_s10 + $0x6d8] sm:$0xff]  ;;  %v1525_v1 = vld [vmem:[%s9139_s10 + $0x710] sm:$0xff] }
 0x4ae   : > { %2048 = vmatprep.subr.bf16.mxu0 %v1632_v38  ;;  %v1639_v38 = vpack.c.bf16 %v1513_v30, %v1511_v11  ;;  %v1642_v58 = vpack.c.bf16 %v1518_v23, %v1516_v21  ;;  %v1278_v30 = vld [vmem:[%s10464_s23 + $0x58] sm:$0xff] }
 0x4af   : > { %v7371_v23 = vcombine.high %v1278_v30, %v1282_v31 }
 0x4b1   : > { %2049 = vmatpush1.bf16.msra.mxu0 %v1631_v33  ;;  %v1515_v33 = vld [vmem:[%s9139_s10 + $0x6c0] sm:$0xff] }
 0x4b2   : > { %2050 = vmatprep.subr.bf16.mxu0 %v1634_v50  ;;  %v1641_v50 = vpack.c.bf16 %v1517_v34, %v1515_v33  ;;  %v1298_v33 = vld [vmem:[%s10464_s23 + $0xf8] sm:$0xff] }
 0x4b4   : > { %2016 = vmatmul.mubr.bf16.gmra.mrb[4].mxu0 %v7368_v6  ;;  %v1528_v6 = vld [vmem:[%s9139_s10 + $0x728] sm:$0xff] }
 0x4b5   : > { %2051 = vmatpush1.bf16.msra.mxu0 %v1633_v16  ;;  %2025 = vmatprep.mubr.bf16.mxu0 %v7377_v29  ;;  %v1270_v16 = vld [vmem:[%s10464_s23 + $0x18] sm:$0xff]  ;;  %v1647_v29 = vpack.c.bf16 %v1529_v54, %v1527_v59 }
 0x4b6   : > { %2052 = vmatprep.subr.bf16.mxu0 %v1636_v19  ;;  %v1274_v19 = vld [vmem:[%s10464_s23 + $0x38] sm:$0xff] }
 0x4b7   : > { %v7363_v35 = vcombine.high %v1270_v16, %v1274_v19  ;;  %v7362_v21 = vcombine.low %v1270_v16, %v1274_v19 }
 0x4b9   : > { %2053 = vmatpush1.bf16.msra.mxu0 %v1635_v63  ;;  %v1523_v63 = vld [vmem:[%s9139_s10 + $0x700] sm:$0xff] }
 0x4ba   : > { %2054 = vmatprep.subr.bf16.mxu0 %v1638_v7  ;;  %v1530_v7 = vld [vmem:[%s9139_s10 + $0x738] sm:$0xff]  ;;  %v1645_v25 = vpack.c.bf16 %v1525_v1, %v1523_v63  ;;  %s7446_s10 = sld [smem:[#allocation2 + $0x1]] }
 0x4bb   : > { %v1648_v9 = vpack.c.bf16 %v1530_v7, %v1528_v6 }
 0x4bc   : > { %2026 = vmatmul.mubr.bf16.gmra.mrb[8].mxu0 %v7376_v32  ;;  %v1290_v32 = vld [vmem:[%s10464_s23 + $0xb8] sm:$0xff] }
 0x4bd   : > { %2055 = vmatpush1.bf16.msra.mxu0 %v1637_v41  ;;  %2035 = vmatprep.mubr.bf16.mxu0 %v7385_v43  ;;  %v1650_v41 = vpack.c.bf16 %v1532_v40, %v1532_v40  ;;  %v7379_v43 = vcombine.high %v1286_v28, %v1290_v32  ;;  %v7378_v34 = vcombine.low %v1286_v28, %v1290_v32 }
 0x4be   : > { %2056 = vmatprep.subr.bf16.mxu0 %v1640_v26  ;;  %v1649_v26 = vpack.c.bf16 %v1531_v42, %v1531_v42 }
 0x4c0   : > { %v1822_v11 = vsel %vm1820_vm0, %v1649_v26, 0 }
 0x4c1   : > { %2057 = vmatpush1.bf16.msra.mxu0 %v1639_v38  ;;  %v7370_v38 = vcombine.low %v1278_v30, %v1282_v31 }
 0x4c2   : > { %2058 = vmatprep.subr.bf16.mxu0 %v1642_v58  ;;  %v1294_v58 = vld [vmem:[%s10464_s23 + $0xd8] sm:$0xff] }
 0x4c3   : > { %v7387_v18 = vcombine.high %v1294_v58, %v1298_v33  ;;  %v7386_v47 = vcombine.low %v1294_v58, %v1298_v33 }
 0x4c4   : > { %2036 = vmatmul.mubr.bf16.gmra.mrb[12].mxu0 %v7384_v61 }
 0x4c5   : > { %2059 = vmatpush1.bf16.msra.mxu0 %v1641_v50  ;;  %7389 = vmatprep.mubr.msk.bf16.mxu0 %vm1807_vm8, %v7363_v35  ;;  %v3093_v50 = vstv %s7446_s10  ;;  %s10466_s10 = sld [smem:[#allocation24_spill]] }
 0x4c6   : > { %2060 = vmatprep.subr.bf16.mxu0 %v1644_v36  ;;  %v3096_v53 = vmul.f32 %v3093_v50, %v9031_v0  ;;  %v3094_v56 = vmul.f32 %v3093_v50, %v9033_v2  ;;  %v3097_v35 = vmul.f32 %v3093_v50, %v9036_v5  ;;  %v3095_v6 = vmul.f32 %v3093_v50, %v9039_v8 }
 0x4c7   : > { %v3100_v42 = vmul.f32 %v3093_v50, %v9043_v12  ;;  %v3098_v26 = vmul.f32 %v3093_v50, %v9045_v14 }
 0x4c9   : > { %2061 = vmatpush1.bf16.msra.mxu0 %v1643_v55 }
 0x4ca   : > { %2062 = vmatprep.subr.bf16.mxu0 %v1646_v62 }
 0x4cd   : > { %2063 = vmatpush1.bf16.msra.mxu0 %v1645_v25 }
 0x4ce   : > { %2064 = vmatprep.subr.bf16.mxu0 %v1648_v9 }
 0x4d1   : > { %2065 = vmatpush1.bf16.msra.mxu0 %v1647_v29 }
 0x4d2   : > { %7388 = vmatprep.subr.msk.bf16.mxu0 %vm1820_vm0, %v1650_v41 }
 0x4d5   : > { %2067 = vmatpush1.bf16.msra.mxu0 %v1822_v11 }
 0x4d8   : > { %2079 = vmatmul.mubr.bf16.vlgmr.msra.gmra.mrb[0].mxu0 %v7362_v21  ;;  %v3101_v21 = vmul.f32 %v3093_v50, %v9048_v17 }
 0x4d9   : > { %7390 = vmatprep.mubr.msk.bf16.mxu0 %vm1807_vm8, %v7371_v23 }
 0x4e0   : > { %2089 = vmatmul.mubr.bf16.gmra.mrb[4].mxu0 %v7370_v38  ;;  %v3099_v38 = vmul.f32 %v3093_v50, %v9051_v20  ;;  %v8413_v50 = vld [vmem:[%s10466_s10] ss:$8 sps:$4 sm:$0xff]  }
 0x4e1   : > { %7391 = vmatprep.mubr.msk.bf16.mxu0 %vm1807_vm8, %v7379_v43 }
 0x4e8   : > { %2099 = vmatmul.mubr.bf16.gmra.mrb[8].mxu0 %v7378_v34 }
 0x4e9   : > { %7392 = vmatprep.mubr.msk.bf16.mxu0 %vm1807_vm8, %v7387_v18 }
 0x4f0   : > { %2109 = vmatmul.mubr.bf16.gmra.mrb[12].mxu0 %v7386_v47  ;;  %v8415_v47 = vld [vmem:[%s10466_s10 + $0x4] ss:$8 sps:$4 sm:$0xff]  }
 0x4f1   : > { %3877 = vmatprep.mubr.bf16.mxu0 %v10418_v48 }
 0x537   : > { %v8050_v36 = vpop.f32.mrb[64].mxu1 }
 0x538   : > { %v3196_v16 = vmul.f32 %v8050_v36, %v3193_v51  ;;  %v3162_v19 = vpop.f32.mrb[65].mxu1  ;;  %v8410_v36 = vld [vmem:[%s10465_s22 + $0x8] sm:$0xff]  }
 0x539   : > { %v3194_v57 = vmul.f32 %v3193_v51, %v3162_v19  ;;  %v8051_v61 = vpop.f32.mrb[66].mxu1  ;;  %v8412_v19 = vld [vmem:[%s10465_s22 + $0x18] sm:$0xff]  }
 0x53a   : > { %v3204_v55 = vadd.f32 %v3196_v16, %v3096_v53  ;;  %v3197_v62 = vmul.f32 %v8051_v61, %v3193_v51  ;;  %v3165_v63 = vpop.f32.mrb[67].mxu1  ;;  %v8411_v53 = vld [vmem:[%s10465_s22 + $0x10] sm:$0xff]  }
 0x53b   : > { %v3202_v1 = vadd.f32 %v3194_v57, %v3094_v56  ;;  %v3195_v7 = vmul.f32 %v3193_v51, %v3165_v63  ;;  %v8416_v16 = vld [vmem:[%s10466_s10 + $0x10] ss:$8 sps:$4 sm:$0xff]   ;;  %v8421_v56 = vld [vmem:[%s10466_s10 + $0x24] ss:$8 sps:$4 sm:$0xff]   ;;  %v8419_v57 = vld [vmem:[%s10466_s10 + $0x20] ss:$8 sps:$4 sm:$0xff]  }
 0x53c   : > { %v3205_v25 = vadd.f32 %v3197_v62, %v3097_v35  ;;  %v8424_v61 = vld [vmem:[%s10466_s10 + $0x34] ss:$8 sps:$4 sm:$0xff]  }
 0x53d   : > { %v3203_v9 = vadd.f32 %v3195_v7, %v3095_v6 }
 0x53e   : > { %v3219_v59 = vpack.c.bf16 %v3205_v25, %v3204_v55  ;;  %v8422_v55 = vld [vmem:[%s10466_s10 + $0x30] ss:$8 sps:$4 sm:$0xff]  }
 0x53f   : > { %v8054_v54 = vpop.f32.mrb[68].mxu1  ;;  %v3218_v40 = vpack.c.bf16 %v3203_v9, %v3202_v1 }
 0x540   : > { %v3200_v29 = vmul.f32 %v8054_v54, %v3193_v51  ;;  %v3178_v41 = vpop.f32.mrb[69].mxu1 }
 0x541   : > { %v3198_v11 = vmul.f32 %v3193_v51, %v3178_v41  ;;  %v8055_v30 = vpop.f32.mrb[70].mxu1  ;;  %8056 = vmatprep.subr.bf16.mxu1 %v3218_v40 }
 0x542   : > { %v3208_v31 = vadd.f32 %v3200_v29, %v3100_v42  ;;  %v3201_v23 = vmul.f32 %v8055_v30, %v3193_v51  ;;  %v3181_v28 = vpop.f32.mrb[71].mxu1  ;;  %8057 = vmatpush3.bf16.msra.mxu1 %v3218_v40  ;;  %v3233_v30 = vpop.permute.xlu0 %3232 }
 0x543   : > { %v3206_v32 = vadd.f32 %v3198_v11, %v3098_v26  ;;  %v3199_v43 = vmul.f32 %v3193_v51, %v3181_v28  ;;  %8058 = vmatprep.subr.bf16.mxu1 %v3219_v59  ;;  %v8418_v51 = vld [vmem:[%s10466_s10 + $0x14] ss:$8 sps:$4 sm:$0xff]  }
 0x544   : > { %v3209_v58 = vadd.f32 %v3201_v23, %v3101_v21 }
 0x545   : > { %v3207_v33 = vadd.f32 %v3199_v43, %v3099_v38  ;;  %v5385_v43 = vstv %s7609_s0  ;;  %s7462_s0 = sld [smem:[#allocation2 + $0x82]] }
 0x546   : > { %8059 = vmatpush3.bf16.msra.mxu1 %v3219_v59  ;;  %v3221_v34 = vpack.c.bf16 %v3209_v58, %v3208_v31  ;;  %v3238_v31 = vpop.permute.xlu1 %3237  ;;  %v3243_v21 = vpop.permute.xlu0 %3242 }
 0x547   : > { %v3220_v18 = vpack.c.bf16 %v3207_v33, %v3206_v32  ;;  %v5395_v33 = vstv %s7610_s2  ;;  %s7461_s2 = sld [smem:[#allocation2 + $0x2]] }
 0x549   : > { %8060 = vmatprep.subr.bf16.mxu1 %v3220_v18 }
 0x54a   : > { %8061 = vmatpush3.bf16.msra.mxu1 %v3220_v18  ;;  %v3248_v23 = vpop.permute.xlu1 %3247  ;;  %v3253_v58 = vpop.permute.xlu0 %3252 }
 0x54b   : > { %8062 = vmatprep.subr.bf16.mxu1 %v3221_v34 }
 0x54e   : > { %8063 = vmatpush3.bf16.msra.mxu1 %v3221_v34 }
 0x54f   : > { %3458 = vmatprep.subr.bf16.mxu1 %v8415_v47 }
 0x551   : > { %8065 = vmatmul.mubr.msk.bf16.vlgmr.msra.gmra.mrb[72].mxu1 %vm2727_vm5, %v8410_v36 }
 0x552   : > { %8068 = vmatprep.mubr.msk.bf16.mxu1 %vm2727_vm5, %v8411_v53  ;;  %3459 = vmatpush1.bf16.msra.mxu1 %v8413_v50  ;;  %v3258_v50 = vpop.permute.xlu1 %3257 }
 0x553   : > { %3460 = vmatprep.subr.bf16.mxu1 %v8418_v51 }
 0x556   : > { %3461 = vmatpush1.bf16.msra.mxu1 %v8416_v16  ;;  %v3268_v10 = vpop.permute.xlu1 %3267 }
 0x557   : > { %3462 = vmatprep.subr.bf16.mxu1 %v8421_v56 }
 0x559   : > { %8069 = vmatmul.mubr.msk.bf16.gmra.mrb[76].mxu1 %vm2727_vm5, %v8412_v19  ;;  %v5388_v19 = vmul.f32 %v5385_v43, %v9031_v0 }
 0x55a   : > { %3490 = vmatprep.mubr.bf16.mxu1 %v10418_v48  ;;  %3463 = vmatpush1.bf16.msra.mxu1 %v8419_v57 }
 0x55b   : > { %3464 = vmatprep.subr.bf16.mxu1 %v8424_v61  ;;  %v5386_v61 = vmul.f32 %v5385_v43, %v9033_v2 }
 0x55e   : > { %3465 = vmatpush1.bf16.msra.mxu1 %v8422_v55 }
 0x5ab   : > { %v9506_v35 = vpop.f32.mrb[0].mxu0 }
 0x5ac   : > { %v9508_v62 = vpop.f32.mrb[1].mxu0 }
 0x5ad   : > { %v9510_v63 = vpop.f32.mrb[2].mxu0 }
 0x5ae   : > { %v9512_v1 = vpop.f32.mrb[3].mxu0 }
 0x5b3   : > { %v9514_v6 = vpop.f32.mrb[4].mxu0 }
 0x5b4   : > { %v9516_v7 = vpop.f32.mrb[5].mxu0 }
 0x5b5   : > { %v9518_v25 = vpop.f32.mrb[6].mxu0 }
 0x5b6   : > { %v9520_v9 = vpop.f32.mrb[7].mxu0 }
 0x5bb   : > { %v9522_v59 = vpop.f32.mrb[8].mxu0 }
 0x5bc   : > { %v9524_v54 = vpop.f32.mrb[9].mxu0 }
 0x5bd   : > { %v9526_v40 = vpop.f32.mrb[10].mxu0 }
 0x5be   : > { %v9528_v42 = vpop.f32.mrb[11].mxu0 }
 0x5c3   : > { %v9530_v29 = vpop.f32.mrb[12].mxu0 }
 0x5c4   : > { %v9532_v41 = vpop.f32.mrb[13].mxu0 }
 0x5c5   : > { %v9534_v26 = vpop.f32.mrb[14].mxu0 }
 0x5c6   : > { %v9536_v11 = vpop.f32.mrb[15].mxu0 }
 0x624   : > { %v8066_v28 = vpop.f32.mrb[72].mxu1 }
 0x625   : > { %v3345_v32 = vadd.f32 %v8066_v28, %v3243_v21  ;;  %v3336_v38 = vpop.f32.mrb[73].mxu1  ;;  %v5389_v28 = vmul.f32 %v5385_v43, %v9036_v5 }
 0x626   : > { %v3337_v34 = vadd.f32 %v3336_v38, %v3233_v30  ;;  %v8067_v18 = vpop.f32.mrb[74].mxu1 }
 0x627   : > { %v3369_v47 = vmax.f32 %v3345_v32, 0.0  ;;  %v3348_v36 = vadd.f32 %v8067_v18, %v3248_v23  ;;  %v3339_v53 = vpop.f32.mrb[75].mxu1  ;;  %v5387_v23 = vmul.f32 %v5385_v43, %v9039_v8  ;;  %v3263_v32 = vpop.permute.xlu0 %3262 }
 0x628   : > { %v3367_v51 = vmax.f32 %v3337_v34, 0.0  ;;  %v3340_v16 = vadd.f32 %v3339_v53, %v3238_v31 }
 0x629   : > { %v5398_v56 = vmul.f32 %v5395_v33, %v3369_v47  ;;  %v3370_v57 = vmax.f32 %v3348_v36, 0.0 }
 0x62a   : > { %v5396_v55 = vmul.f32 %v5395_v33, %v3367_v51  ;;  %v3368_v21 = vmax.f32 %v3340_v16, 0.0 }
 0x62b   : > { %v9541_v48 = vadd.f32 %v5398_v56, %v5388_v19  ;;  %v3403_v30 = vpack.c.bf16 %v3370_v57, %v3369_v47  ;;  %v5399_v38 = vmul.f32 %v5395_v33, %v3370_v57  ;;  %v10467_v57 = vmov 0  }
 0x62c   : > { %v9544_v18 = vadd.f32 %v5396_v55, %v5386_v61  ;;  %v3402_v31 = vpack.c.bf16 %v3368_v21, %v3367_v51  ;;  %v5397_v34 = vmul.f32 %v5395_v33, %v3368_v21  ;;  %v8070_v0 = vpop.f32.mrb[76].mxu1  ;;  %v5392_v55 = vmul.f32 %v5385_v43, %v9043_v12 }
 0x62d   : > { %v9546_v53 = vadd.f32 %v5399_v38, %v5389_v28  ;;  %v3361_v36 = vadd.f32 %v8070_v0, %v3263_v32  ;;  %v3352_v2 = vpop.f32.mrb[77].mxu1  ;;  %v5390_v38 = vmul.f32 %v5385_v43, %v9045_v14  ;;  %v9570_v14 = vstv %s7461_s2  ;;  %s10468_s2 = sld [smem:[#allocation9_spill]] }
 0x62e   : > { %v9548_v16 = vadd.f32 %v5397_v34, %v5387_v23  ;;  %v3353_v5 = vadd.f32 %v3352_v2, %v3253_v58  ;;  %v8071_v19 = vpop.f32.mrb[78].mxu1  ;;  %7471 = vmatmul.mubr.msk.bf16.vlgmr.msra.gmra.mrb[80].mxu1 %vm2727_vm5, %v3402_v31  ;;  %v5393_v58 = vmul.f32 %v5385_v43, %v9048_v17  ;;  %v9572_v17 = vstv %s7462_s0  ;;  %s10469_s0 = sld [smem:[#allocation12_spill]] }
 0x62f   : > { %v3373_v47 = vmax.f32 %v3361_v36, 0.0  ;;  %v3364_v56 = vadd.f32 %v8071_v19, %v3268_v10  ;;  %v3355_v8 = vpop.f32.mrb[79].mxu1  ;;  %3500 = vmatprep.mubr.bf16.mxu1 %v10467_v57  ;;  %v5391_v10 = vmul.f32 %v5385_v43, %v9051_v20  ;;  %v3377_v43 = vmul.f32 %v9570_v14, %v9506_v35 }
 0x630   : > { %v3371_v61 = vmax.f32 %v3353_v5, 0.0  ;;  %v3356_v51 = vadd.f32 %v3355_v8, %v3258_v50  ;;  %v3378_v19 = vmul.f32 %v9570_v14, %v9508_v62  ;;  %v3379_v8 = vmul.f32 %v9570_v14, %v9510_v63 }
 0x631   : > { %v5402_v21 = vmul.f32 %v5395_v33, %v3373_v47  ;;  %v3374_v28 = vmax.f32 %v3364_v56, 0.0 }
 0x632   : > { %v5400_v32 = vmul.f32 %v5395_v33, %v3371_v61  ;;  %v3372_v23 = vmax.f32 %v3356_v51, 0.0 }
 0x633   : > { %v9555_v34 = vadd.f32 %v5402_v21, %v5392_v55  ;;  %v3405_v31 = vpack.c.bf16 %v3374_v28, %v3373_v47  ;;  %v5403_v0 = vmul.f32 %v5395_v33, %v3374_v28  ;;  %v3380_v21 = vmul.f32 %v9570_v14, %v9512_v1 }
 0x634   : > { %v9558_v36 = vadd.f32 %v5400_v32, %v5390_v38  ;;  %v3404_v2 = vpack.c.bf16 %v3372_v23, %v3371_v61  ;;  %v5401_v50 = vmul.f32 %v5395_v33, %v3372_v23 }
 0x635   : > { %v9560_v5 = vadd.f32 %v5403_v0, %v5393_v58 }
 0x636   : > { %v9562_v12 = vadd.f32 %v5401_v50, %v5391_v10  ;;  %7472 = vmatmul.mubr.msk.bf16.gmra.mrb[84].mxu1 %vm2727_vm5, %v3403_v30  ;;  %v3382_v10 = vmul.f32 %v9570_v14, %v9516_v7  ;;  %v3383_v50 = vmul.f32 %v9570_v14, %v9518_v25 }
 0x637   : > { %3510 = vmatprep.mubr.bf16.mxu1 %v10467_v57 }
 0x63e   : > { %7473 = vmatmul.mubr.msk.bf16.gmra.mrb[88].mxu1 %vm2727_vm5, %v3404_v2 }
 0x63f   : > { %3520 = vmatprep.mubr.bf16.mxu1 %v10467_v57 }
 0x646   : > { %7474 = vmatmul.mubr.msk.bf16.gmra.mrb[92].mxu1 %vm2727_vm5, %v3405_v31  ;;  %v3381_v31 = vmul.f32 %v9570_v14, %v9514_v6  ;;  %v3384_v6 = vmul.f32 %v9570_v14, %v9520_v9 }
 0x647   : > { %3692 = vmatprep.mubr.bf16.mxu1 %v10467_v57 }
 0x701   : > { %v3492_v20 = vpop.f32.mrb[80].mxu1 }
 0x702   : > { %v3532_v33 = vmul.f32 %v9572_v17, %v3492_v20  ;;  %v3494_v30 = vpop.f32.mrb[81].mxu1 }
 0x703   : > { %v3533_v47 = vmul.f32 %v9572_v17, %v3494_v30  ;;  %v3496_v56 = vpop.f32.mrb[82].mxu1 }
 0x704   : > { %v3548_v61 = vadd.f32 %v3532_v33, %v3377_v43  ;;  %v3534_v51 = vmul.f32 %v9572_v17, %v3496_v56  ;;  %v3498_v55 = vpop.f32.mrb[83].mxu1 }
 0x705   : > { %v3549_v35 = vadd.f32 %v3533_v47, %v3378_v19  ;;  %v3535_v28 = vmul.f32 %v9572_v17, %v3498_v55 }
 0x706   : > { %v3550_v38 = vadd.f32 %v3534_v51, %v3379_v8  ;;  %v3385_v51 = vmul.f32 %v9570_v14, %v9522_v59  ;;  %v3388_v59 = vmul.f32 %v9570_v14, %v9528_v42 }
 0x707   : > { %v3551_v32 = vadd.f32 %v3535_v28, %v3380_v21  ;;  %v3386_v21 = vmul.f32 %v9570_v14, %v9524_v54  ;;  %v3387_v28 = vmul.f32 %v9570_v14, %v9526_v40 }
 0x708   : > { %v3572_v23 = vpack.c.bf16 %v3550_v38, %v3548_v61 }
 0x709   : > { %v3502_v62 = vpop.f32.mrb[84].mxu1  ;;  %v3573_v58 = vpack.c.bf16 %v3551_v32, %v3549_v35 }
 0x70a   : > { %v3536_v63 = vmul.f32 %v9572_v17, %v3502_v62  ;;  %v3504_v0 = vpop.f32.mrb[85].mxu1 }
 0x70b   : > { %v3537_v2 = vmul.f32 %v9572_v17, %v3504_v0  ;;  %v3506_v1 = vpop.f32.mrb[86].mxu1  ;;  %3660 = vmatprep.subr.bf16.mxu1 %v3573_v58 }
 0x70c   : > { %v3552_v20 = vadd.f32 %v3536_v63, %v3381_v31  ;;  %v3538_v43 = vmul.f32 %v9572_v17, %v3506_v1  ;;  %v3508_v33 = vpop.f32.mrb[87].mxu1  ;;  %3661 = vmatpush1.bf16.msra.mxu1 %v3572_v23 }
 0x70d   : > { %v3553_v30 = vadd.f32 %v3537_v2, %v3382_v10  ;;  %v3539_v19 = vmul.f32 %v9572_v17, %v3508_v33  ;;  %v3389_v2 = vmul.f32 %v9570_v14, %v9530_v29  ;;  %v3392_v29 = vmul.f32 %v9570_v14, %v9536_v11  ;;  %v8427_v11 = vld [vmem:[%s10468_s2 + $0x10] sm:$0xff]  }
 0x70e   : > { %v3554_v47 = vadd.f32 %v3538_v43, %v3383_v50  ;;  %v3390_v50 = vmul.f32 %v9570_v14, %v9532_v41  ;;  %v3391_v43 = vmul.f32 %v9570_v14, %v9534_v26  ;;  %v8425_v26 = vld [vmem:[%s10468_s2] sm:$0xff]   ;;  %v8428_v14 = vld [vmem:[%s10468_s2 + $0x18] sm:$0xff]  }
 0x70f   : > { %v3555_v7 = vadd.f32 %v3539_v19, %v3384_v6 }
 0x710   : > { %v3574_v56 = vpack.c.bf16 %v3554_v47, %v3552_v20 }
 0x711   : > { %v3512_v8 = vpop.f32.mrb[88].mxu1  ;;  %v3575_v61 = vpack.c.bf16 %v3555_v7, %v3553_v30 }
 0x712   : > { %v3540_v25 = vmul.f32 %v9572_v17, %v3512_v8  ;;  %v3514_v55 = vpop.f32.mrb[89].mxu1 }
 0x713   : > { %v3541_v35 = vmul.f32 %v9572_v17, %v3514_v55  ;;  %v3516_v9 = vpop.f32.mrb[90].mxu1  ;;  %3662 = vmatprep.subr.bf16.mxu1 %v3575_v61  ;;  %v8426_v61 = vld [vmem:[%s10468_s2 + $0x8] sm:$0xff]   ;;  %s10475_s2 = sld [smem:[#allocation26_spill]] }
 0x714   : > { %v3556_v38 = vadd.f32 %v3540_v25, %v3385_v51  ;;  %v3542_v32 = vmul.f32 %v9572_v17, %v3516_v9  ;;  %v3518_v23 = vpop.f32.mrb[91].mxu1  ;;  %3663 = vmatpush1.bf16.msra.mxu1 %v3574_v56 }
 0x715   : > { %v3557_v62 = vadd.f32 %v3541_v35, %v3386_v21  ;;  %v3543_v58 = vmul.f32 %v9572_v17, %v3518_v23  ;;  %v3596_v21 = vpop.permute.xlu1 %3595 }
 0x716   : > { %v3558_v31 = vadd.f32 %v3542_v32, %v3387_v28 }
 0x717   : > { %v3559_v54 = vadd.f32 %v3543_v58, %v3388_v59 }
 0x718   : > { %v3576_v63 = vpack.c.bf16 %v3558_v31, %v3556_v38 }
 0x719   : > { %v3522_v0 = vpop.f32.mrb[92].mxu1  ;;  %v3577_v10 = vpack.c.bf16 %v3559_v54, %v3557_v62 }
 0x71a   : > { %v3544_v40 = vmul.f32 %v9572_v17, %v3522_v0  ;;  %v3524_v1 = vpop.f32.mrb[93].mxu1 }
 0x71b   : > { %v3545_v20 = vmul.f32 %v9572_v17, %v3524_v1  ;;  %v3526_v42 = vpop.f32.mrb[94].mxu1  ;;  %3664 = vmatprep.subr.bf16.mxu1 %v3577_v10 }
 0x71c   : > { %v3560_v33 = vadd.f32 %v3544_v40, %v3389_v2  ;;  %v3546_v6 = vmul.f32 %v9572_v17, %v3526_v42  ;;  %v3528_v30 = vpop.f32.mrb[95].mxu1  ;;  %3665 = vmatpush1.bf16.msra.mxu1 %v3576_v63  ;;  %v3606_v40 = vpop.permute.xlu1 %3605 }
 0x71d   : > { %v3561_v19 = vadd.f32 %v3545_v20, %v3390_v50  ;;  %v3547_v41 = vmul.f32 %v9572_v17, %v3528_v30  ;;  %v3591_v17 = vpop.permute.xlu0 %3590 }
 0x71e   : > { %v3562_v47 = vadd.f32 %v3546_v6, %v3391_v43 }
 0x71f   : > { %v3563_v7 = vadd.f32 %v3547_v41, %v3392_v29 }
 0x720   : > { %v3578_v56 = vpack.c.bf16 %v3562_v47, %v3560_v33 }
 0x721   : > { %v3579_v8 = vpack.c.bf16 %v3563_v7, %v3561_v19  ;;  %v3601_v54 = vpop.permute.xlu0 %3600 }
 0x723   : > { %3666 = vmatprep.subr.bf16.mxu1 %v3579_v8 }
 0x724   : > { %3667 = vmatpush1.bf16.msra.mxu1 %v3578_v56 }
 0x725   : > { %v3611_v41 = vpop.permute.xlu0 %3610 }
 0x727   : > { %7479 = vmatmul.mubr.msk.bf16.vlgmr.msra.gmra.mrb[96].mxu1 %vm2727_vm5, %v8425_v26  ;;  %v3616_v26 = vpop.permute.xlu1 %3615 }
 0x728   : > { %3702 = vmatprep.mubr.bf16.mxu1 %v10467_v57 }
 0x72f   : > { %7480 = vmatmul.mubr.msk.bf16.gmra.mrb[100].mxu1 %vm2727_vm5, %v8426_v61 }
 0x730   : > { %3712 = vmatprep.mubr.bf16.mxu1 %v10467_v57 }
 0x737   : > { %7481 = vmatmul.mubr.msk.bf16.gmra.mrb[104].mxu1 %vm2727_vm5, %v8427_v11 }
 0x738   : > { %3722 = vmatprep.mubr.bf16.mxu1 %v10467_v57 }
 0x73f   : > { %7482 = vmatmul.mubr.msk.bf16.gmra.mrb[108].mxu1 %vm2727_vm5, %v8428_v14 }
 0x740   : > { %4661 = vmatprep.mubr.bf16.mxu1 %v10467_v57 }
 0x7fa   : > { %v3694_v51 = vpop.f32.mrb[96].mxu1 }
 0x7fb   : > { %v3695_v25 = vadd.f32 %v3694_v51, %v3591_v17  ;;  %v3696_v55 = vpop.f32.mrb[97].mxu1 }
 0x7fc   : > { %v3697_v35 = vadd.f32 %v3696_v55, %v3591_v17  ;;  %v3698_v9 = vpop.f32.mrb[98].mxu1 }
 0x7fd   : > { %v3699_v28 = vadd.f32 %v3698_v9, %v3596_v21  ;;  %v3700_v38 = vpop.f32.mrb[99].mxu1  ;;  %v3733_v23 = vmax.f32 %v3695_v25, 0.0 }
 0x7fe   : > { %v3701_v32 = vadd.f32 %v3700_v38, %v3596_v21  ;;  %v3734_v62 = vmax.f32 %v3697_v35, 0.0 }
 0x7ff   : > { %v3735_v59 = vmax.f32 %v3699_v28, 0.0  ;;  %v3621_v28 = vpop.permute.xlu0 %3620 }
 0x800   : > { %v3736_v58 = vmax.f32 %v3701_v32, 0.0 }
 0x801   : > { %v3757_v31 = vpack.c.bf16 %v3735_v59, %v3733_v23 }
 0x802   : > { %v3758_v63 = vpack.c.bf16 %v3736_v58, %v3734_v62  ;;  %v3704_v0 = vpop.f32.mrb[100].mxu1  ;;  %v3626_v62 = vpop.permute.xlu1 %3625 }
 0x803   : > { %v3705_v10 = vadd.f32 %v3704_v0, %v3601_v54  ;;  %v3706_v2 = vpop.f32.mrb[101].mxu1 }
 0x804   : > { %v3707_v1 = vadd.f32 %v3706_v2, %v3601_v54  ;;  %v3708_v50 = vpop.f32.mrb[102].mxu1  ;;  %3845 = vmatprep.subr.bf16.mxu0 %v3758_v63 }
 0x805   : > { %v3709_v20 = vadd.f32 %v3708_v50, %v3606_v40  ;;  %v3710_v42 = vpop.f32.mrb[103].mxu1  ;;  %3846 = vmatpush1.bf16.msra.mxu0 %v3757_v31  ;;  %v3737_v33 = vmax.f32 %v3705_v10, 0.0 }
 0x806   : > { %v3711_v43 = vadd.f32 %v3710_v42, %v3606_v40  ;;  %v3738_v30 = vmax.f32 %v3707_v1, 0.0  ;;  %v8429_v42 = vld [vmem:[%s10469_s0] sm:$0xff]  }
 0x807   : > { %v3739_v6 = vmax.f32 %v3709_v20, 0.0 }
 0x808   : > { %v3740_v29 = vmax.f32 %v3711_v43, 0.0  ;;  %v8430_v43 = vld [vmem:[%s10469_s0 + $0x8] sm:$0xff]  }
 0x809   : > { %v3759_v19 = vpack.c.bf16 %v3739_v6, %v3737_v33  ;;  %v8431_v33 = vld [vmem:[%s10469_s0 + $0x10] sm:$0xff]   ;;  %v8432_v6 = vld [vmem:[%s10469_s0 + $0x18] sm:$0xff]   ;;  %s10473_s0 = smul.u32 1872, %s10486_s16 }
 0x80a   : > { %v3760_v47 = vpack.c.bf16 %v3740_v29, %v3738_v30  ;;  %v3714_v7 = vpop.f32.mrb[104].mxu1  ;;  %v3776_v30 = vpop.permute.xlu0 %3775 }
 0x80b   : > { %v3715_v56 = vadd.f32 %v3714_v7, %v3611_v41  ;;  %v3716_v8 = vpop.f32.mrb[105].mxu1 }
 0x80c   : > { %v3717_v61 = vadd.f32 %v3716_v8, %v3611_v41  ;;  %v3718_v11 = vpop.f32.mrb[106].mxu1  ;;  %3847 = vmatprep.subr.bf16.mxu0 %v3760_v47  ;;  %v3781_v47 = vpop.permute.xlu1 %3780 }
 0x80d   : > { %v3719_v14 = vadd.f32 %v3718_v11, %v3616_v26  ;;  %v3720_v17 = vpop.f32.mrb[107].mxu1  ;;  %3848 = vmatpush1.bf16.msra.mxu0 %v3759_v19  ;;  %v3741_v25 = vmax.f32 %v3715_v56, 0.0 }
 0x80e   : > { %v3721_v51 = vadd.f32 %v3720_v17, %v3616_v26  ;;  %v3742_v21 = vmax.f32 %v3717_v61, 0.0 }
 0x80f   : > { %v3743_v55 = vmax.f32 %v3719_v14, 0.0 }
 0x810   : > { %v3744_v35 = vmax.f32 %v3721_v51, 0.0 }
 0x811   : > { %v3761_v9 = vpack.c.bf16 %v3743_v55, %v3741_v25  ;;  %v3786_v55 = vpop.permute.xlu0 %3785 }
 0x812   : > { %v3762_v38 = vpack.c.bf16 %v3744_v35, %v3742_v21  ;;  %v3724_v32 = vpop.f32.mrb[108].mxu1 }
 0x813   : > { %v3725_v23 = vadd.f32 %v3724_v32, %v3621_v28  ;;  %v3726_v59 = vpop.f32.mrb[109].mxu1 }
 0x814   : > { %v3727_v58 = vadd.f32 %v3726_v59, %v3621_v28  ;;  %v3728_v31 = vpop.f32.mrb[110].mxu1  ;;  %3849 = vmatprep.subr.bf16.mxu0 %v3762_v38  ;;  %v3791_v38 = vpop.permute.xlu1 %3790 }
 0x815   : > { %v3729_v54 = vadd.f32 %v3728_v31, %v3626_v62  ;;  %v3730_v63 = vpop.f32.mrb[111].mxu1  ;;  %3850 = vmatpush1.bf16.msra.mxu0 %v3761_v9  ;;  %v3745_v10 = vmax.f32 %v3725_v23, 0.0 }
 0x816   : > { %v3731_v0 = vadd.f32 %v3730_v63, %v3626_v62  ;;  %v3746_v40 = vmax.f32 %v3727_v58, 0.0 }
 0x817   : > { %v3747_v2 = vmax.f32 %v3729_v54, 0.0 }
 0x818   : > { %v3748_v1 = vmax.f32 %v3731_v0, 0.0 }
 0x819   : > { %v3763_v50 = vpack.c.bf16 %v3747_v2, %v3745_v10  ;;  %v3796_v2 = vpop.permute.xlu0 %3795 }
 0x81a   : > { %v3764_v20 = vpack.c.bf16 %v3748_v1, %v3746_v40 }
 0x81c   : > { %3851 = vmatprep.subr.bf16.mxu0 %v3764_v20 }
 0x81d   : > { %3852 = vmatpush1.bf16.msra.mxu0 %v3763_v50 }
 0x820   : > { %7487 = vmatmul.mubr.msk.bf16.vlgmr.msra.gmra.mrb[16].mxu0 %vm2727_vm5, %v8429_v42  ;;  %v3801_v42 = vpop.permute.xlu1 %3800 }
 0x821   : > { %3887 = vmatprep.mubr.bf16.mxu0 %v10467_v57 }
 0x828   : > { %7488 = vmatmul.mubr.msk.bf16.gmra.mrb[20].mxu0 %vm2727_vm5, %v8430_v43 }
 0x829   : > { %3897 = vmatprep.mubr.bf16.mxu0 %v10467_v57 }
 0x830   : > { %7489 = vmatmul.mubr.msk.bf16.gmra.mrb[24].mxu0 %vm2727_vm5, %v8431_v33 }
 0x831   : > { %3907 = vmatprep.mubr.bf16.mxu0 %v10467_v57 }
 0x838   : > { %7490 = vmatmul.mubr.msk.bf16.gmra.mrb[28].mxu0 %vm2727_vm5, %v8432_v6 }
 0x839   : > { %4561 = vmatprep.mubr.bf16.mxu0 %v10467_v57 }
 0x8f3   : > { %v3879_v29 = vpop.f32.mrb[16].mxu0 }
 0x8f4   : > { %v3880_v19 = vadd.f32 %v3879_v29, %v3776_v30  ;;  %v3881_v41 = vpop.f32.mrb[17].mxu0 }
 0x8f5   : > { %v3882_v7 = vadd.f32 %v3881_v41, %v3776_v30  ;;  %v3883_v56 = vpop.f32.mrb[18].mxu0 }
 0x8f6   : > { %v3884_v8 = vadd.f32 %v3883_v56, %v3781_v47  ;;  %v3885_v26 = vpop.f32.mrb[19].mxu0  ;;  %v3918_v11 = vmax.f32 %v3880_v19, 0.0 }
 0x8f7   : > { %v3886_v61 = vadd.f32 %v3885_v26, %v3781_v47  ;;  %v3919_v17 = vmax.f32 %v3882_v7, 0.0 }
 0x8f8   : > { %v3920_v14 = vmax.f32 %v3884_v8, 0.0  ;;  %v3806_v8 = vpop.permute.xlu0 %3805 }
 0x8f9   : > { %v3921_v51 = vmax.f32 %v3886_v61, 0.0 }
 0x8fa   : > { %v9646_v25 = vpack.c.bf16 %v3920_v14, %v3918_v11 }
 0x8fb   : > { %v9648_v21 = vpack.c.bf16 %v3921_v51, %v3919_v17  ;;  %v3889_v35 = vpop.f32.mrb[20].mxu0  ;;  %v3811_v17 = vpop.permute.xlu1 %3810 }
 0x8fc   : > { %v3890_v9 = vadd.f32 %v3889_v35, %v3786_v55  ;;  %v3891_v28 = vpop.f32.mrb[21].mxu0 }
 0x8fd   : > { %v3892_v32 = vadd.f32 %v3891_v28, %v3786_v55  ;;  %v3893_v23 = vpop.f32.mrb[22].mxu0  ;;  %4529 = vmatprep.subr.bf16.mxu0 %v9648_v21  ;;  %8250 = vmatprep.subr.bf16.mxu1 %v9648_v21 }
 0x8fe   : > { %v3894_v59 = vadd.f32 %v3893_v23, %v3791_v38  ;;  %v3895_v62 = vpop.f32.mrb[23].mxu0  ;;  %4530 = vmatpush1.bf16.msra.mxu0 %v9646_v25  ;;  %8254 = vmatpush1.bf16.msra.mxu1 %v9646_v25  ;;  %v3922_v31 = vmax.f32 %v3890_v9, 0.0 }
 0x8ff   : > { %v3896_v58 = vadd.f32 %v3895_v62, %v3791_v38  ;;  %v3923_v63 = vmax.f32 %v3892_v32, 0.0 }
 0x900   : > { %v3924_v54 = vmax.f32 %v3894_v59, 0.0 }
 0x901   : > { %v3925_v0 = vmax.f32 %v3896_v58, 0.0 }
 0x902   : > { %v9654_v10 = vpack.c.bf16 %v3924_v54, %v3922_v31  ;;  %v8434_v31 = vld [vmem:[%s10470_s1 + $0x40] sm:$0xff]  }
 0x903   : > { %v9656_v40 = vpack.c.bf16 %v3925_v0, %v3923_v63  ;;  %v3899_v1 = vpop.f32.mrb[24].mxu0  ;;  %v8433_v54 = vld [vmem:[%s10471_s26] sm:$0xff]   ;;  %v8437_v0 = vld [vmem:[%s10470_s1 + $0x48] sm:$0xff]  }
 0x904   : > { %v3900_v50 = vadd.f32 %v3899_v1, %v3796_v2  ;;  %v3901_v20 = vpop.f32.mrb[25].mxu0  ;;  %v8435_v63 = vld [vmem:[%s10470_s1] sm:$0xff]   ;;  %v8441_v1 = vld [vmem:[%s10470_s1 + $0x50] sm:$0xff]  }
 0x905   : > { %v3902_v43 = vadd.f32 %v3901_v20, %v3796_v2  ;;  %v3903_v33 = vpop.f32.mrb[26].mxu0  ;;  %4531 = vmatprep.subr.bf16.mxu0 %v9656_v40  ;;  %8251 = vmatprep.subr.bf16.mxu1 %v9656_v40  ;;  %v8438_v2 = vld [vmem:[%s10470_s1 + $0x8] sm:$0xff]   ;;  %v8442_v20 = vld [vmem:[%s10470_s1 + $0x10] sm:$0xff]  }
 0x906   : > { %v3904_v6 = vadd.f32 %v3903_v33, %v3801_v42  ;;  %v3905_v30 = vpop.f32.mrb[27].mxu0  ;;  %4532 = vmatpush1.bf16.msra.mxu0 %v9654_v10  ;;  %8255 = vmatpush1.bf16.msra.mxu1 %v9654_v10  ;;  %v3926_v19 = vmax.f32 %v3900_v50, 0.0  ;;  %v8436_v50 = vld [vmem:[%s10471_s26 + $0x8] sm:$0xff]   ;;  %v8447_v33 = vld [vmem:[%s10470_s1 + $0x60] sm:$0xff]  }
 0x907   : > { %v3906_v29 = vadd.f32 %v3905_v30, %v3801_v42  ;;  %v3927_v47 = vmax.f32 %v3902_v43, 0.0  ;;  %v8444_v42 = vld [vmem:[%s10470_s1 + $0x58] sm:$0xff]   ;;  %v8448_v30 = vld [vmem:[%s10470_s1 + $0x20] sm:$0xff]  }
 0x908   : > { %v3928_v41 = vmax.f32 %v3904_v6, 0.0  ;;  %v8445_v43 = vld [vmem:[%s10470_s1 + $0x18] sm:$0xff]   ;;  %v8439_v6 = vld [vmem:[%s10471_s26 + $0x10] sm:$0xff]  }
 0x909   : > { %v3929_v7 = vmax.f32 %v3906_v29, 0.0  ;;  %v8450_v29 = vld [vmem:[%s10470_s1 + $0x68] sm:$0xff]  }
 0x90a   : > { %v9662_v56 = vpack.c.bf16 %v3928_v41, %v3926_v19  ;;  %v8451_v19 = vld [vmem:[%s10470_s1 + $0x28] sm:$0xff]   ;;  %v8454_v41 = vld [vmem:[%s10470_s1 + $0x70] sm:$0xff]  }
 0x90b   : > { %v9664_v26 = vpack.c.bf16 %v3929_v7, %v3927_v47  ;;  %v3909_v61 = vpop.f32.mrb[28].mxu0  ;;  %v8440_v47 = vld [vmem:[%s10471_s26 + $0x18] sm:$0xff]   ;;  %v8455_v7 = vld [vmem:[%s10470_s1 + $0x30] sm:$0xff]  }
 0x90c   : > { %v3910_v11 = vadd.f32 %v3909_v61, %v3806_v8  ;;  %v3911_v14 = vpop.f32.mrb[29].mxu0  ;;  %v8458_v61 = vld [vmem:[%s10470_s1 + $0x38] sm:$0xff]  }
 0x90d   : > { %v3912_v51 = vadd.f32 %v3911_v14, %v3806_v8  ;;  %v3913_v55 = vpop.f32.mrb[30].mxu0  ;;  %4533 = vmatprep.subr.bf16.mxu0 %v9664_v26  ;;  %8252 = vmatprep.subr.bf16.mxu1 %v9664_v26  ;;  %v8457_v8 = vld [vmem:[%s10470_s1 + $0x78] sm:$0xff]   ;;  %v8446_v14 = vld [vmem:[%s10471_s26 + $0x28] sm:$0xff]   ;;  %s9736_s1 = scalar_lea.vmem %s8807_s24, %s10473_s0  ;;  %s7611_s0 = sld [smem:[#allocation2 + $0x200]] }
 0x90e   : > { %v3914_v35 = vadd.f32 %v3913_v55, %v3811_v17  ;;  %v3915_v9 = vpop.f32.mrb[31].mxu0  ;;  %4534 = vmatpush1.bf16.msra.mxu0 %v9662_v56  ;;  %8256 = vmatpush1.bf16.msra.mxu1 %v9662_v56  ;;  %v3930_v38 = vmax.f32 %v3910_v11, 0.0  ;;  %v8443_v11 = vld [vmem:[%s10471_s26 + $0x20] sm:$0xff]  }
 0x90f   : > { %v3916_v28 = vadd.f32 %v3915_v9, %v3811_v17  ;;  %v3931_v23 = vmax.f32 %v3912_v51, 0.0  ;;  %v8449_v17 = vld [vmem:[%s10471_s26 + $0x30] sm:$0xff]   ;;  %v8452_v51 = vld [vmem:[%s10471_s26 + $0x38] sm:$0xff]   ;;  %v8453_v55 = vld [vmem:[%s10471_s26 + $0x40] sm:$0xff]  }
 0x910   : > { %v3932_v32 = vmax.f32 %v3914_v35, 0.0  ;;  %v8456_v35 = vld [vmem:[%s10471_s26 + $0x48] sm:$0xff]   ;;  %v8459_v9 = vld [vmem:[%s10472_s7] sm:$0xff]  }
 0x911   : > { %v3933_v59 = vmax.f32 %v3916_v28, 0.0 }
 0x912   : > { %v9670_v62 = vpack.c.bf16 %v3932_v32, %v3930_v38 }
 0x913   : > { %v9672_v58 = vpack.c.bf16 %v3933_v59, %v3931_v23 }
 0x915   : > { %4535 = vmatprep.subr.bf16.mxu0 %v9672_v58  ;;  %8253 = vmatprep.subr.bf16.mxu1 %v9672_v58 }
 0x916   : > { %4536 = vmatpush1.bf16.msra.mxu0 %v9670_v62  ;;  %8257 = vmatpush1.bf16.msra.mxu1 %v9670_v62 }
 0x917   : > { %7833 = vmatprep.subr.bf16.mxu0 %v8434_v31 }
 0x919   : > { %7550 = vmatmul.mubr.msk.bf16.vlgmr.msra.gmra.mrb[32].mxu0 %vm2727_vm5, %v8433_v54 }
 0x91a   : > { %7834 = vmatpush3.bf16.msra.mxu0 %v8435_v63  ;;  %4571 = vmatprep.mubr.bf16.mxu0 %v10467_v57 }
 0x91b   : > { %7835 = vmatprep.subr.bf16.mxu0 %v8437_v0 }
 0x91e   : > { %7836 = vmatpush3.bf16.msra.mxu0 %v8438_v2 }
 0x91f   : > { %7837 = vmatprep.subr.bf16.mxu0 %v8441_v1 }
 0x921   : > { %7551 = vmatmul.mubr.msk.bf16.gmra.mrb[36].mxu0 %vm2727_vm5, %v8436_v50 }
 0x922   : > { %4581 = vmatprep.mubr.bf16.mxu0 %v10467_v57  ;;  %7838 = vmatpush3.bf16.msra.mxu0 %v8442_v20 }
 0x923   : > { %7839 = vmatprep.subr.bf16.mxu0 %v8444_v42 }
 0x926   : > { %7840 = vmatpush3.bf16.msra.mxu0 %v8445_v43 }
 0x927   : > { %7841 = vmatprep.subr.bf16.mxu0 %v8447_v33 }
 0x929   : > { %7552 = vmatmul.mubr.msk.bf16.gmra.mrb[40].mxu0 %vm2727_vm5, %v8439_v6 }
 0x92a   : > { %4591 = vmatprep.mubr.bf16.mxu0 %v10467_v57  ;;  %7842 = vmatpush3.bf16.msra.mxu0 %v8448_v30 }
 0x92b   : > { %7843 = vmatprep.subr.bf16.mxu0 %v8450_v29 }
 0x92e   : > { %7844 = vmatpush3.bf16.msra.mxu0 %v8451_v19 }
 0x92f   : > { %7845 = vmatprep.subr.bf16.mxu0 %v8454_v41 }
 0x931   : > { %7553 = vmatmul.mubr.msk.bf16.gmra.mrb[44].mxu0 %vm2727_vm5, %v8440_v47 }
 0x932   : > { %4601 = vmatprep.mubr.bf16.mxu0 %v10467_v57  ;;  %7846 = vmatpush3.bf16.msra.mxu0 %v8455_v7 }
 0x933   : > { %7847 = vmatprep.subr.bf16.mxu0 %v8457_v8 }
 0x936   : > { %7848 = vmatpush3.bf16.msra.mxu0 %v8458_v61 }
 0x939   : > { %7554 = vmatmul.mubr.msk.bf16.gmra.mrb[48].mxu0 %vm2727_vm5, %v8443_v11 }
 0x93a   : > { %4611 = vmatprep.mubr.bf16.mxu0 %v10467_v57 }
 0x941   : > { %7555 = vmatmul.mubr.msk.bf16.gmra.mrb[52].mxu0 %vm2727_vm5, %v8446_v14 }
 0x942   : > { %4621 = vmatprep.mubr.bf16.mxu0 %v10467_v57 }
 0x949   : > { %7556 = vmatmul.mubr.msk.bf16.gmra.mrb[56].mxu0 %vm2727_vm5, %v8449_v17 }
 0x94a   : > { %4631 = vmatprep.mubr.bf16.mxu0 %v10467_v57 }
 0x951   : > { %7557 = vmatmul.mubr.msk.bf16.gmra.mrb[60].mxu0 %vm2727_vm5, %v8452_v51 }
 0x952   : > { %4641 = vmatprep.mubr.bf16.mxu0 %v10467_v57 }
 0x959   : > { %7558 = vmatmul.mubr.msk.bf16.gmra.mrb[64].mxu0 %vm2727_vm5, %v8453_v55 }
 0x95a   : > { %4651 = vmatprep.mubr.bf16.mxu0 %v10467_v57 }
 0x961   : > { %7559 = vmatmul.mubr.msk.bf16.gmra.mrb[68].mxu0 %vm2727_vm5, %v8456_v35 }
 0x962   : > { %5573 = vmatprep.mubr.bf16.mxu0 %v9648_v21 }
 0x969   : > { %5574 = vmatmul.mubr.bf16.vlgmr.msra.gmra.mrb[72].mxu0 %v9646_v25 }
 0x96a   : > { %5581 = vmatprep.mubr.bf16.mxu0 %v9656_v40 }
 0x971   : > { %5582 = vmatmul.mubr.bf16.gmra.mrb[76].mxu0 %v9654_v10 }
 0x972   : > { %5589 = vmatprep.mubr.bf16.mxu0 %v9664_v26 }
 0x979   : > { %5590 = vmatmul.mubr.bf16.gmra.mrb[80].mxu0 %v9662_v56 }
 0x97a   : > { %5597 = vmatprep.mubr.bf16.mxu0 %v9672_v58 }
 0x981   : > { %5598 = vmatmul.mubr.bf16.gmra.mrb[84].mxu0 %v9670_v62 }
 0x982   : > { %8080 = vmatprep.mubr.msk.bf16.mxu0 %vm2727_vm5, %v8459_v9 }
 0x9ec   : > { %v4563_v25 = vpop.f32.mrb[32].mxu0 }
 0x9ed   : > { %5150 = vst [vmem:[%s9736_s1] sm:$0xff] %v4563_v25  ;;  %v4565_v21 = vpop.f32.mrb[33].mxu0 }
 0x9ee   : > { %5151 = vst [vmem:[%s9736_s1 + $0x8] sm:$0xff] %v4565_v21  ;;  %v4567_v10 = vpop.f32.mrb[34].mxu0 }
 0x9ef   : > { %5152 = vst [vmem:[%s9736_s1 + $0x10] sm:$0xff] %v4567_v10  ;;  %v4569_v40 = vpop.f32.mrb[35].mxu0  ;;  %v5606_v10 = vstv %s7611_s0  ;;  %s10474_s0 = sld [smem:[#allocation19_spill]] }
 0x9f0   : > { %5153 = vst [vmem:[%s9736_s1 + $0x18] sm:$0xff] %v4569_v40 }
 0x9f4   : > { %v4573_v56 = vpop.f32.mrb[36].mxu0 }
 0x9f5   : > { %5154 = vst [vmem:[%s9736_s1 + $0x20] sm:$0xff] %v4573_v56  ;;  %v4575_v26 = vpop.f32.mrb[37].mxu0 }
 0x9f6   : > { %5155 = vst [vmem:[%s9736_s1 + $0x28] sm:$0xff] %v4575_v26  ;;  %v4577_v28 = vpop.f32.mrb[38].mxu0 }
 0x9f7   : > { %5156 = vst [vmem:[%s9736_s1 + $0x30] sm:$0xff] %v4577_v28  ;;  %v4579_v38 = vpop.f32.mrb[39].mxu0 }
 0x9f8   : > { %5157 = vst [vmem:[%s9736_s1 + $0x38] sm:$0xff] %v4579_v38 }
 0x9fc   : > { %v4583_v32 = vpop.f32.mrb[40].mxu0 }
 0x9fd   : > { %5158 = vst [vmem:[%s9736_s1 + $0x40] sm:$0xff] %v4583_v32  ;;  %v4585_v23 = vpop.f32.mrb[41].mxu0 }
 0x9fe   : > { %5159 = vst [vmem:[%s9736_s1 + $0x48] sm:$0xff] %v4585_v23  ;;  %v4587_v59 = vpop.f32.mrb[42].mxu0 }
 0x9ff   : > { %5160 = vst [vmem:[%s9736_s1 + $0x50] sm:$0xff] %v4587_v59  ;;  %v4589_v62 = vpop.f32.mrb[43].mxu0 }
 0xa00   : > { %5161 = vst [vmem:[%s9736_s1 + $0x58] sm:$0xff] %v4589_v62 }
 0xa04   : > { %v4593_v58 = vpop.f32.mrb[44].mxu0 }
 0xa05   : > { %5162 = vst [vmem:[%s9736_s1 + $0x60] sm:$0xff] %v4593_v58  ;;  %v4595_v31 = vpop.f32.mrb[45].mxu0 }
 0xa06   : > { %5163 = vst [vmem:[%s9736_s1 + $0x68] sm:$0xff] %v4595_v31  ;;  %v4597_v54 = vpop.f32.mrb[46].mxu0 }
 0xa07   : > { %5164 = vst [vmem:[%s9736_s1 + $0x70] sm:$0xff] %v4597_v54  ;;  %v4599_v63 = vpop.f32.mrb[47].mxu0 }
 0xa08   : > { %5165 = vst [vmem:[%s9736_s1 + $0x78] sm:$0xff] %v4599_v63 }
 0xa0c   : > { %v4603_v0 = vpop.f32.mrb[48].mxu0 }
 0xa0d   : > { %5166 = vst [vmem:[%s9736_s1 + $0x80] sm:$0xff] %v4603_v0  ;;  %v4605_v2 = vpop.f32.mrb[49].mxu0 }
 0xa0e   : > { %5167 = vst [vmem:[%s9736_s1 + $0x88] sm:$0xff] %v4605_v2  ;;  %v4607_v1 = vpop.f32.mrb[50].mxu0 }
 0xa0f   : > { %5168 = vst [vmem:[%s9736_s1 + $0x90] sm:$0xff] %v4607_v1  ;;  %v4609_v50 = vpop.f32.mrb[51].mxu0 }
 0xa10   : > { %5169 = vst [vmem:[%s9736_s1 + $0x98] sm:$0xff] %v4609_v50 }
 0xa14   : > { %v4613_v20 = vpop.f32.mrb[52].mxu0 }
 0xa15   : > { %5170 = vst [vmem:[%s9736_s1 + $0xa0] sm:$0xff] %v4613_v20  ;;  %v4615_v42 = vpop.f32.mrb[53].mxu0 }
 0xa16   : > { %5171 = vst [vmem:[%s9736_s1 + $0xa8] sm:$0xff] %v4615_v42  ;;  %v4617_v43 = vpop.f32.mrb[54].mxu0 }
 0xa17   : > { %5172 = vst [vmem:[%s9736_s1 + $0xb0] sm:$0xff] %v4617_v43  ;;  %v4619_v33 = vpop.f32.mrb[55].mxu0 }
 0xa18   : > { %5173 = vst [vmem:[%s9736_s1 + $0xb8] sm:$0xff] %v4619_v33 }
 0xa1c   : > { %v4623_v6 = vpop.f32.mrb[56].mxu0 }
 0xa1d   : > { %5174 = vst [vmem:[%s9736_s1 + $0xc0] sm:$0xff] %v4623_v6  ;;  %v4625_v30 = vpop.f32.mrb[57].mxu0 }
 0xa1e   : > { %5175 = vst [vmem:[%s9736_s1 + $0xc8] sm:$0xff] %v4625_v30  ;;  %v4627_v29 = vpop.f32.mrb[58].mxu0 }
 0xa1f   : > { %5176 = vst [vmem:[%s9736_s1 + $0xd0] sm:$0xff] %v4627_v29  ;;  %v4629_v19 = vpop.f32.mrb[59].mxu0 }
 0xa20   : > { %5177 = vst [vmem:[%s9736_s1 + $0xd8] sm:$0xff] %v4629_v19 }
 0xa24   : > { %v4633_v41 = vpop.f32.mrb[60].mxu0 }
 0xa25   : > { %5178 = vst [vmem:[%s9736_s1 + $0xe0] sm:$0xff] %v4633_v41  ;;  %v4635_v47 = vpop.f32.mrb[61].mxu0 }
 0xa26   : > { %5179 = vst [vmem:[%s9736_s1 + $0xe8] sm:$0xff] %v4635_v47  ;;  %v4637_v7 = vpop.f32.mrb[62].mxu0 }
 0xa27   : > { %5180 = vst [vmem:[%s9736_s1 + $0xf0] sm:$0xff] %v4637_v7  ;;  %v4639_v8 = vpop.f32.mrb[63].mxu0 }
 0xa28   : > { %5181 = vst [vmem:[%s9736_s1 + $0xf8] sm:$0xff] %v4639_v8 }
 0xa2c   : > { %v4643_v61 = vpop.f32.mrb[64].mxu0 }
 0xa2d   : > { %5182 = vst [vmem:[%s9736_s1 + $0x100] sm:$0xff] %v4643_v61  ;;  %v4645_v11 = vpop.f32.mrb[65].mxu0 }
 0xa2e   : > { %5183 = vst [vmem:[%s9736_s1 + $0x108] sm:$0xff] %v4645_v11  ;;  %v4647_v14 = vpop.f32.mrb[66].mxu0 }
 0xa2f   : > { %5184 = vst [vmem:[%s9736_s1 + $0x110] sm:$0xff] %v4647_v14  ;;  %v4649_v17 = vpop.f32.mrb[67].mxu0 }
 0xa30   : > { %5185 = vst [vmem:[%s9736_s1 + $0x118] sm:$0xff] %v4649_v17 }
 0xa34   : > { %v4653_v51 = vpop.f32.mrb[68].mxu0 }
 0xa35   : > { %5186 = vst [vmem:[%s9736_s1 + $0x120] sm:$0xff] %v4653_v51  ;;  %v4655_v55 = vpop.f32.mrb[69].mxu0 }
 0xa36   : > { %5187 = vst [vmem:[%s9736_s1 + $0x128] sm:$0xff] %v4655_v55  ;;  %v4657_v35 = vpop.f32.mrb[70].mxu0 }
 0xa37   : > { %5188 = vst [vmem:[%s9736_s1 + $0x130] sm:$0xff] %v4657_v35  ;;  %v4659_v9 = vpop.f32.mrb[71].mxu0 }
 0xa38   : > { %5189 = vst [vmem:[%s9736_s1 + $0x138] sm:$0xff] %v4659_v9  ;;  %v8460_v9 = vld [vmem:[%s10472_s7 + $0x8] sm:$0xff]  }
 0xa3c   : > { %v7849_v25 = vpop.f32.mrb[72].mxu0 }
 0xa3d   : > { %v7850_v21 = vpop.f32.mrb[73].mxu0 }
 0xa3e   : > { %v7851_v40 = vadd.f32 %v7850_v21, %v7849_v25  ;;  %v7852_v56 = vpop.f32.mrb[74].mxu0  ;;  %v8461_v25 = vld [vmem:[%s10472_s7 + $0x10] sm:$0xff]   ;;  %v8462_v21 = vld [vmem:[%s10472_s7 + $0x18] sm:$0xff]  }
 0xa3f   : > { %v7853_v26 = vpop.f32.mrb[75].mxu0 }
 0xa40   : > { %v5607_v28 = vmul.f32 %v7851_v40, %v5606_v10  ;;  %v7854_v38 = vadd.f32 %v7853_v26, %v7852_v56  ;;  %v8463_v40 = vld [vmem:[%s10474_s0] sm:$0xff]   ;;  %v5646_v56 = vpop.permute.xlu0 %5645 }
 0xa42   : > { %v5615_v32 = vadd.f32 %v5607_v28, %v9544_v18  ;;  %v5608_v23 = vmul.f32 %v7854_v38, %v5606_v10 }
 0xa44   : > { %v5616_v59 = vadd.f32 %v5608_v23, %v9548_v16  ;;  %v7855_v62 = vpop.f32.mrb[76].mxu0 }
 0xa45   : > { %v7856_v58 = vpop.f32.mrb[77].mxu0 }
 0xa46   : > { %v7857_v31 = vadd.f32 %v7856_v58, %v7855_v62  ;;  %v7858_v54 = vpop.f32.mrb[78].mxu0  ;;  %v5631_v63 = vpack.c.bf16 %v5616_v59, %v5615_v32 }
 0xa47   : > { %v7859_v0 = vpop.f32.mrb[79].mxu0 }
 0xa48   : > { %v5609_v2 = vmul.f32 %v7857_v31, %v5606_v10  ;;  %v7860_v1 = vadd.f32 %v7859_v0, %v7858_v54  ;;  %8072 = vmatprep.subr.bf16.mxu0 %v5631_v63 }
 0xa49   : > { %8073 = vmatpush3.bf16.msra.mxu0 %v5631_v63 }
 0xa4a   : > { %v5617_v50 = vadd.f32 %v5609_v2, %v9541_v48  ;;  %v5610_v20 = vmul.f32 %v7860_v1, %v5606_v10 }
 0xa4c   : > { %v5618_v42 = vadd.f32 %v5610_v20, %v9546_v53  ;;  %v7861_v43 = vpop.f32.mrb[80].mxu0 }
 0xa4d   : > { %v7862_v18 = vpop.f32.mrb[81].mxu0 }
 0xa4e   : > { %v7863_v33 = vadd.f32 %v7862_v18, %v7861_v43  ;;  %v7864_v6 = vpop.f32.mrb[82].mxu0  ;;  %v5632_v16 = vpack.c.bf16 %v5618_v42, %v5617_v50 }
 0xa4f   : > { %v7865_v30 = vpop.f32.mrb[83].mxu0 }
 0xa50   : > { %v5611_v29 = vmul.f32 %v7863_v33, %v5606_v10  ;;  %v7866_v19 = vadd.f32 %v7865_v30, %v7864_v6  ;;  %8074 = vmatprep.subr.bf16.mxu0 %v5632_v16 }
 0xa51   : > { %8075 = vmatpush3.bf16.msra.mxu0 %v5632_v16 }
 0xa52   : > { %v5619_v41 = vadd.f32 %v5611_v29, %v9558_v36  ;;  %v5612_v47 = vmul.f32 %v7866_v19, %v5606_v10 }
 0xa54   : > { %v5620_v7 = vadd.f32 %v5612_v47, %v9562_v12  ;;  %v7867_v48 = vpop.f32.mrb[84].mxu0 }
 0xa55   : > { %v7868_v8 = vpop.f32.mrb[85].mxu0 }
 0xa56   : > { %v7869_v53 = vadd.f32 %v7868_v8, %v7867_v48  ;;  %v7870_v61 = vpop.f32.mrb[86].mxu0  ;;  %v5633_v11 = vpack.c.bf16 %v5620_v7, %v5619_v41 }
 0xa57   : > { %v7871_v14 = vpop.f32.mrb[87].mxu0 }
 0xa58   : > { %v5613_v17 = vmul.f32 %v7869_v53, %v5606_v10  ;;  %v7872_v51 = vadd.f32 %v7871_v14, %v7870_v61  ;;  %8076 = vmatprep.subr.bf16.mxu0 %v5633_v11  ;;  %v8464_v14 = vld [vmem:[%s10474_s0 + $0x8] sm:$0xff]  }
 0xa59   : > { %8077 = vmatpush3.bf16.msra.mxu0 %v5633_v11  ;;  %v8465_v11 = vld [vmem:[%s10475_s2] sm:$0xff]  }
 0xa5a   : > { %v5621_v55 = vadd.f32 %v5613_v17, %v9555_v34  ;;  %v5614_v36 = vmul.f32 %v7872_v51, %v5606_v10  ;;  %v5651_v34 = vpop.permute.xlu1 %5650  ;;  %v5656_v10 = vpop.permute.xlu0 %5655  ;;  %v8466_v17 = vld [vmem:[%s10474_s0 + $0x10] sm:$0xff]   ;;  %v8472_v51 = vld [vmem:[%s10475_s2 + $0x8] sm:$0xff]  }
 0xa5c   : > { %v5622_v35 = vadd.f32 %v5614_v36, %v9560_v5  ;;  %v8467_v36 = vld [vmem:[%s10474_s0 + $0x18] sm:$0xff]  }
 0xa5e   : > { %v5634_v12 = vpack.c.bf16 %v5622_v35, %v5621_v55  ;;  %v5661_v26 = vpop.permute.xlu1 %5660  ;;  %v5666_v32 = vpop.permute.xlu0 %5665  ;;  %v8477_v55 = vld [vmem:[%s10475_s2 + $0x10] sm:$0xff]   ;;  %v8468_v35 = vld [vmem:[%s10474_s0 + $0x20] sm:$0xff]  }
 0xa60   : > { %8078 = vmatprep.subr.bf16.mxu0 %v5634_v12 }
 0xa61   : > { %8079 = vmatpush3.bf16.msra.mxu0 %v5634_v12  ;;  %v8484_v12 = vld [vmem:[%s10475_s2 + $0x18] sm:$0xff]   ;;  %s10476_s2 = sld [smem:[#allocation14_spill]] }
 0xa62   : > { %v5671_v31 = vpop.permute.xlu1 %5670  ;;  %v5676_v20 = vpop.permute.xlu0 %5675 }
 0xa64   : > { %8081 = vmatmul.mubr.msk.bf16.vlgmr.msra.gmra.mrb[88].mxu0 %vm2727_vm5, %v8460_v9  ;;  %v8469_v9 = vld [vmem:[%s10474_s0 + $0x28] sm:$0xff]  }
 0xa65   : > { %8084 = vmatprep.mubr.msk.bf16.mxu0 %vm2727_vm5, %v8461_v25  ;;  %v8470_v25 = vld [vmem:[%s10474_s0 + $0x30] sm:$0xff]  }
 0xa66   : > { %v5681_v6 = vpop.permute.xlu1 %5680 }
 0xa6c   : > { %8085 = vmatmul.mubr.msk.bf16.gmra.mrb[92].mxu0 %vm2727_vm5, %v8462_v21  ;;  %v8471_v21 = vld [vmem:[%s10474_s0 + $0x38] sm:$0xff]  }
 0xa6d   : > { %8096 = vmatprep.mubr.msk.bf16.mxu0 %vm2727_vm5, %v8463_v40  ;;  %v8473_v40 = vld [vmem:[%s10474_s0 + $0x40] sm:$0xff]  }
 0xb37   : > { %v8082_v5 = vpop.f32.mrb[88].mxu0 }
 0xb38   : > { %v5758_v28 = vadd.f32 %v8082_v5, %v5656_v10  ;;  %v5749_v38 = vpop.f32.mrb[89].mxu0  ;;  %v8476_v10 = vld [vmem:[%s10474_s0 + $0x58] sm:$0xff]   ;;  %v8479_v5 = vld [vmem:[%s10474_s0 + $0x68] sm:$0xff]  }
 0xb39   : > { %v5750_v23 = vadd.f32 %v5749_v38, %v5646_v56  ;;  %v8083_v59 = vpop.f32.mrb[90].mxu0  ;;  %v8474_v56 = vld [vmem:[%s10474_s0 + $0x48] sm:$0xff]   ;;  %v8481_v38 = vld [vmem:[%s10474_s0 + $0x78] sm:$0xff]  }
 0xb3a   : > { %v5761_v62 = vadd.f32 %v8083_v59, %v5661_v26  ;;  %v5752_v58 = vpop.f32.mrb[91].mxu0  ;;  %v5782_v63 = vmax.f32 %v5758_v28, 0.0  ;;  %v8478_v26 = vld [vmem:[%s10474_s0 + $0x60] sm:$0xff]   ;;  %v8480_v28 = vld [vmem:[%s10474_s0 + $0x70] sm:$0xff]  }
 0xb3b   : > { %v5753_v54 = vadd.f32 %v5752_v58, %v5651_v34  ;;  %v5780_v2 = vmax.f32 %v5750_v23, 0.0  ;;  %v8475_v34 = vld [vmem:[%s10474_s0 + $0x50] sm:$0xff]   ;;  %v8483_v23 = vld [vmem:[%s10474_s0 + $0x88] sm:$0xff]   ;;  %v8487_v58 = vld [vmem:[%s10476_s2] sm:$0xff]  }
 0xb3c   : > { %v5783_v0 = vmax.f32 %v5761_v62, 0.0  ;;  %v8485_v59 = vld [vmem:[%s10474_s0 + $0x90] sm:$0xff]   ;;  %v8486_v62 = vld [vmem:[%s10474_s0 + $0x98] ss:$0 sps:$4 sm:$0xff]  }
 0xb3d   : > { %v5781_v1 = vmax.f32 %v5753_v54, 0.0 }
 0xb3e   : > { %v9794_v50 = vpack.c.bf16 %v5783_v0, %v5782_v63 }
 0xb3f   : > { %v9796_v42 = vpack.c.bf16 %v5781_v1, %v5780_v2  ;;  %v8086_v43 = vpop.f32.mrb[92].mxu0 }
 0xb40   : > { %v5774_v18 = vadd.f32 %v8086_v43, %v5676_v20  ;;  %v5765_v33 = vpop.f32.mrb[93].mxu0 }
 0xb41   : > { %v5766_v16 = vadd.f32 %v5765_v33, %v5666_v32  ;;  %v8087_v30 = vpop.f32.mrb[94].mxu0  ;;  %8088 = vmatprep.subr.bf16.mxu0 %v9796_v42  ;;  %v8482_v32 = vld [vmem:[%s10474_s0 + $0x80] sm:$0xff]   ;;  %s10481_s0 = smul.u32 104, %s10486_s16 }
 0xb42   : > { %v5777_v29 = vadd.f32 %v8087_v30, %v5681_v6  ;;  %v5768_v19 = vpop.f32.mrb[95].mxu0  ;;  %8089 = vmatpush3.bf16.msra.mxu0 %v9796_v42  ;;  %v5786_v47 = vmax.f32 %v5774_v18, 0.0 }
 0xb43   : > { %v5769_v41 = vadd.f32 %v5768_v19, %v5671_v31  ;;  %8090 = vmatprep.subr.bf16.mxu0 %v9794_v50  ;;  %v5784_v48 = vmax.f32 %v5766_v16, 0.0 }
 0xb44   : > { %v5787_v7 = vmax.f32 %v5777_v29, 0.0 }
 0xb45   : > { %v5785_v8 = vmax.f32 %v5769_v41, 0.0 }
 0xb46   : > { %v5830_v53 = vpack.c.bf16 %v5787_v7, %v5786_v47  ;;  %8091 = vmatpush3.bf16.msra.mxu0 %v9794_v50 }
 0xb47   : > { %v5829_v61 = vpack.c.bf16 %v5785_v8, %v5784_v48 }
 0xb49   : > { %8092 = vmatprep.subr.bf16.mxu0 %v5829_v61 }
 0xb4a   : > { %8093 = vmatpush3.bf16.msra.mxu0 %v5829_v61 }
 0xb4b   : > { %8094 = vmatprep.subr.bf16.mxu0 %v5830_v53 }
 0xb4e   : > { %8095 = vmatpush3.bf16.msra.mxu0 %v5830_v53 }
 0xb4f   : > { %8136 = vmatprep.subr.bf16.mxu0 %v8465_v11 }
 0xb51   : > { %8097 = vmatmul.mubr.msk.bf16.vlgmr.msra.gmra.mrb[96].mxu0 %vm2727_vm5, %v8464_v14 }
 0xb52   : > { %8137 = vmatpush3.bf16.msra.mxu0 %v8465_v11  ;;  %8100 = vmatprep.mubr.msk.bf16.mxu0 %vm2727_vm5, %v8466_v17 }
 0xb53   : > { %8138 = vmatprep.subr.bf16.mxu0 %v8472_v51 }
 0xb56   : > { %8139 = vmatpush3.bf16.msra.mxu0 %v8472_v51 }
 0xb57   : > { %8140 = vmatprep.subr.bf16.mxu0 %v8477_v55 }
 0xb59   : > { %8101 = vmatmul.mubr.msk.bf16.gmra.mrb[100].mxu0 %vm2727_vm5, %v8467_v36 }
 0xb5a   : > { %8104 = vmatprep.mubr.msk.bf16.mxu0 %vm2727_vm5, %v8468_v35  ;;  %8141 = vmatpush3.bf16.msra.mxu0 %v8477_v55 }
 0xb5b   : > { %8142 = vmatprep.subr.bf16.mxu0 %v8484_v12 }
 0xb5e   : > { %8143 = vmatpush3.bf16.msra.mxu0 %v8484_v12 }
 0xb61   : > { %8105 = vmatmul.mubr.msk.bf16.gmra.mrb[104].mxu0 %vm2727_vm5, %v8469_v9 }
 0xb62   : > { %8108 = vmatprep.mubr.msk.bf16.mxu0 %vm2727_vm5, %v8470_v25 }
 0xb69   : > { %8109 = vmatmul.mubr.msk.bf16.gmra.mrb[108].mxu0 %vm2727_vm5, %v8471_v21 }
 0xb6a   : > { %8112 = vmatprep.mubr.msk.bf16.mxu0 %vm2727_vm5, %v8473_v40 }
 0xb71   : > { %8113 = vmatmul.mubr.msk.bf16.gmra.mrb[112].mxu0 %vm2727_vm5, %v8474_v56 }
 0xb72   : > { %8116 = vmatprep.mubr.msk.bf16.mxu0 %vm2727_vm5, %v8475_v34 }
 0xb79   : > { %8117 = vmatmul.mubr.msk.bf16.gmra.mrb[116].mxu0 %vm2727_vm5, %v8476_v10 }
 0xb7a   : > { %8120 = vmatprep.mubr.msk.bf16.mxu0 %vm2727_vm5, %v8478_v26 }
 0xb81   : > { %8121 = vmatmul.mubr.msk.bf16.gmra.mrb[120].mxu0 %vm2727_vm5, %v8479_v5  ;;  %v6358_v5 = vstv %s7678_s3  ;;  %s10479_s3 = sld [smem:[#allocation20_spill]] }
 0xb82   : > { %8124 = vmatprep.mubr.msk.bf16.mxu0 %vm2727_vm5, %v8480_v28 }
 0xb89   : > { %8125 = vmatmul.mubr.msk.bf16.gmra.mrb[124].mxu0 %vm2727_vm5, %v8481_v38 }
 0xb8a   : > { %8128 = vmatprep.mubr.msk.bf16.mxu0 %vm2727_vm5, %v8482_v32 }
 0xb91   : > { %8129 = vmatmul.mubr.msk.bf16.gmra.mrb[128].mxu0 %vm2727_vm5, %v8483_v23 }
 0xb92   : > { %8132 = vmatprep.mubr.msk.bf16.mxu0 %vm2727_vm5, %v8485_v59 }
 0xb99   : > { %8133 = vmatmul.mubr.msk.bf16.gmra.mrb[132].mxu0 %vm2727_vm5, %v8486_v62 }
 0xb9a   : > { %8144 = vmatprep.mubr.msk.bf16.mxu0 %vm2727_vm5, %v9796_v42 }
 0xba1   : > { %8145 = vmatmul.mubr.msk.bf16.vlgmr.msra.gmra.mrb[136].mxu0 %vm2727_vm5, %v9794_v50 }
 0xba2   : > { %8148 = vmatprep.mubr.msk.bf16.mxu0 %vm2727_vm5, %v5829_v61 }
 0xba9   : > { %8149 = vmatmul.mubr.msk.bf16.gmra.mrb[140].mxu0 %vm2727_vm5, %v5830_v53 }
 0xbaa   : > { %8160 = vmatprep.mubr.msk.bf16.mxu0 %vm2727_vm5, %v8487_v58 }
 0xc24   : > { %v8098_v31 = vpop.f32.mrb[96].mxu0 }
 0xc25   : > { %6183 = vst.msk [vmem:[%s9855_s5 + $0x10] sm:$0xff] %vm2727_vm5, %v8098_v31  ;;  %v6023_v54 = vpop.f32.mrb[97].mxu0 }
 0xc26   : > { %6181 = vst.msk [vmem:[%s9855_s5] sm:$0xff] %vm2727_vm5, %v6023_v54  ;;  %v8099_v63 = vpop.f32.mrb[98].mxu0 }
 0xc27   : > { %6184 = vst.msk [vmem:[%s9855_s5 + $0x18] sm:$0xff] %vm2727_vm5, %v8099_v63  ;;  %v6026_v0 = vpop.f32.mrb[99].mxu0 }
 0xc28   : > { %6182 = vst.msk [vmem:[%s9855_s5 + $0x8] sm:$0xff] %vm2727_vm5, %v6026_v0 }
 0xc2c   : > { %v8102_v2 = vpop.f32.mrb[100].mxu0 }
 0xc2d   : > { %6187 = vst.msk [vmem:[%s9855_s5 + $0x30] sm:$0xff] %vm2727_vm5, %v8102_v2  ;;  %v6039_v1 = vpop.f32.mrb[101].mxu0 }
 0xc2e   : > { %6185 = vst.msk [vmem:[%s9855_s5 + $0x20] sm:$0xff] %vm2727_vm5, %v6039_v1  ;;  %v8103_v50 = vpop.f32.mrb[102].mxu0 }
 0xc2f   : > { %6188 = vst.msk [vmem:[%s9855_s5 + $0x38] sm:$0xff] %vm2727_vm5, %v8103_v50  ;;  %v6042_v20 = vpop.f32.mrb[103].mxu0 }
 0xc30   : > { %6186 = vst.msk [vmem:[%s9855_s5 + $0x28] sm:$0xff] %vm2727_vm5, %v6042_v20 }
 0xc34   : > { %v8106_v42 = vpop.f32.mrb[104].mxu0 }
 0xc35   : > { %6191 = vst.msk [vmem:[%s9855_s5 + $0x50] sm:$0xff] %vm2727_vm5, %v8106_v42  ;;  %v6055_v43 = vpop.f32.mrb[105].mxu0 }
 0xc36   : > { %6189 = vst.msk [vmem:[%s9855_s5 + $0x40] sm:$0xff] %vm2727_vm5, %v6055_v43  ;;  %v8107_v18 = vpop.f32.mrb[106].mxu0 }
 0xc37   : > { %6192 = vst.msk [vmem:[%s9855_s5 + $0x58] sm:$0xff] %vm2727_vm5, %v8107_v18  ;;  %v6058_v33 = vpop.f32.mrb[107].mxu0 }
 0xc38   : > { %6190 = vst.msk [vmem:[%s9855_s5 + $0x48] sm:$0xff] %vm2727_vm5, %v6058_v33 }
 0xc3c   : > { %v8110_v6 = vpop.f32.mrb[108].mxu0 }
 0xc3d   : > { %6195 = vst.msk [vmem:[%s9855_s5 + $0x70] sm:$0xff] %vm2727_vm5, %v8110_v6  ;;  %v6071_v16 = vpop.f32.mrb[109].mxu0 }
 0xc3e   : > { %6193 = vst.msk [vmem:[%s9855_s5 + $0x60] sm:$0xff] %vm2727_vm5, %v6071_v16  ;;  %v8111_v30 = vpop.f32.mrb[110].mxu0 }
 0xc3f   : > { %6196 = vst.msk [vmem:[%s9855_s5 + $0x78] sm:$0xff] %vm2727_vm5, %v8111_v30  ;;  %v6074_v29 = vpop.f32.mrb[111].mxu0 }
 0xc40   : > { %6194 = vst.msk [vmem:[%s9855_s5 + $0x68] sm:$0xff] %vm2727_vm5, %v6074_v29 }
 0xc44   : > { %v8114_v19 = vpop.f32.mrb[112].mxu0 }
 0xc45   : > { %6199 = vst.msk [vmem:[%s9855_s5 + $0x90] sm:$0xff] %vm2727_vm5, %v8114_v19  ;;  %v6087_v41 = vpop.f32.mrb[113].mxu0 }
 0xc46   : > { %6197 = vst.msk [vmem:[%s9855_s5 + $0x80] sm:$0xff] %vm2727_vm5, %v6087_v41  ;;  %v8115_v47 = vpop.f32.mrb[114].mxu0  ;;  %v8489_v41 = vld [vmem:[%s10476_s2 + $0x10] sm:$0xff]  }
 0xc47   : > { %6200 = vst.msk [vmem:[%s9855_s5 + $0x98] sm:$0xff] %vm2727_vm5, %v8115_v47  ;;  %v6090_v7 = vpop.f32.mrb[115].mxu0  ;;  %v8500_v47 = vld [vmem:[%s10471_s26 + $0x58] sm:$0xff]  }
 0xc48   : > { %6198 = vst.msk [vmem:[%s9855_s5 + $0x88] sm:$0xff] %vm2727_vm5, %v6090_v7  ;;  %v8501_v7 = vld [vmem:[%s10471_s26 + $0x60] sm:$0xff]  }
 0xc4c   : > { %v8118_v48 = vpop.f32.mrb[116].mxu0 }
 0xc4d   : > { %6203 = vst.msk [vmem:[%s9855_s5 + $0xb0] sm:$0xff] %vm2727_vm5, %v8118_v48  ;;  %v6103_v8 = vpop.f32.mrb[117].mxu0  ;;  %v8502_v48 = vld [vmem:[%s10471_s26 + $0x68] sm:$0xff]  }
 0xc4e   : > { %6201 = vst.msk [vmem:[%s9855_s5 + $0xa0] sm:$0xff] %vm2727_vm5, %v6103_v8  ;;  %v8119_v53 = vpop.f32.mrb[118].mxu0  ;;  %v6398_v8 = vpop.permute.xlu0 %6397 }
 0xc4f   : > { %6204 = vst.msk [vmem:[%s9855_s5 + $0xb8] sm:$0xff] %vm2727_vm5, %v8119_v53  ;;  %v6106_v61 = vpop.f32.mrb[119].mxu0  ;;  %v8503_v53 = vld [vmem:[%s10471_s26 + $0x70] sm:$0xff]  }
 0xc50   : > { %6202 = vst.msk [vmem:[%s9855_s5 + $0xa8] sm:$0xff] %vm2727_vm5, %v6106_v61  ;;  %v6403_v61 = vpop.permute.xlu1 %6402 }
 0xc54   : > { %v8122_v11 = vpop.f32.mrb[120].mxu0 }
 0xc55   : > { %6207 = vst.msk [vmem:[%s9855_s5 + $0xd0] sm:$0xff] %vm2727_vm5, %v8122_v11  ;;  %v6119_v14 = vpop.f32.mrb[121].mxu0  ;;  %v6408_v11 = vpop.permute.xlu0 %6407 }
 0xc56   : > { %6205 = vst.msk [vmem:[%s9855_s5 + $0xc0] sm:$0xff] %vm2727_vm5, %v6119_v14  ;;  %v8123_v17 = vpop.f32.mrb[122].mxu0  ;;  %v6413_v14 = vpop.permute.xlu1 %6412 }
 0xc57   : > { %6208 = vst.msk [vmem:[%s9855_s5 + $0xd8] sm:$0xff] %vm2727_vm5, %v8123_v17  ;;  %v6122_v51 = vpop.f32.mrb[123].mxu0  ;;  %v8504_v17 = vld [vmem:[%s10471_s26 + $0x78] sm:$0xff]  }
 0xc58   : > { %6206 = vst.msk [vmem:[%s9855_s5 + $0xc8] sm:$0xff] %vm2727_vm5, %v6122_v51 }
 0xc5c   : > { %v8126_v55 = vpop.f32.mrb[124].mxu0 }
 0xc5d   : > { %6211 = vst.msk [vmem:[%s9855_s5 + $0xf0] sm:$0xff] %vm2727_vm5, %v8126_v55  ;;  %v6135_v36 = vpop.f32.mrb[125].mxu0 }
 0xc5e   : > { %6209 = vst.msk [vmem:[%s9855_s5 + $0xe0] sm:$0xff] %vm2727_vm5, %v6135_v36  ;;  %v8127_v35 = vpop.f32.mrb[126].mxu0 }
 0xc5f   : > { %6212 = vst.msk [vmem:[%s9855_s5 + $0xf8] sm:$0xff] %vm2727_vm5, %v8127_v35  ;;  %v6138_v12 = vpop.f32.mrb[127].mxu0  ;;  %v6418_v35 = vpop.permute.xlu0 %6417 }
 0xc60   : > { %6210 = vst.msk [vmem:[%s9855_s5 + $0xe8] sm:$0xff] %vm2727_vm5, %v6138_v12 }
 0xc64   : > { %v8130_v9 = vpop.f32.mrb[128].mxu0 }
 0xc65   : > { %6215 = vst.msk [vmem:[%s9855_s5 + $0x110] sm:$0xff] %vm2727_vm5, %v8130_v9  ;;  %v6151_v25 = vpop.f32.mrb[129].mxu0 }
 0xc66   : > { %6213 = vst.msk [vmem:[%s9855_s5 + $0x100] sm:$0xff] %vm2727_vm5, %v6151_v25  ;;  %v8131_v21 = vpop.f32.mrb[130].mxu0 }
 0xc67   : > { %6216 = vst.msk [vmem:[%s9855_s5 + $0x118] sm:$0xff] %vm2727_vm5, %v8131_v21  ;;  %v6154_v40 = vpop.f32.mrb[131].mxu0 }
 0xc68   : > { %6214 = vst.msk [vmem:[%s9855_s5 + $0x108] sm:$0xff] %vm2727_vm5, %v6154_v40  ;;  %v6423_v40 = vpop.permute.xlu1 %6422 }
 0xc6c   : > { %v8134_v56 = vpop.f32.mrb[132].mxu0 }
 0xc6d   : > { %6219 = vst.msk [vmem:[%s9855_s5 + $0x130] sm:$0xff] %vm2727_vm5, %v8134_v56  ;;  %v6167_v34 = vpop.f32.mrb[133].mxu0 }
 0xc6e   : > { %6217 = vst.msk [vmem:[%s9855_s5 + $0x120] sm:$0xff] %vm2727_vm5, %v6167_v34  ;;  %v8135_v10 = vpop.f32.mrb[134].mxu0 }
 0xc6f   : > { %v6170_v26 = vpop.f32.mrb[135].mxu0 }
 0xc70   : > { %6218 = vst.msk [vmem:[%s9855_s5 + $0x128] sm:$0xff] %vm2727_vm5, %v6170_v26  ;;  %s10478_s5 = sld [smem:[#allocation27_spill]] }
 0xc74   : > { %v8146_v28 = vpop.f32.mrb[136].mxu0 }
 0xc75   : > { %v6361_v38 = vmul.f32 %v8146_v28, %v6358_v5  ;;  %v6327_v32 = vpop.f32.mrb[137].mxu0 }
 0xc76   : > { %v6359_v23 = vmul.f32 %v6358_v5, %v6327_v32  ;;  %v8147_v59 = vpop.f32.mrb[138].mxu0  ;;  %v6428_v32 = vpop.permute.xlu0 %6427 }
 0xc77   : > { %v6369_v62 = vadd.f32 %v6361_v38, %v9305_v13  ;;  %v6362_v58 = vmul.f32 %v8147_v59, %v6358_v5  ;;  %v6330_v31 = vpop.f32.mrb[139].mxu0  ;;  %v8505_v38 = vld [vmem:[%s10471_s26 + $0x80] sm:$0xff]  }
 0xc78   : > { %v6367_v54 = vadd.f32 %v6359_v23, %v9308_v24  ;;  %v6360_v63 = vmul.f32 %v6358_v5, %v6330_v31  ;;  %v6433_v31 = vpop.permute.xlu1 %6432 }
 0xc79   : > { %v6370_v0 = vadd.f32 %v6362_v58, %v9312_v60 }
 0xc7a   : > { %v6368_v2 = vadd.f32 %v6360_v63, %v9317_v52 }
 0xc7b   : > { %v6384_v1 = vpack.c.bf16 %v6370_v0, %v6369_v62 }
 0xc7c   : > { %v8150_v50 = vpop.f32.mrb[140].mxu0  ;;  %v6383_v20 = vpack.c.bf16 %v6368_v2, %v6367_v54 }
 0xc7d   : > { %v6365_v42 = vmul.f32 %v8150_v50, %v6358_v5  ;;  %v6343_v43 = vpop.f32.mrb[141].mxu0 }
 0xc7e   : > { %v6363_v18 = vmul.f32 %v6358_v5, %v6343_v43  ;;  %v8151_v33 = vpop.f32.mrb[142].mxu0  ;;  %8152 = vmatprep.subr.bf16.mxu0 %v6383_v20 }
 0xc7f   : > { %v6373_v13 = vadd.f32 %v6365_v42, %v9335_v15  ;;  %v6366_v6 = vmul.f32 %v8151_v33, %v6358_v5  ;;  %v6346_v16 = vpop.f32.mrb[143].mxu0  ;;  %8153 = vmatpush3.bf16.msra.mxu0 %v6383_v20  ;;  %v8488_v15 = vld [vmem:[%s10476_s2 + $0x8] sm:$0xff]  }
 0xc80   : > { %v6371_v24 = vadd.f32 %v6363_v18, %v9338_v27  ;;  %v6364_v60 = vmul.f32 %v6358_v5, %v6346_v16  ;;  %8154 = vmatprep.subr.bf16.mxu0 %v6384_v1  ;;  %v8490_v27 = vld [vmem:[%s10476_s2 + $0x18] sm:$0xff]   ;;  %v8493_v16 = vld [vmem:[%s10479_s3 + $0x8] sm:$0xff]   ;;  %s10088_s2 = scalar_lea.vmem %s8817_s4, %s10481_s0  ;;  %s7711_s0 = sld [smem:[#allocation2 + $0x202]] }
 0xc81   : > { %v6374_v52 = vadd.f32 %v6366_v6, %v9342_v37  ;;  %v8622_v37 = vmov 0.0   ;;  %v8491_v6 = vld [vmem:[%s10479_s3] sm:$0xff]  }
 0xc82   : > { %v6372_v30 = vadd.f32 %v6364_v60, %v9347_v45  ;;  %v8499_v45 = vld [vmem:[%s10471_s26 + $0x50] sm:$0xff]   ;;  %v8495_v60 = vld [vmem:[%s10479_s3 + $0x18] sm:$0xff]  }
 0xc83   : > { %8155 = vmatpush3.bf16.msra.mxu0 %v6384_v1  ;;  %v6386_v29 = vpack.c.bf16 %v6374_v52, %v6373_v13  ;;  %7560 = vmatmul.mubr.msk.bf16.vlgmr.msra.gmra.mrb[112].mxu1 %vm2727_vm5, %v8499_v45  ;;  %v8492_v13 = vld [vmem:[%s10478_s5] sm:$0xff]   ;;  %v8510_v45 = vld [vmem:[%s10471_s26 + $0xa8] sm:$0xff]   ;;  %s10480_s5 = sld [smem:[#allocation16_spill]] }
 0xc84   : > { %v6385_v19 = vpack.c.bf16 %v6372_v30, %v6371_v24  ;;  %4671 = vmatprep.mubr.bf16.mxu1 %v10467_v57  ;;  %v8494_v24 = vld [vmem:[%s10479_s3 + $0x10] sm:$0xff]   ;;  %v8496_v52 = vld [vmem:[%s10479_s3 + $0x20] sm:$0xff]   ;;  %v8497_v30 = vld [vmem:[%s10479_s3 + $0x28] sm:$0xff]  }
 0xc86   : > { %8156 = vmatprep.subr.bf16.mxu0 %v6385_v19 }
 0xc87   : > { %8157 = vmatpush3.bf16.msra.mxu0 %v6385_v19  ;;  %v8506_v19 = vld [vmem:[%s10471_s26 + $0x88] sm:$0xff]  }
 0xc88   : > { %8158 = vmatprep.subr.bf16.mxu0 %v6386_v29 }
 0xc8b   : > { %8159 = vmatpush3.bf16.msra.mxu0 %v6386_v29  ;;  %7561 = vmatmul.mubr.msk.bf16.gmra.mrb[116].mxu1 %vm2727_vm5, %v8500_v47  ;;  %v8498_v29 = vld [vmem:[%s10479_s3 + $0x30] ss:$0 sps:$4 sm:$0xff]  }
 0xc8c   : > { %8168 = vmatprep.subr.bf16.mxu0 %v8622_v37  ;;  %4681 = vmatprep.mubr.bf16.mxu1 %v10467_v57  ;;  %v8511_v47 = vld [vmem:[%s10471_s26 + $0xb0] sm:$0xff]  }
 0xc8e   : > { %8161 = vmatmul.mubr.msk.bf16.vlgmr.msra.gmra.mrb[144].mxu0 %vm2727_vm5, %v8488_v15  ;;  %v8507_v15 = vld [vmem:[%s10471_s26 + $0x90] sm:$0xff]  }
 0xc8f   : > { %8164 = vmatprep.mubr.msk.bf16.mxu0 %vm2727_vm5, %v8489_v41  ;;  %v8508_v41 = vld [vmem:[%s10471_s26 + $0x98] sm:$0xff]  }
 0xc93   : > { %7562 = vmatmul.mubr.msk.bf16.gmra.mrb[120].mxu1 %vm2727_vm5, %v8501_v7  ;;  %v8512_v7 = vld [vmem:[%s10471_s26 + $0xb8] sm:$0xff]  }
 0xc94   : > { %4691 = vmatprep.mubr.bf16.mxu1 %v10467_v57 }
 0xc96   : > { %8165 = vmatmul.mubr.msk.bf16.gmra.mrb[148].mxu0 %vm2727_vm5, %v8490_v27  ;;  %v8509_v27 = vld [vmem:[%s10471_s26 + $0xa0] sm:$0xff]  }
 0xc97   : > { %8176 = vmatprep.mubr.msk.bf16.mxu0 %vm8623_vm9, %v8622_v37 }
 0xc9b   : > { %7563 = vmatmul.mubr.msk.bf16.gmra.mrb[124].mxu1 %vm2727_vm5, %v8502_v48  ;;  %v8513_v48 = vld [vmem:[%s10471_s26 + $0xc0] sm:$0xff]  }
 0xc9c   : > { %4701 = vmatprep.mubr.bf16.mxu1 %v10467_v57 }
 0xca3   : > { %7564 = vmatmul.mubr.msk.bf16.gmra.mrb[128].mxu1 %vm2727_vm5, %v8503_v53  ;;  %v8515_v53 = vld [vmem:[%s10471_s26 + $0xd0] sm:$0xff]  }
 0xca4   : > { %4711 = vmatprep.mubr.bf16.mxu1 %v10467_v57 }
 0xcab   : > { %7565 = vmatmul.mubr.msk.bf16.gmra.mrb[132].mxu1 %vm2727_vm5, %v8504_v17 }
 0xcac   : > { %4721 = vmatprep.mubr.bf16.mxu1 %v10467_v57 }
 0xcb3   : > { %7566 = vmatmul.mubr.msk.bf16.gmra.mrb[136].mxu1 %vm2727_vm5, %v8505_v38 }
 0xcb4   : > { %4731 = vmatprep.mubr.bf16.mxu1 %v10467_v57 }
 0xcbb   : > { %7567 = vmatmul.mubr.msk.bf16.gmra.mrb[140].mxu1 %vm2727_vm5, %v8506_v19  ;;  %v8528_v19 = vld [vmem:[%s10471_s26 + $0x118] sm:$0xff]  }
 0xcbc   : > { %4741 = vmatprep.mubr.bf16.mxu1 %v10467_v57 }
 0xcc3   : > { %7568 = vmatmul.mubr.msk.bf16.gmra.mrb[144].mxu1 %vm2727_vm5, %v8507_v15 }
 0xcc4   : > { %4751 = vmatprep.mubr.bf16.mxu1 %v10467_v57 }
 0xccb   : > { %7569 = vmatmul.mubr.msk.bf16.gmra.mrb[148].mxu1 %vm2727_vm5, %v8508_v41 }
 0xccc   : > { %4761 = vmatprep.mubr.bf16.mxu1 %v10467_v57 }
 0xcd3   : > { %7570 = vmatmul.mubr.msk.bf16.gmra.mrb[152].mxu1 %vm2727_vm5, %v8509_v27 }
 0xcd4   : > { %4771 = vmatprep.mubr.bf16.mxu1 %v10467_v57 }
 0xcdb   : > { %7571 = vmatmul.mubr.msk.bf16.gmra.mrb[156].mxu1 %vm2727_vm5, %v8510_v45 }
 0xcdc   : > { %4781 = vmatprep.mubr.bf16.mxu1 %v10467_v57 }
 0xce3   : > { %7572 = vmatmul.mubr.msk.bf16.gmra.mrb[160].mxu1 %vm2727_vm5, %v8511_v47  ;;  %v8529_v47 = vld [vmem:[%s10471_s26 + $0x120] sm:$0xff]  }
 0xce4   : > { %4791 = vmatprep.mubr.bf16.mxu1 %v10467_v57 }
 0xceb   : > { %7573 = vmatmul.mubr.msk.bf16.gmra.mrb[164].mxu1 %vm2727_vm5, %v8512_v7 }
 0xcec   : > { %4801 = vmatprep.mubr.bf16.mxu1 %v10467_v57 }
 0xcf3   : > { %7574 = vmatmul.mubr.msk.bf16.gmra.mrb[168].mxu1 %vm2727_vm5, %v8513_v48 }
 0xcf4   : > { %4811 = vmatprep.mubr.bf16.mxu1 %v10467_v57 }
 0xd56   : > { %v4663_v17 = vpop.f32.mrb[112].mxu1 }
 0xd57   : > { %5190 = vst [vmem:[%s9736_s1 + $0x140] sm:$0xff] %v4663_v17 }
 0xd61   : > { %v8162_v51 = vpop.f32.mrb[144].mxu0 }
 0xd62   : > { %v6510_v55 = vadd.f32 %v8162_v51, %v6408_v11  ;;  %v6501_v36 = vpop.f32.mrb[145].mxu0  ;;  %v8518_v11 = vld [vmem:[%s10471_s26 + $0xd8] sm:$0xff]   ;;  %v4665_v51 = vpop.f32.mrb[113].mxu1 }
 0xd63   : > { %v6502_v12 = vadd.f32 %v6501_v36, %v6398_v8  ;;  %v8163_v9 = vpop.f32.mrb[146].mxu0  ;;  %v8514_v8 = vld [vmem:[%s10471_s26 + $0xc8] sm:$0xff]   ;;  %5191 = vst [vmem:[%s9736_s1 + $0x148] sm:$0xff] %v4665_v51 }
 0xd64   : > { %v6513_v25 = vadd.f32 %v8163_v9, %v6413_v14  ;;  %v6504_v21 = vpop.f32.mrb[147].mxu0  ;;  %v6534_v34 = vmax.f32 %v6510_v55, 0.0  ;;  %7575 = vmatmul.mubr.msk.bf16.gmra.mrb[172].mxu1 %vm2727_vm5, %v8514_v8  ;;  %v8521_v14 = vld [vmem:[%s10471_s26 + $0xe0] sm:$0xff]   ;;  %v4667_v55 = vpop.f32.mrb[114].mxu1 }
 0xd65   : > { %v6505_v56 = vadd.f32 %v6504_v21, %v6403_v61  ;;  %v6532_v26 = vmax.f32 %v6502_v12, 0.0  ;;  %4821 = vmatprep.mubr.bf16.mxu1 %v10467_v57  ;;  %v8516_v61 = vld [vmem:[%s10480_s5] sm:$0xff]   ;;  %5192 = vst [vmem:[%s9736_s1 + $0x150] sm:$0xff] %v4667_v55  ;;  %v4669_v36 = vpop.f32.mrb[115].mxu1  ;;  %v8522_v12 = vld [vmem:[%s10471_s26 + $0xe8] sm:$0xff]   ;;  %v8531_v55 = vld [vmem:[%s10471_s26 + $0x130] sm:$0xff]  }
 0xd66   : > { %v6535_v10 = vmax.f32 %v6513_v25, 0.0  ;;  %5193 = vst [vmem:[%s9736_s1 + $0x158] sm:$0xff] %v4669_v36 }
 0xd67   : > { %v6533_v5 = vmax.f32 %v6505_v56, 0.0 }
 0xd68   : > { %v6554_v28 = vpack.c.bf16 %v6535_v10, %v6534_v34 }
 0xd69   : > { %v6553_v23 = vpack.c.bf16 %v6533_v5, %v6532_v26  ;;  %v8166_v59 = vpop.f32.mrb[148].mxu0  ;;  %v8523_v5 = vld [vmem:[%s10471_s26 + $0xf0] sm:$0xff]  }
 0xd6a   : > { %v6526_v62 = vadd.f32 %v8166_v59, %v6428_v32  ;;  %v6517_v58 = vpop.f32.mrb[149].mxu0 }
 0xd6b   : > { %v6518_v54 = vadd.f32 %v6517_v58, %v6418_v35  ;;  %v8167_v63 = vpop.f32.mrb[150].mxu0  ;;  %8169 = vmatpush3.bf16.msra.mxu0 %v6553_v23  ;;  %v4673_v35 = vpop.f32.mrb[116].mxu1 }
 0xd6c   : > { %v6529_v0 = vadd.f32 %v8167_v63, %v6433_v31  ;;  %v6520_v2 = vpop.f32.mrb[151].mxu0  ;;  %8170 = vmatprep.subr.bf16.mxu0 %v8622_v37  ;;  %v6538_v50 = vmax.f32 %v6526_v62, 0.0  ;;  %7576 = vmatmul.mubr.msk.bf16.gmra.mrb[176].mxu1 %vm2727_vm5, %v8515_v53  ;;  %5194 = vst [vmem:[%s9736_s1 + $0x160] sm:$0xff] %v4673_v35  ;;  %v4675_v9 = vpop.f32.mrb[117].mxu1 }
 0xd6d   : > { %v6521_v1 = vadd.f32 %v6520_v2, %v6423_v40  ;;  %v6536_v42 = vmax.f32 %v6518_v54, 0.0  ;;  %4831 = vmatprep.mubr.bf16.mxu1 %v10467_v57  ;;  %5195 = vst [vmem:[%s9736_s1 + $0x168] sm:$0xff] %v4675_v9  ;;  %v4677_v25 = vpop.f32.mrb[118].mxu1  ;;  %v8524_v54 = vld [vmem:[%s10471_s26 + $0xf8] sm:$0xff]  }
 0xd6e   : > { %v6539_v20 = vmax.f32 %v6529_v0, 0.0  ;;  %5196 = vst [vmem:[%s9736_s1 + $0x170] sm:$0xff] %v4677_v25  ;;  %v4679_v21 = vpop.f32.mrb[119].mxu1  ;;  %v8532_v25 = vld [vmem:[%s10471_s26 + $0x138] sm:$0xff]  }
 0xd6f   : > { %v6537_v43 = vmax.f32 %v6521_v1, 0.0  ;;  %8171 = vmatpush3.bf16.msra.mxu0 %v6554_v28  ;;  %5197 = vst [vmem:[%s9736_s1 + $0x178] sm:$0xff] %v4679_v21  ;;  %v4683_v40 = vpop.f32.mrb[120].mxu1 }
 0xd70   : > { %v6556_v18 = vpack.c.bf16 %v6539_v20, %v6538_v50  ;;  %8172 = vmatprep.subr.bf16.mxu0 %v8622_v37  ;;  %5198 = vst [vmem:[%s9736_s1 + $0x180] sm:$0xff] %v4683_v40  ;;  %v4685_v56 = vpop.f32.mrb[121].mxu1 }
 0xd71   : > { %v6555_v33 = vpack.c.bf16 %v6537_v43, %v6536_v42  ;;  %5199 = vst [vmem:[%s9736_s1 + $0x188] sm:$0xff] %v4685_v56  ;;  %v4687_v34 = vpop.f32.mrb[122].mxu1  ;;  %v8525_v43 = vld [vmem:[%s10471_s26 + $0x100] sm:$0xff]  }
 0xd72   : > { %5200 = vst [vmem:[%s9736_s1 + $0x190] sm:$0xff] %v4687_v34  ;;  %v4689_v10 = vpop.f32.mrb[123].mxu1 }
 0xd73   : > { %8173 = vmatpush3.bf16.msra.mxu0 %v6555_v33  ;;  %5201 = vst [vmem:[%s9736_s1 + $0x198] sm:$0xff] %v4689_v10  ;;  %v4693_v26 = vpop.f32.mrb[124].mxu1  ;;  %v6826_v10 = vstv %s7711_s0  ;;  %s10484_s0 = smul.u32 40, %s10486_s16 }
 0xd74   : > { %8174 = vmatprep.subr.bf16.mxu0 %v8622_v37  ;;  %7577 = vmatmul.mubr.msk.bf16.gmra.mrb[180].mxu1 %vm2727_vm5, %v8518_v11  ;;  %5202 = vst [vmem:[%s9736_s1 + $0x1a0] sm:$0xff] %v4693_v26  ;;  %v8533_v26 = vld [vmem:[%s10471_s26 + $0x140] sm:$0xff]  }
 0xd75   : > { %4841 = vmatprep.mubr.bf16.mxu1 %v10467_v57 }
 0xd77   : > { %8175 = vmatpush3.bf16.msra.mxu0 %v6556_v18 }
 0xd78   : > { %8204 = vmatprep.subr.bf16.mxu0 %v8492_v13 }
 0xd7a   : > { %8177 = vmatmul.mubr.msk.bf16.vlgmr.msra.gmra.mrb[152].mxu0 %vm2727_vm5, %v8491_v6 }
 0xd7b   : > { %8205 = vmatpush3.bf16.msra.mxu0 %v8492_v13  ;;  %8180 = vmatprep.mubr.msk.bf16.mxu0 %vm8623_vm9, %v8622_v37 }
 0xd7c   : > { %7578 = vmatmul.mubr.msk.bf16.gmra.mrb[184].mxu1 %vm2727_vm5, %v8521_v14 }
 0xd7d   : > { %4851 = vmatprep.mubr.bf16.mxu1 %v10467_v57 }
 0xd82   : > { %8181 = vmatmul.mubr.msk.bf16.gmra.mrb[156].mxu0 %vm2727_vm5, %v8493_v16 }
 0xd83   : > { %8184 = vmatprep.mubr.msk.bf16.mxu0 %vm8623_vm9, %v8622_v37 }
 0xd84   : > { %7579 = vmatmul.mubr.msk.bf16.gmra.mrb[188].mxu1 %vm2727_vm5, %v8522_v12 }
 0xd85   : > { %4861 = vmatprep.mubr.bf16.mxu1 %v10467_v57 }
 0xd8a   : > { %8185 = vmatmul.mubr.msk.bf16.gmra.mrb[160].mxu0 %vm2727_vm5, %v8494_v24  ;;  %v8527_v24 = vld [vmem:[%s10471_s26 + $0x110] sm:$0xff]  }
 0xd8b   : > { %8188 = vmatprep.mubr.msk.bf16.mxu0 %vm8623_vm9, %v8622_v37 }
 0xd8c   : > { %7580 = vmatmul.mubr.msk.bf16.gmra.mrb[192].mxu1 %vm2727_vm5, %v8523_v5 }
 0xd8d   : > { %4871 = vmatprep.mubr.bf16.mxu1 %v10467_v57 }
 0xd92   : > { %8189 = vmatmul.mubr.msk.bf16.gmra.mrb[164].mxu0 %vm2727_vm5, %v8495_v60 }
 0xd93   : > { %8192 = vmatprep.mubr.msk.bf16.mxu0 %vm8623_vm9, %v8622_v37 }
 0xd94   : > { %7581 = vmatmul.mubr.msk.bf16.gmra.mrb[196].mxu1 %vm2727_vm5, %v8524_v54 }
 0xd95   : > { %4881 = vmatprep.mubr.bf16.mxu1 %v10467_v57 }
 0xd9a   : > { %8193 = vmatmul.mubr.msk.bf16.gmra.mrb[168].mxu0 %vm2727_vm5, %v8496_v52 }
 0xd9b   : > { %8196 = vmatprep.mubr.msk.bf16.mxu0 %vm8623_vm9, %v8622_v37 }
 0xd9c   : > { %7582 = vmatmul.mubr.msk.bf16.gmra.mrb[200].mxu1 %vm2727_vm5, %v8525_v43 }
 0xd9d   : > { %4891 = vmatprep.mubr.bf16.mxu1 %v10467_v57 }
 0xda2   : > { %8197 = vmatmul.mubr.msk.bf16.gmra.mrb[172].mxu0 %vm2727_vm5, %v8497_v30 }
 0xda3   : > { %8200 = vmatprep.mubr.msk.bf16.mxu0 %vm8623_vm9, %v8622_v37 }
 0xdaa   : > { %8201 = vmatmul.mubr.msk.bf16.gmra.mrb[176].mxu0 %vm2727_vm5, %v8498_v29 }
 0xdab   : > { %8206 = vmatprep.mubr.msk.bf16.mxu0 %vm3115_vm7, %v6553_v23 }
 0xdb2   : > { %8207 = vmatmul.mubr.msk.bf16.vlgmr.msra.gmra.mrb[180].mxu0 %vm3115_vm7, %v6554_v28  ;;  %v4695_v28 = vpop.f32.mrb[125].mxu1 }
 0xdb3   : > { %8210 = vmatprep.mubr.msk.bf16.mxu0 %vm3115_vm7, %v6555_v33  ;;  %5203 = vst [vmem:[%s9736_s1 + $0x1a8] sm:$0xff] %v4695_v28  ;;  %v4697_v38 = vpop.f32.mrb[126].mxu1 }
 0xdb4   : > { %5204 = vst [vmem:[%s9736_s1 + $0x1b0] sm:$0xff] %v4697_v38  ;;  %v4699_v32 = vpop.f32.mrb[127].mxu1 }
 0xdb5   : > { %5205 = vst [vmem:[%s9736_s1 + $0x1b8] sm:$0xff] %v4699_v32  ;;  %v4703_v23 = vpop.f32.mrb[128].mxu1 }
 0xdb6   : > { %5206 = vst [vmem:[%s9736_s1 + $0x1c0] sm:$0xff] %v4703_v23  ;;  %v4705_v59 = vpop.f32.mrb[129].mxu1 }
 0xdb7   : > { %5207 = vst [vmem:[%s9736_s1 + $0x1c8] sm:$0xff] %v4705_v59  ;;  %v4707_v62 = vpop.f32.mrb[130].mxu1 }
 0xdb8   : > { %5208 = vst [vmem:[%s9736_s1 + $0x1d0] sm:$0xff] %v4707_v62  ;;  %v4709_v58 = vpop.f32.mrb[131].mxu1 }
 0xdb9   : > { %5209 = vst [vmem:[%s9736_s1 + $0x1d8] sm:$0xff] %v4709_v58  ;;  %v4713_v31 = vpop.f32.mrb[132].mxu1 }
 0xdba   : > { %8211 = vmatmul.mubr.msk.bf16.gmra.mrb[184].mxu0 %vm3115_vm7, %v6556_v18  ;;  %5210 = vst [vmem:[%s9736_s1 + $0x1e0] sm:$0xff] %v4713_v31  ;;  %v4715_v63 = vpop.f32.mrb[133].mxu1  ;;  %v8526_v18 = vld [vmem:[%s10471_s26 + $0x108] sm:$0xff]  }
 0xdbb   : > { %8222 = vmatprep.mubr.msk.bf16.mxu0 %vm2727_vm5, %v8516_v61  ;;  %5211 = vst [vmem:[%s9736_s1 + $0x1e8] sm:$0xff] %v4715_v63  ;;  %v4717_v0 = vpop.f32.mrb[134].mxu1  ;;  %7583 = vmatmul.mubr.msk.bf16.gmra.mrb[204].mxu1 %vm2727_vm5, %v8526_v18  ;;  %v8530_v61 = vld [vmem:[%s10471_s26 + $0x128] sm:$0xff]  }
 0xdbc   : > { %5212 = vst [vmem:[%s9736_s1 + $0x1f0] sm:$0xff] %v4717_v0  ;;  %v4719_v2 = vpop.f32.mrb[135].mxu1  ;;  %4901 = vmatprep.mubr.bf16.mxu1 %v10467_v57 }
 0xdbd   : > { %5213 = vst [vmem:[%s9736_s1 + $0x1f8] sm:$0xff] %v4719_v2  ;;  %v4723_v1 = vpop.f32.mrb[136].mxu1 }
 0xdbe   : > { %5214 = vst [vmem:[%s9736_s1 + $0x200] sm:$0xff] %v4723_v1  ;;  %v4725_v50 = vpop.f32.mrb[137].mxu1  ;;  %v8534_v1 = vld [vmem:[%s10471_s26 + $0x148] sm:$0xff]  }
 0xdbf   : > { %5215 = vst [vmem:[%s9736_s1 + $0x208] sm:$0xff] %v4725_v50  ;;  %v4727_v20 = vpop.f32.mrb[138].mxu1 }
 0xdc0   : > { %5216 = vst [vmem:[%s9736_s1 + $0x210] sm:$0xff] %v4727_v20  ;;  %v4729_v42 = vpop.f32.mrb[139].mxu1 }
 0xdc1   : > { %5217 = vst [vmem:[%s9736_s1 + $0x218] sm:$0xff] %v4729_v42 }
 0xdc3   : > { %7584 = vmatmul.mubr.msk.bf16.gmra.mrb[208].mxu1 %vm2727_vm5, %v8527_v24 }
 0xdc4   : > { %4911 = vmatprep.mubr.bf16.mxu1 %v10467_v57 }
 0xdcb   : > { %7585 = vmatmul.mubr.msk.bf16.gmra.mrb[212].mxu1 %vm2727_vm5, %v8528_v19  ;;  %v4733_v19 = vpop.f32.mrb[140].mxu1 }
 0xdcc   : > { %4921 = vmatprep.mubr.bf16.mxu1 %v10467_v57  ;;  %5218 = vst [vmem:[%s9736_s1 + $0x220] sm:$0xff] %v4733_v19 }
 0xdd3   : > { %7586 = vmatmul.mubr.msk.bf16.gmra.mrb[216].mxu1 %vm2727_vm5, %v8529_v47 }
 0xdd4   : > { %4931 = vmatprep.mubr.bf16.mxu1 %v10467_v57 }
 0xddb   : > { %7587 = vmatmul.mubr.msk.bf16.gmra.mrb[220].mxu1 %vm2727_vm5, %v8530_v61 }
 0xddc   : > { %4941 = vmatprep.mubr.bf16.mxu1 %v10467_v57 }
 0xde3   : > { %7588 = vmatmul.mubr.msk.bf16.gmra.mrb[224].mxu1 %vm2727_vm5, %v8531_v55 }
 0xde4   : > { %4951 = vmatprep.mubr.bf16.mxu1 %v10467_v57 }
 0xdeb   : > { %7589 = vmatmul.mubr.msk.bf16.gmra.mrb[228].mxu1 %vm2727_vm5, %v8532_v25 }
 0xdec   : > { %4961 = vmatprep.mubr.bf16.mxu1 %v10467_v57 }
 0xdf3   : > { %7590 = vmatmul.mubr.msk.bf16.gmra.mrb[232].mxu1 %vm2727_vm5, %v8533_v26 }
 0xdf4   : > { %4971 = vmatprep.mubr.bf16.mxu1 %v10467_v57 }
 0xdfb   : > { %7591 = vmatmul.mubr.msk.bf16.gmra.mrb[236].mxu1 %vm2727_vm5, %v8534_v1 }
 0xdfc   : > { %4981 = vmatprep.mubr.bf16.mxu1 %v10467_v57 }
 0xe4d   : > { %v6645_v33 = vpop.f32.mrb[152].mxu0 }
 0xe4e   : > { %6699 = vst.msk [vmem:[%s10088_s2] sm:$0xff] %vm3115_vm7, %v6645_v33  ;;  %v8178_v13 = vpop.f32.mrb[153].mxu0 }
 0xe4f   : > { %v6648_v6 = vpop.f32.mrb[154].mxu0 }
 0xe50   : > { %6700 = vst.msk [vmem:[%s10088_s2 + $0x8] sm:$0xff] %vm3115_vm7, %v6648_v6  ;;  %v8179_v16 = vpop.f32.mrb[155].mxu0 }
 0xe51   : > { %v10482_v16 = vld [vmem:[#allocation28_spill] sm:$0xff] }
 0xe55   : > { %v6653_v60 = vpop.f32.mrb[156].mxu0 }
 0xe56   : > { %6701 = vst.msk [vmem:[%s10088_s2 + $0x10] sm:$0xff] %vm3115_vm7, %v6653_v60  ;;  %v8182_v52 = vpop.f32.mrb[157].mxu0  ;;  %v8535_v60 = vld [vmem:[%s10471_s26 + $0x150] sm:$0xff]  }
 0xe57   : > { %v6656_v30 = vpop.f32.mrb[158].mxu0  ;;  %7592 = vmatmul.mubr.msk.bf16.gmra.mrb[240].mxu1 %vm2727_vm5, %v8535_v60 }
 0xe58   : > { %6702 = vst.msk [vmem:[%s10088_s2 + $0x18] sm:$0xff] %vm3115_vm7, %v6656_v30  ;;  %v8183_v29 = vpop.f32.mrb[159].mxu0  ;;  %4991 = vmatprep.mubr.bf16.mxu1 %v10467_v57  ;;  %v8536_v30 = vld [vmem:[%s10471_s26 + $0x158] sm:$0xff]  }
 0xe59   : > { %v8520_v29 = vld [vmem:[%s10480_s5 + $0x18] sm:$0xff]  }
 0xe5d   : > { %v6661_v15 = vpop.f32.mrb[160].mxu0 }
 0xe5e   : > { %6703 = vst.msk [vmem:[%s10088_s2 + $0x20] sm:$0xff] %vm3115_vm7, %v6661_v15  ;;  %v8186_v41 = vpop.f32.mrb[161].mxu0  ;;  %v4735_v15 = vpop.f32.mrb[141].mxu1 }
 0xe5f   : > { %v6664_v27 = vpop.f32.mrb[162].mxu0  ;;  %7593 = vmatmul.mubr.msk.bf16.gmra.mrb[244].mxu1 %vm2727_vm5, %v8536_v30  ;;  %v8537_v41 = vld [vmem:[%s10471_s26 + $0x160] sm:$0xff]   ;;  %5219 = vst [vmem:[%s9736_s1 + $0x228] sm:$0xff] %v4735_v15 }
 0xe60   : > { %6704 = vst.msk [vmem:[%s10088_s2 + $0x28] sm:$0xff] %vm3115_vm7, %v6664_v27  ;;  %v8187_v45 = vpop.f32.mrb[163].mxu0  ;;  %5001 = vmatprep.mubr.bf16.mxu1 %v10467_v57  ;;  %v4737_v27 = vpop.f32.mrb[142].mxu1 }
 0xe61   : > { %5220 = vst [vmem:[%s9736_s1 + $0x230] sm:$0xff] %v4737_v27  ;;  %v4739_v45 = vpop.f32.mrb[143].mxu1 }
 0xe62   : > { %5221 = vst [vmem:[%s9736_s1 + $0x238] sm:$0xff] %v4739_v45  ;;  %v4743_v47 = vpop.f32.mrb[144].mxu1 }
 0xe63   : > { %5222 = vst [vmem:[%s9736_s1 + $0x240] sm:$0xff] %v4743_v47  ;;  %v8551_v47 = vld [vmem:[%s10471_s26 + $0x1c8] sm:$0xff]  }
 0xe65   : > { %v6669_v7 = vpop.f32.mrb[164].mxu0 }
 0xe66   : > { %6705 = vst.msk [vmem:[%s10088_s2 + $0x30] sm:$0xff] %vm3115_vm7, %v6669_v7  ;;  %v8190_v48 = vpop.f32.mrb[165].mxu0  ;;  %v4745_v7 = vpop.f32.mrb[145].mxu1 }
 0xe67   : > { %v6672_v8 = vpop.f32.mrb[166].mxu0  ;;  %7594 = vmatmul.mubr.msk.bf16.gmra.mrb[248].mxu1 %vm2727_vm5, %v8537_v41  ;;  %v8538_v48 = vld [vmem:[%s10471_s26 + $0x168] sm:$0xff]   ;;  %5223 = vst [vmem:[%s9736_s1 + $0x248] sm:$0xff] %v4745_v7  ;;  %v8549_v41 = vld [vmem:[%s10471_s26 + $0x1c0] sm:$0xff]  }
 0xe68   : > { %6706 = vst.msk [vmem:[%s10088_s2 + $0x38] sm:$0xff] %vm3115_vm7, %v6672_v8  ;;  %v8191_v53 = vpop.f32.mrb[167].mxu0  ;;  %5011 = vmatprep.mubr.bf16.mxu1 %v10467_v57  ;;  %v4747_v8 = vpop.f32.mrb[146].mxu1 }
 0xe69   : > { %5224 = vst [vmem:[%s9736_s1 + $0x250] sm:$0xff] %v4747_v8  ;;  %v4749_v53 = vpop.f32.mrb[147].mxu1 }
 0xe6a   : > { %5225 = vst [vmem:[%s9736_s1 + $0x258] sm:$0xff] %v4749_v53  ;;  %v4753_v61 = vpop.f32.mrb[148].mxu1 }
 0xe6b   : > { %5226 = vst [vmem:[%s9736_s1 + $0x260] sm:$0xff] %v4753_v61  ;;  %v8553_v61 = vld [vmem:[%s10471_s26 + $0x1d0] ss:$0 sps:$4 sm:$0xff]  }
 0xe6d   : > { %v6677_v11 = vpop.f32.mrb[168].mxu0 }
 0xe6e   : > { %6707 = vst.msk [vmem:[%s10088_s2 + $0x40] sm:$0xff] %vm3115_vm7, %v6677_v11  ;;  %v8194_v14 = vpop.f32.mrb[169].mxu0  ;;  %v4755_v11 = vpop.f32.mrb[149].mxu1 }
 0xe6f   : > { %v6680_v17 = vpop.f32.mrb[170].mxu0  ;;  %7595 = vmatmul.mubr.msk.bf16.gmra.mrb[252].mxu1 %vm2727_vm5, %v8538_v48  ;;  %v8539_v14 = vld [vmem:[%s10471_s26 + $0x170] sm:$0xff]   ;;  %5227 = vst [vmem:[%s9736_s1 + $0x268] sm:$0xff] %v4755_v11 }
 0xe70   : > { %6708 = vst.msk [vmem:[%s10088_s2 + $0x48] sm:$0xff] %vm3115_vm7, %v6680_v17  ;;  %v8195_v51 = vpop.f32.mrb[171].mxu0  ;;  %5021 = vmatprep.mubr.bf16.mxu1 %v10467_v57  ;;  %v4757_v17 = vpop.f32.mrb[150].mxu1 }
 0xe71   : > { %5228 = vst [vmem:[%s9736_s1 + $0x270] sm:$0xff] %v4757_v17  ;;  %v4759_v51 = vpop.f32.mrb[151].mxu1 }
 0xe72   : > { %5229 = vst [vmem:[%s9736_s1 + $0x278] sm:$0xff] %v4759_v51  ;;  %v4763_v55 = vpop.f32.mrb[152].mxu1 }
 0xe73   : > { %5230 = vst [vmem:[%s9736_s1 + $0x280] sm:$0xff] %v4763_v55 }
 0xe75   : > { %v6685_v36 = vpop.f32.mrb[172].mxu0 }
 0xe76   : > { %6709 = vst.msk [vmem:[%s10088_s2 + $0x50] sm:$0xff] %vm3115_vm7, %v6685_v36  ;;  %v8198_v35 = vpop.f32.mrb[173].mxu0  ;;  %v4765_v36 = vpop.f32.mrb[153].mxu1 }
 0xe77   : > { %v6688_v12 = vpop.f32.mrb[174].mxu0  ;;  %7596 = vmatmul.mubr.msk.bf16.gmra.mrb[0].mxu1 %vm2727_vm5, %v8539_v14  ;;  %v8540_v35 = vld [vmem:[%s10471_s26 + $0x178] sm:$0xff]   ;;  %5231 = vst [vmem:[%s9736_s1 + $0x288] sm:$0xff] %v4765_v36 }
 0xe78   : > { %6710 = vst.msk [vmem:[%s10088_s2 + $0x58] sm:$0xff] %vm3115_vm7, %v6688_v12  ;;  %v8199_v9 = vpop.f32.mrb[175].mxu0  ;;  %5031 = vmatprep.mubr.bf16.mxu1 %v10467_v57  ;;  %v4767_v12 = vpop.f32.mrb[154].mxu1 }
 0xe79   : > { %5232 = vst [vmem:[%s9736_s1 + $0x290] sm:$0xff] %v4767_v12  ;;  %v4769_v9 = vpop.f32.mrb[155].mxu1 }
 0xe7a   : > { %5233 = vst [vmem:[%s9736_s1 + $0x298] sm:$0xff] %v4769_v9  ;;  %v4773_v25 = vpop.f32.mrb[156].mxu1 }
 0xe7b   : > { %5234 = vst [vmem:[%s9736_s1 + $0x2a0] sm:$0xff] %v4773_v25 }
 0xe7d   : > { %v6693_v21 = vpop.f32.mrb[176].mxu0 }
 0xe7e   : > { %6711 = vst.msk [vmem:[%s10088_s2 + $0x60] sm:$0xff] %vm3115_vm7, %v6693_v21  ;;  %v8202_v40 = vpop.f32.mrb[177].mxu0  ;;  %v4775_v21 = vpop.f32.mrb[157].mxu1  ;;  %s10483_s2 = sld [smem:[#allocation21_spill]] }
 0xe7f   : > { %v6696_v56 = vpop.f32.mrb[178].mxu0  ;;  %7597 = vmatmul.mubr.msk.bf16.gmra.mrb[4].mxu1 %vm2727_vm5, %v8540_v35  ;;  %v8541_v40 = vld [vmem:[%s10471_s26 + $0x180] sm:$0xff]   ;;  %5235 = vst [vmem:[%s9736_s1 + $0x2a8] sm:$0xff] %v4775_v21 }
 0xe80   : > { %v8203_v34 = vpop.f32.mrb[179].mxu0  ;;  %5041 = vmatprep.mubr.bf16.mxu1 %v10467_v57  ;;  %v4777_v56 = vpop.f32.mrb[158].mxu1 }
 0xe81   : > { %5236 = vst [vmem:[%s9736_s1 + $0x2b0] sm:$0xff] %v4777_v56  ;;  %v4779_v34 = vpop.f32.mrb[159].mxu1 }
 0xe82   : > { %5237 = vst [vmem:[%s9736_s1 + $0x2b8] sm:$0xff] %v4779_v34 }
 0xe85   : > { %v8208_v5 = vpop.f32.mrb[180].mxu0 }
 0xe86   : > { %v6829_v28 = vmul.f32 %v8208_v5, %v6826_v10  ;;  %v6795_v38 = vpop.f32.mrb[181].mxu0  ;;  %v8542_v5 = vld [vmem:[%s10471_s26 + $0x188] sm:$0xff]  }
 0xe87   : > { %v6827_v32 = vmul.f32 %v6826_v10, %v6795_v38  ;;  %v8209_v23 = vpop.f32.mrb[182].mxu0  ;;  %7598 = vmatmul.mubr.msk.bf16.gmra.mrb[8].mxu1 %vm2727_vm5, %v8541_v40 }
 0xe88   : > { %v6837_v59 = vadd.f32 %v6829_v28, %v9094_v22  ;;  %v6830_v62 = vmul.f32 %v8209_v23, %v6826_v10  ;;  %v6798_v58 = vpop.f32.mrb[183].mxu0  ;;  %5051 = vmatprep.mubr.bf16.mxu1 %v10467_v57 }
 0xe89   : > { %v6835_v31 = vadd.f32 %v6827_v32, %v9096_v44  ;;  %v6828_v54 = vmul.f32 %v6826_v10, %v6798_v58 }
 0xe8a   : > { %v6838_v63 = vadd.f32 %v6830_v62, %v9098_v46 }
 0xe8b   : > { %v6836_v0 = vadd.f32 %v6828_v54, %v9101_v49 }
 0xe8c   : > { %v6852_v2 = vpack.c.bf16 %v6838_v63, %v6837_v59  ;;  %v8543_v59 = vld [vmem:[%s10471_s26 + $0x190] sm:$0xff]   ;;  %v8544_v63 = vld [vmem:[%s10471_s26 + $0x198] sm:$0xff]  }
 0xe8d   : > { %v8212_v50 = vpop.f32.mrb[184].mxu0  ;;  %v6851_v20 = vpack.c.bf16 %v6836_v0, %v6835_v31 }
 0xe8e   : > { %v6833_v42 = vmul.f32 %v8212_v50, %v6826_v10  ;;  %v6811_v43 = vpop.f32.mrb[185].mxu0 }
 0xe8f   : > { %v6831_v22 = vmul.f32 %v6826_v10, %v6811_v43  ;;  %v8213_v18 = vpop.f32.mrb[186].mxu0  ;;  %8214 = vmatprep.subr.bf16.mxu0 %v6851_v20  ;;  %7599 = vmatmul.mubr.msk.bf16.gmra.mrb[12].mxu1 %vm2727_vm5, %v8542_v5 }
 0xe90   : > { %v6841_v33 = vadd.f32 %v6833_v42, %v9107_v3  ;;  %v6834_v44 = vmul.f32 %v8213_v18, %v6826_v10  ;;  %v6814_v13 = vpop.f32.mrb[187].mxu0  ;;  %8215 = vmatpush3.bf16.msra.mxu0 %v6851_v20  ;;  %5061 = vmatprep.mubr.bf16.mxu1 %v10467_v57  ;;  %v8545_v20 = vld [vmem:[%s10471_s26 + $0x1a0] sm:$0xff]  }
 0xe91   : > { %v6839_v46 = vadd.f32 %v6831_v22, %v9110_v4  ;;  %v6832_v49 = vmul.f32 %v6826_v10, %v6814_v13  ;;  %8216 = vmatprep.subr.bf16.mxu0 %v6852_v2  ;;  %v8517_v4 = vld [vmem:[%s10480_s5 + $0x8] sm:$0xff]   ;;  %v4783_v10 = vpop.f32.mrb[160].mxu1 }
 0xe92   : > { %v6842_v6 = vadd.f32 %v6834_v44, %v9112_v39  ;;  %v8519_v39 = vld [vmem:[%s10480_s5 + $0x10] sm:$0xff]   ;;  %5238 = vst [vmem:[%s9736_s1 + $0x2c0] sm:$0xff] %v4783_v10  ;;  %v4785_v26 = vpop.f32.mrb[161].mxu1  ;;  %v8546_v13 = vld [vmem:[%s10471_s26 + $0x1a8] sm:$0xff]  }
 0xe93   : > { %v6840_v24 = vadd.f32 %v6832_v49, %v10482_v16  ;;  %5239 = vst [vmem:[%s9736_s1 + $0x2c8] sm:$0xff] %v4785_v26  ;;  %v4787_v28 = vpop.f32.mrb[162].mxu1 }
 0xe94   : > { %8217 = vmatpush3.bf16.msra.mxu0 %v6852_v2  ;;  %v6854_v3 = vpack.c.bf16 %v6842_v6, %v6841_v33  ;;  %5240 = vst [vmem:[%s9736_s1 + $0x2d0] sm:$0xff] %v4787_v28  ;;  %v4789_v38 = vpop.f32.mrb[163].mxu1 }
 0xe95   : > { %v6853_v52 = vpack.c.bf16 %v6840_v24, %v6839_v46  ;;  %5241 = vst [vmem:[%s9736_s1 + $0x2d8] sm:$0xff] %v4789_v38  ;;  %v4793_v32 = vpop.f32.mrb[164].mxu1  ;;  %v8547_v24 = vld [vmem:[%s10471_s26 + $0x1b0] sm:$0xff]  }
 0xe96   : > { %5242 = vst [vmem:[%s9736_s1 + $0x2e0] sm:$0xff] %v4793_v32  ;;  %v4795_v23 = vpop.f32.mrb[165].mxu1 }
 0xe97   : > { %8218 = vmatprep.subr.bf16.mxu0 %v6853_v52  ;;  %5243 = vst [vmem:[%s9736_s1 + $0x2e8] sm:$0xff] %v4795_v23  ;;  %v4797_v62 = vpop.f32.mrb[166].mxu1  ;;  %7600 = vmatmul.mubr.msk.bf16.gmra.mrb[16].mxu1 %vm2727_vm5, %v8543_v59 }
 0xe98   : > { %8219 = vmatpush3.bf16.msra.mxu0 %v6853_v52  ;;  %5244 = vst [vmem:[%s9736_s1 + $0x2f0] sm:$0xff] %v4797_v62  ;;  %v4799_v58 = vpop.f32.mrb[167].mxu1  ;;  %5071 = vmatprep.mubr.bf16.mxu1 %v10467_v57 }
 0xe99   : > { %8220 = vmatprep.subr.bf16.mxu0 %v6854_v3  ;;  %5245 = vst [vmem:[%s9736_s1 + $0x2f8] sm:$0xff] %v4799_v58  ;;  %v4803_v31 = vpop.f32.mrb[168].mxu1 }
 0xe9a   : > { %5246 = vst [vmem:[%s9736_s1 + $0x300] sm:$0xff] %v4803_v31  ;;  %v4805_v54 = vpop.f32.mrb[169].mxu1 }
 0xe9b   : > { %5247 = vst [vmem:[%s9736_s1 + $0x308] sm:$0xff] %v4805_v54  ;;  %v4807_v0 = vpop.f32.mrb[170].mxu1 }
 0xe9c   : > { %8221 = vmatpush3.bf16.msra.mxu0 %v6854_v3  ;;  %5248 = vst [vmem:[%s9736_s1 + $0x310] sm:$0xff] %v4807_v0  ;;  %v4809_v2 = vpop.f32.mrb[171].mxu1 }
 0xe9d   : > { %8230 = vmatprep.subr.bf16.mxu0 %v8622_v37  ;;  %5249 = vst [vmem:[%s9736_s1 + $0x318] sm:$0xff] %v4809_v2  ;;  %v4813_v1 = vpop.f32.mrb[172].mxu1 }
 0xe9e   : > { %5250 = vst [vmem:[%s9736_s1 + $0x320] sm:$0xff] %v4813_v1  ;;  %v4815_v50 = vpop.f32.mrb[173].mxu1 }
 0xe9f   : > { %8223 = vmatmul.mubr.msk.bf16.vlgmr.msra.gmra.mrb[188].mxu0 %vm2727_vm5, %v8517_v4  ;;  %7601 = vmatmul.mubr.msk.bf16.gmra.mrb[20].mxu1 %vm2727_vm5, %v8544_v63  ;;  %5251 = vst [vmem:[%s9736_s1 + $0x328] sm:$0xff] %v4815_v50  ;;  %v4817_v42 = vpop.f32.mrb[174].mxu1 }
 0xea0   : > { %8226 = vmatprep.mubr.msk.bf16.mxu0 %vm2727_vm5, %v8519_v39  ;;  %5081 = vmatprep.mubr.bf16.mxu1 %v10467_v57  ;;  %5252 = vst [vmem:[%s9736_s1 + $0x330] sm:$0xff] %v4817_v42  ;;  %v4819_v43 = vpop.f32.mrb[175].mxu1  ;;  %v8548_v39 = vld [vmem:[%s10471_s26 + $0x1b8] sm:$0xff]  }
 0xea1   : > { %5253 = vst [vmem:[%s9736_s1 + $0x338] sm:$0xff] %v4819_v43  ;;  %v4823_v22 = vpop.f32.mrb[176].mxu1 }
 0xea2   : > { %5254 = vst [vmem:[%s9736_s1 + $0x340] sm:$0xff] %v4823_v22  ;;  %v4825_v18 = vpop.f32.mrb[177].mxu1 }
 0xea3   : > { %5255 = vst [vmem:[%s9736_s1 + $0x348] sm:$0xff] %v4825_v18  ;;  %v4827_v33 = vpop.f32.mrb[178].mxu1 }
 0xea4   : > { %5256 = vst [vmem:[%s9736_s1 + $0x350] sm:$0xff] %v4827_v33  ;;  %v4829_v44 = vpop.f32.mrb[179].mxu1 }
 0xea5   : > { %5257 = vst [vmem:[%s9736_s1 + $0x358] sm:$0xff] %v4829_v44  ;;  %v4833_v46 = vpop.f32.mrb[180].mxu1 }
 0xea6   : > { %5258 = vst [vmem:[%s9736_s1 + $0x360] sm:$0xff] %v4833_v46  ;;  %v4835_v49 = vpop.f32.mrb[181].mxu1  ;;  %v6866_v46 = vpop.permute.xlu0 %6865 }
 0xea7   : > { %8227 = vmatmul.mubr.msk.bf16.gmra.mrb[192].mxu0 %vm2727_vm5, %v8520_v29  ;;  %7602 = vmatmul.mubr.msk.bf16.gmra.mrb[24].mxu1 %vm2727_vm5, %v8545_v20  ;;  %5259 = vst [vmem:[%s9736_s1 + $0x368] sm:$0xff] %v4835_v49  ;;  %v4837_v6 = vpop.f32.mrb[182].mxu1 }
 0xea8   : > { %8238 = vmatprep.mubr.msk.bf16.mxu0 %vm8623_vm9, %v8622_v37  ;;  %5091 = vmatprep.mubr.bf16.mxu1 %v10467_v57  ;;  %5260 = vst [vmem:[%s9736_s1 + $0x370] sm:$0xff] %v4837_v6  ;;  %v4839_v16 = vpop.f32.mrb[183].mxu1  ;;  %v6871_v6 = vpop.permute.xlu1 %6870 }
 0xea9   : > { %5261 = vst [vmem:[%s9736_s1 + $0x378] sm:$0xff] %v4839_v16  ;;  %v4843_v3 = vpop.f32.mrb[184].mxu1 }
 0xeaa   : > { %5262 = vst [vmem:[%s9736_s1 + $0x380] sm:$0xff] %v4843_v3  ;;  %v4845_v60 = vpop.f32.mrb[185].mxu1 }
 0xeab   : > { %5263 = vst [vmem:[%s9736_s1 + $0x388] sm:$0xff] %v4845_v60  ;;  %v4847_v52 = vpop.f32.mrb[186].mxu1 }
 0xeac   : > { %5264 = vst [vmem:[%s9736_s1 + $0x390] sm:$0xff] %v4847_v52  ;;  %v4849_v4 = vpop.f32.mrb[187].mxu1  ;;  %v6881_v60 = vpop.permute.xlu1 %6880 }
 0xead   : > { %5265 = vst [vmem:[%s9736_s1 + $0x398] sm:$0xff] %v4849_v4  ;;  %v4853_v30 = vpop.f32.mrb[188].mxu1 }
 0xeae   : > { %5266 = vst [vmem:[%s9736_s1 + $0x3a0] sm:$0xff] %v4853_v30  ;;  %v4855_v29 = vpop.f32.mrb[189].mxu1 }
 0xeaf   : > { %7603 = vmatmul.mubr.msk.bf16.gmra.mrb[28].mxu1 %vm2727_vm5, %v8546_v13  ;;  %5267 = vst [vmem:[%s9736_s1 + $0x3a8] sm:$0xff] %v4855_v29  ;;  %v4857_v19 = vpop.f32.mrb[190].mxu1 }
 0xeb0   : > { %5101 = vmatprep.mubr.bf16.mxu1 %v10467_v57  ;;  %5268 = vst [vmem:[%s9736_s1 + $0x3b0] sm:$0xff] %v4857_v19  ;;  %v4859_v15 = vpop.f32.mrb[191].mxu1  ;;  %v6891_v29 = vpop.permute.xlu1 %6890 }
 0xeb1   : > { %5269 = vst [vmem:[%s9736_s1 + $0x3b8] sm:$0xff] %v4859_v15  ;;  %v4863_v27 = vpop.f32.mrb[192].mxu1 }
 0xeb2   : > { %5270 = vst [vmem:[%s9736_s1 + $0x3c0] sm:$0xff] %v4863_v27  ;;  %v4865_v45 = vpop.f32.mrb[193].mxu1 }
 0xeb3   : > { %5271 = vst [vmem:[%s9736_s1 + $0x3c8] sm:$0xff] %v4865_v45  ;;  %v4867_v7 = vpop.f32.mrb[194].mxu1 }
 0xeb4   : > { %5272 = vst [vmem:[%s9736_s1 + $0x3d0] sm:$0xff] %v4867_v7  ;;  %v4869_v48 = vpop.f32.mrb[195].mxu1 }
 0xeb5   : > { %5273 = vst [vmem:[%s9736_s1 + $0x3d8] sm:$0xff] %v4869_v48  ;;  %v4873_v8 = vpop.f32.mrb[196].mxu1 }
 0xeb6   : > { %5274 = vst [vmem:[%s9736_s1 + $0x3e0] sm:$0xff] %v4873_v8  ;;  %v4875_v53 = vpop.f32.mrb[197].mxu1 }
 0xeb7   : > { %7604 = vmatmul.mubr.msk.bf16.gmra.mrb[32].mxu1 %vm2727_vm5, %v8547_v24  ;;  %5275 = vst [vmem:[%s9736_s1 + $0x3e8] sm:$0xff] %v4875_v53  ;;  %v4877_v11 = vpop.f32.mrb[198].mxu1  ;;  %v6876_v24 = vpop.permute.xlu0 %6875 }
 0xeb8   : > { %5111 = vmatprep.mubr.bf16.mxu1 %v10467_v57  ;;  %5276 = vst [vmem:[%s9736_s1 + $0x3f0] sm:$0xff] %v4877_v11  ;;  %v4879_v14 = vpop.f32.mrb[199].mxu1 }
 0xeb9   : > { %5277 = vst [vmem:[%s9736_s1 + $0x3f8] sm:$0xff] %v4879_v14  ;;  %v4883_v17 = vpop.f32.mrb[200].mxu1 }
 0xeba   : > { %5278 = vst [vmem:[%s9736_s1 + $0x400] sm:$0xff] %v4883_v17 }
 0xebb   : > { %v6886_v30 = vpop.permute.xlu0 %6885 }
 0xebf   : > { %7605 = vmatmul.mubr.msk.bf16.gmra.mrb[36].mxu1 %vm2727_vm5, %v8548_v39 }
 0xec0   : > { %5121 = vmatprep.mubr.bf16.mxu1 %v10467_v57 }
 0xec7   : > { %7606 = vmatmul.mubr.msk.bf16.gmra.mrb[40].mxu1 %vm2727_vm5, %v8549_v41 }
 0xec8   : > { %5131 = vmatprep.mubr.bf16.mxu1 %v10467_v57 }
 0xecf   : > { %7607 = vmatmul.mubr.msk.bf16.gmra.mrb[44].mxu1 %vm2727_vm5, %v8551_v47 }
 0xed0   : > { %5141 = vmatprep.mubr.bf16.mxu1 %v10467_v57  ;;  %v4885_v57 = vpop.f32.mrb[201].mxu1 }
 0xed1   : > { %5279 = vst [vmem:[%s9736_s1 + $0x408] sm:$0xff] %v4885_v57  ;;  %v4887_v51 = vpop.f32.mrb[202].mxu1 }
 0xed2   : > { %5280 = vst [vmem:[%s9736_s1 + $0x410] sm:$0xff] %v4887_v51  ;;  %v4889_v55 = vpop.f32.mrb[203].mxu1 }
 0xed3   : > { %5281 = vst [vmem:[%s9736_s1 + $0x418] sm:$0xff] %v4889_v55  ;;  %v4893_v36 = vpop.f32.mrb[204].mxu1  ;;  %v6896_v55 = vpop.permute.xlu0 %6895 }
 0xed4   : > { %5282 = vst [vmem:[%s9736_s1 + $0x420] sm:$0xff] %v4893_v36  ;;  %v4895_v35 = vpop.f32.mrb[205].mxu1 }
 0xed5   : > { %5283 = vst [vmem:[%s9736_s1 + $0x428] sm:$0xff] %v4895_v35  ;;  %v4897_v12 = vpop.f32.mrb[206].mxu1  ;;  %v6901_v35 = vpop.permute.xlu1 %6900 }
 0xed6   : > { %5284 = vst [vmem:[%s9736_s1 + $0x430] sm:$0xff] %v4897_v12  ;;  %v4899_v9 = vpop.f32.mrb[207].mxu1 }
 0xed7   : > { %7608 = vmatmul.mubr.msk.bf16.gmra.mrb[48].mxu1 %vm2727_vm5, %v8553_v61  ;;  %5285 = vst [vmem:[%s9736_s1 + $0x438] sm:$0xff] %v4899_v9  ;;  %v4903_v25 = vpop.f32.mrb[208].mxu1 }
 0xed8   : > { %5286 = vst [vmem:[%s9736_s1 + $0x440] sm:$0xff] %v4903_v25  ;;  %v4905_v21 = vpop.f32.mrb[209].mxu1 }
 0xed9   : > { %5287 = vst [vmem:[%s9736_s1 + $0x448] sm:$0xff] %v4905_v21  ;;  %v4907_v40 = vpop.f32.mrb[210].mxu1 }
 0xeda   : > { %5288 = vst [vmem:[%s9736_s1 + $0x450] sm:$0xff] %v4907_v40  ;;  %v4909_v56 = vpop.f32.mrb[211].mxu1 }
 0xedb   : > { %5289 = vst [vmem:[%s9736_s1 + $0x458] sm:$0xff] %v4909_v56  ;;  %v4913_v34 = vpop.f32.mrb[212].mxu1 }
 0xedc   : > { %5290 = vst [vmem:[%s9736_s1 + $0x460] sm:$0xff] %v4913_v34  ;;  %v4915_v10 = vpop.f32.mrb[213].mxu1 }
 0xedd   : > { %5291 = vst [vmem:[%s9736_s1 + $0x468] sm:$0xff] %v4915_v10  ;;  %v4917_v26 = vpop.f32.mrb[214].mxu1 }
 0xede   : > { %5292 = vst [vmem:[%s9736_s1 + $0x470] sm:$0xff] %v4917_v26  ;;  %v4919_v5 = vpop.f32.mrb[215].mxu1 }
 0xedf   : > { %5293 = vst [vmem:[%s9736_s1 + $0x478] sm:$0xff] %v4919_v5  ;;  %v4923_v28 = vpop.f32.mrb[216].mxu1 }
 0xee0   : > { %5294 = vst [vmem:[%s9736_s1 + $0x480] sm:$0xff] %v4923_v28  ;;  %v4925_v38 = vpop.f32.mrb[217].mxu1 }
 0xee1   : > { %5295 = vst [vmem:[%s9736_s1 + $0x488] sm:$0xff] %v4925_v38  ;;  %v4927_v32 = vpop.f32.mrb[218].mxu1 }
 0xee2   : > { %5296 = vst [vmem:[%s9736_s1 + $0x490] sm:$0xff] %v4927_v32  ;;  %v4929_v23 = vpop.f32.mrb[219].mxu1 }
 0xee3   : > { %5297 = vst [vmem:[%s9736_s1 + $0x498] sm:$0xff] %v4929_v23  ;;  %v4933_v59 = vpop.f32.mrb[220].mxu1 }
 0xee4   : > { %5298 = vst [vmem:[%s9736_s1 + $0x4a0] sm:$0xff] %v4933_v59  ;;  %v4935_v62 = vpop.f32.mrb[221].mxu1 }
 0xee5   : > { %5299 = vst [vmem:[%s9736_s1 + $0x4a8] sm:$0xff] %v4935_v62  ;;  %v4937_v58 = vpop.f32.mrb[222].mxu1 }
 0xee6   : > { %5300 = vst [vmem:[%s9736_s1 + $0x4b0] sm:$0xff] %v4937_v58  ;;  %v4939_v31 = vpop.f32.mrb[223].mxu1 }
 0xee7   : > { %5301 = vst [vmem:[%s9736_s1 + $0x4b8] sm:$0xff] %v4939_v31  ;;  %v4943_v54 = vpop.f32.mrb[224].mxu1 }
 0xee8   : > { %5302 = vst [vmem:[%s9736_s1 + $0x4c0] sm:$0xff] %v4943_v54  ;;  %v4945_v63 = vpop.f32.mrb[225].mxu1 }
 0xee9   : > { %5303 = vst [vmem:[%s9736_s1 + $0x4c8] sm:$0xff] %v4945_v63  ;;  %v4947_v0 = vpop.f32.mrb[226].mxu1 }
 0xeea   : > { %5304 = vst [vmem:[%s9736_s1 + $0x4d0] sm:$0xff] %v4947_v0  ;;  %v4949_v2 = vpop.f32.mrb[227].mxu1 }
 0xeeb   : > { %5305 = vst [vmem:[%s9736_s1 + $0x4d8] sm:$0xff] %v4949_v2  ;;  %v4953_v1 = vpop.f32.mrb[228].mxu1 }
 0xeec   : > { %5306 = vst [vmem:[%s9736_s1 + $0x4e0] sm:$0xff] %v4953_v1  ;;  %v4955_v50 = vpop.f32.mrb[229].mxu1 }
 0xeed   : > { %5307 = vst [vmem:[%s9736_s1 + $0x4e8] sm:$0xff] %v4955_v50  ;;  %v4957_v20 = vpop.f32.mrb[230].mxu1  ;;  %v8550_v50 = vld [vmem:[%s10483_s2] sm:$0xff]  }
 0xeee   : > { %5308 = vst [vmem:[%s9736_s1 + $0x4f0] sm:$0xff] %v4957_v20  ;;  %v4959_v42 = vpop.f32.mrb[231].mxu1 }
 0xeef   : > { %5309 = vst [vmem:[%s9736_s1 + $0x4f8] sm:$0xff] %v4959_v42  ;;  %v4963_v43 = vpop.f32.mrb[232].mxu1 }
 0xef0   : > { %5310 = vst [vmem:[%s9736_s1 + $0x500] sm:$0xff] %v4963_v43  ;;  %v4965_v22 = vpop.f32.mrb[233].mxu1 }
 0xef1   : > { %5311 = vst [vmem:[%s9736_s1 + $0x508] sm:$0xff] %v4965_v22  ;;  %v4967_v18 = vpop.f32.mrb[234].mxu1 }
 0xef2   : > { %5312 = vst [vmem:[%s9736_s1 + $0x510] sm:$0xff] %v4967_v18  ;;  %v4969_v33 = vpop.f32.mrb[235].mxu1  ;;  %v8552_v18 = vld [vmem:[%s10483_s2 + $0x8] sm:$0xff]  }
 0xef3   : > { %5313 = vst [vmem:[%s9736_s1 + $0x518] sm:$0xff] %v4969_v33  ;;  %v4973_v44 = vpop.f32.mrb[236].mxu1 }
 0xef4   : > { %5314 = vst [vmem:[%s9736_s1 + $0x520] sm:$0xff] %v4973_v44  ;;  %v4975_v13 = vpop.f32.mrb[237].mxu1 }
 0xef5   : > { %5315 = vst [vmem:[%s9736_s1 + $0x528] sm:$0xff] %v4975_v13  ;;  %v4977_v49 = vpop.f32.mrb[238].mxu1 }
 0xef6   : > { %5316 = vst [vmem:[%s9736_s1 + $0x530] sm:$0xff] %v4977_v49  ;;  %v4979_v16 = vpop.f32.mrb[239].mxu1  ;;  %v8554_v49 = vld [vmem:[%s10483_s2 + $0x10] ss:$0 sps:$4 sm:$0x33]   ;;  %s1265_s2 = scalar_lea.vmem %s8822_s9, %s10484_s0 }
 0xef7   : > { %5317 = vst [vmem:[%s9736_s1 + $0x538] sm:$0xff] %v4979_v16 }
 0xf2a   : > { %v4983_v3 = vpop.f32.mrb[240].mxu1 }
 0xf2b   : > { %5318 = vst [vmem:[%s9736_s1 + $0x540] sm:$0xff] %v4983_v3  ;;  %v4985_v52 = vpop.f32.mrb[241].mxu1 }
 0xf2c   : > { %5319 = vst [vmem:[%s9736_s1 + $0x548] sm:$0xff] %v4985_v52  ;;  %v4987_v4 = vpop.f32.mrb[242].mxu1 }
 0xf2d   : > { %5320 = vst [vmem:[%s9736_s1 + $0x550] sm:$0xff] %v4987_v4  ;;  %v4989_v39 = vpop.f32.mrb[243].mxu1 }
 0xf2e   : > { %5321 = vst [vmem:[%s9736_s1 + $0x558] sm:$0xff] %v4989_v39 }
 0xf32   : > { %v4993_v27 = vpop.f32.mrb[244].mxu1 }
 0xf33   : > { %5322 = vst [vmem:[%s9736_s1 + $0x560] sm:$0xff] %v4993_v27  ;;  %v4995_v7 = vpop.f32.mrb[245].mxu1 }
 0xf34   : > { %5323 = vst [vmem:[%s9736_s1 + $0x568] sm:$0xff] %v4995_v7  ;;  %v4997_v53 = vpop.f32.mrb[246].mxu1 }
 0xf35   : > { %5324 = vst [vmem:[%s9736_s1 + $0x570] sm:$0xff] %v4997_v53  ;;  %v4999_v11 = vpop.f32.mrb[247].mxu1 }
 0xf36   : > { %5325 = vst [vmem:[%s9736_s1 + $0x578] sm:$0xff] %v4999_v11 }
 0xf3a   : > { %v5003_v40 = vpop.f32.mrb[248].mxu1 }
 0xf3b   : > { %5326 = vst [vmem:[%s9736_s1 + $0x580] sm:$0xff] %v5003_v40  ;;  %v5005_v10 = vpop.f32.mrb[249].mxu1 }
 0xf3c   : > { %5327 = vst [vmem:[%s9736_s1 + $0x588] sm:$0xff] %v5005_v10  ;;  %v5007_v28 = vpop.f32.mrb[250].mxu1 }
 0xf3d   : > { %5328 = vst [vmem:[%s9736_s1 + $0x590] sm:$0xff] %v5007_v28  ;;  %v5009_v32 = vpop.f32.mrb[251].mxu1 }
 0xf3e   : > { %5329 = vst [vmem:[%s9736_s1 + $0x598] sm:$0xff] %v5009_v32 }
 0xf42   : > { %v5013_v63 = vpop.f32.mrb[252].mxu1 }
 0xf43   : > { %5330 = vst [vmem:[%s9736_s1 + $0x5a0] sm:$0xff] %v5013_v63  ;;  %v5015_v0 = vpop.f32.mrb[253].mxu1 }
 0xf44   : > { %5331 = vst [vmem:[%s9736_s1 + $0x5a8] sm:$0xff] %v5015_v0  ;;  %v5017_v2 = vpop.f32.mrb[254].mxu1 }
 0xf45   : > { %5332 = vst [vmem:[%s9736_s1 + $0x5b0] sm:$0xff] %v5017_v2  ;;  %v5019_v1 = vpop.f32.mrb[255].mxu1 }
 0xf46   : > { %5333 = vst [vmem:[%s9736_s1 + $0x5b8] sm:$0xff] %v5019_v1 }
 0xf4a   : > { %v5023_v20 = vpop.f32.mrb[0].mxu1 }
 0xf4b   : > { %5334 = vst [vmem:[%s9736_s1 + $0x5c0] sm:$0xff] %v5023_v20  ;;  %v5025_v42 = vpop.f32.mrb[1].mxu1 }
 0xf4c   : > { %5335 = vst [vmem:[%s9736_s1 + $0x5c8] sm:$0xff] %v5025_v42  ;;  %v5027_v43 = vpop.f32.mrb[2].mxu1 }
 0xf4d   : > { %5336 = vst [vmem:[%s9736_s1 + $0x5d0] sm:$0xff] %v5027_v43  ;;  %v5029_v22 = vpop.f32.mrb[3].mxu1 }
 0xf4e   : > { %5337 = vst [vmem:[%s9736_s1 + $0x5d8] sm:$0xff] %v5029_v22 }
 0xf52   : > { %v5033_v33 = vpop.f32.mrb[4].mxu1 }
 0xf53   : > { %5338 = vst [vmem:[%s9736_s1 + $0x5e0] sm:$0xff] %v5033_v33  ;;  %v5035_v44 = vpop.f32.mrb[5].mxu1 }
 0xf54   : > { %5339 = vst [vmem:[%s9736_s1 + $0x5e8] sm:$0xff] %v5035_v44  ;;  %v5037_v13 = vpop.f32.mrb[6].mxu1 }
 0xf55   : > { %5340 = vst [vmem:[%s9736_s1 + $0x5f0] sm:$0xff] %v5037_v13 }
 0xf72   : > { %v8224_v19 = vpop.f32.mrb[188].mxu0 }
 0xf73   : > { %v6978_v15 = vadd.f32 %v8224_v19, %v6876_v24  ;;  %v6969_v41 = vpop.f32.mrb[189].mxu0 }
 0xf74   : > { %v6970_v45 = vadd.f32 %v6969_v41, %v6866_v46  ;;  %v8225_v47 = vpop.f32.mrb[190].mxu0  ;;  %v5039_v46 = vpop.f32.mrb[7].mxu1 }
 0xf75   : > { %v6981_v48 = vadd.f32 %v8225_v47, %v6881_v60  ;;  %v6972_v8 = vpop.f32.mrb[191].mxu0  ;;  %v7002_v14 = vmax.f32 %v6978_v15, 0.0  ;;  %5341 = vst [vmem:[%s9736_s1 + $0x5f8] sm:$0xff] %v5039_v46 }
 0xf76   : > { %v6973_v61 = vadd.f32 %v6972_v8, %v6871_v6  ;;  %v7000_v57 = vmax.f32 %v6970_v45, 0.0  ;;  %v5043_v6 = vpop.f32.mrb[8].mxu1 }
 0xf77   : > { %v7003_v17 = vmax.f32 %v6981_v48, 0.0  ;;  %5342 = vst [vmem:[%s9736_s1 + $0x600] sm:$0xff] %v5043_v6  ;;  %v5045_v16 = vpop.f32.mrb[9].mxu1 }
 0xf78   : > { %v7001_v51 = vmax.f32 %v6973_v61, 0.0  ;;  %5343 = vst [vmem:[%s9736_s1 + $0x608] sm:$0xff] %v5045_v16 }
 0xf79   : > { %v7014_v36 = vpack.c.bf16 %v7003_v17, %v7002_v14 }
 0xf7a   : > { %v7013_v12 = vpack.c.bf16 %v7001_v51, %v7000_v57  ;;  %v8228_v9 = vpop.f32.mrb[192].mxu0 }
 0xf7b   : > { %v6994_v25 = vadd.f32 %v8228_v9, %v6896_v55  ;;  %v6985_v21 = vpop.f32.mrb[193].mxu0 }
 0xf7c   : > { %v6986_v56 = vadd.f32 %v6985_v21, %v6886_v30  ;;  %v8229_v34 = vpop.f32.mrb[194].mxu0  ;;  %8231 = vmatpush3.bf16.msra.mxu0 %v7013_v12 }
 0xf7d   : > { %v6997_v26 = vadd.f32 %v8229_v34, %v6901_v35  ;;  %v6988_v5 = vpop.f32.mrb[195].mxu0  ;;  %8232 = vmatprep.subr.bf16.mxu0 %v8622_v37  ;;  %v7006_v23 = vmax.f32 %v6994_v25, 0.0 }
 0xf7e   : > { %v6989_v38 = vadd.f32 %v6988_v5, %v6891_v29  ;;  %v7004_v62 = vmax.f32 %v6986_v56, 0.0 }
 0xf7f   : > { %v7007_v59 = vmax.f32 %v6997_v26, 0.0 }
 0xf80   : > { %v7005_v58 = vmax.f32 %v6989_v38, 0.0  ;;  %8233 = vmatpush3.bf16.msra.mxu0 %v7014_v36 }
 0xf81   : > { %v7016_v31 = vpack.c.bf16 %v7007_v59, %v7006_v23  ;;  %8234 = vmatprep.subr.bf16.mxu0 %v8622_v37 }
 0xf82   : > { %v7015_v54 = vpack.c.bf16 %v7005_v58, %v7004_v62 }
 0xf84   : > { %8235 = vmatpush3.bf16.msra.mxu0 %v7015_v54 }
 0xf85   : > { %8236 = vmatprep.subr.bf16.mxu0 %v8622_v37 }
 0xf88   : > { %8237 = vmatpush3.bf16.msra.mxu0 %v7016_v31 }
 0xf8b   : > { %8239 = vmatmul.mubr.msk.bf16.vlgmr.msra.gmra.mrb[196].mxu0 %vm2727_vm5, %v8550_v50 }
 0xf8c   : > { %8242 = vmatprep.mubr.msk.bf16.mxu0 %vm8623_vm9, %v8622_v37 }
 0xf93   : > { %8243 = vmatmul.mubr.msk.bf16.gmra.mrb[200].mxu0 %vm2727_vm5, %v8552_v18 }
 0xf94   : > { %8246 = vmatprep.mubr.msk.bf16.mxu0 %vm8623_vm9, %v8622_v37  ;;  %v5047_v37 = vpop.f32.mrb[10].mxu1 }
 0xf95   : > { %5344 = vst [vmem:[%s9736_s1 + $0x610] sm:$0xff] %v5047_v37  ;;  %v5049_v24 = vpop.f32.mrb[11].mxu1 }
 0xf96   : > { %5345 = vst [vmem:[%s9736_s1 + $0x618] sm:$0xff] %v5049_v24  ;;  %v5053_v3 = vpop.f32.mrb[12].mxu1 }
 0xf97   : > { %5346 = vst [vmem:[%s9736_s1 + $0x620] sm:$0xff] %v5053_v3  ;;  %v5055_v60 = vpop.f32.mrb[13].mxu1 }
 0xf98   : > { %5347 = vst [vmem:[%s9736_s1 + $0x628] sm:$0xff] %v5055_v60  ;;  %v5057_v52 = vpop.f32.mrb[14].mxu1 }
 0xf99   : > { %5348 = vst [vmem:[%s9736_s1 + $0x630] sm:$0xff] %v5057_v52  ;;  %v5059_v4 = vpop.f32.mrb[15].mxu1 }
 0xf9a   : > { %5349 = vst [vmem:[%s9736_s1 + $0x638] sm:$0xff] %v5059_v4  ;;  %v5063_v39 = vpop.f32.mrb[16].mxu1 }
 0xf9b   : > { %8247 = vmatmul.mubr.msk.bf16.gmra.mrb[204].mxu0 %vm2727_vm5, %v8554_v49  ;;  %5350 = vst [vmem:[%s9736_s1 + $0x640] sm:$0xff] %v5063_v39  ;;  %v5065_v30 = vpop.f32.mrb[17].mxu1 }
 0xf9c   : > { %5351 = vst [vmem:[%s9736_s1 + $0x648] sm:$0xff] %v5065_v30  ;;  %v5067_v29 = vpop.f32.mrb[18].mxu1 }
 0xf9d   : > { %5352 = vst [vmem:[%s9736_s1 + $0x650] sm:$0xff] %v5067_v29  ;;  %v5069_v19 = vpop.f32.mrb[19].mxu1 }
 0xf9e   : > { %5353 = vst [vmem:[%s9736_s1 + $0x658] sm:$0xff] %v5069_v19  ;;  %v5073_v15 = vpop.f32.mrb[20].mxu1 }
 0xf9f   : > { %5354 = vst [vmem:[%s9736_s1 + $0x660] sm:$0xff] %v5073_v15  ;;  %v5075_v41 = vpop.f32.mrb[21].mxu1 }
 0xfa0   : > { %5355 = vst [vmem:[%s9736_s1 + $0x668] sm:$0xff] %v5075_v41  ;;  %v5077_v27 = vpop.f32.mrb[22].mxu1 }
 0xfa1   : > { %5356 = vst [vmem:[%s9736_s1 + $0x670] sm:$0xff] %v5077_v27  ;;  %v5079_v45 = vpop.f32.mrb[23].mxu1 }
 0xfa2   : > { %5357 = vst [vmem:[%s9736_s1 + $0x678] sm:$0xff] %v5079_v45  ;;  %v5083_v47 = vpop.f32.mrb[24].mxu1 }
 0xfa3   : > { %5358 = vst [vmem:[%s9736_s1 + $0x680] sm:$0xff] %v5083_v47  ;;  %v5085_v7 = vpop.f32.mrb[25].mxu1 }
 0xfa4   : > { %5359 = vst [vmem:[%s9736_s1 + $0x688] sm:$0xff] %v5085_v7  ;;  %v5087_v48 = vpop.f32.mrb[26].mxu1 }
 0xfa5   : > { %5360 = vst [vmem:[%s9736_s1 + $0x690] sm:$0xff] %v5087_v48  ;;  %v5089_v8 = vpop.f32.mrb[27].mxu1 }
 0xfa6   : > { %5361 = vst [vmem:[%s9736_s1 + $0x698] sm:$0xff] %v5089_v8  ;;  %v5093_v53 = vpop.f32.mrb[28].mxu1 }
 0xfa7   : > { %5362 = vst [vmem:[%s9736_s1 + $0x6a0] sm:$0xff] %v5093_v53  ;;  %v5095_v61 = vpop.f32.mrb[29].mxu1 }
 0xfa8   : > { %5363 = vst [vmem:[%s9736_s1 + $0x6a8] sm:$0xff] %v5095_v61  ;;  %v5097_v11 = vpop.f32.mrb[30].mxu1 }
 0xfa9   : > { %5364 = vst [vmem:[%s9736_s1 + $0x6b0] sm:$0xff] %v5097_v11  ;;  %v5099_v14 = vpop.f32.mrb[31].mxu1 }
 0xfaa   : > { %5365 = vst [vmem:[%s9736_s1 + $0x6b8] sm:$0xff] %v5099_v14  ;;  %v5103_v17 = vpop.f32.mrb[32].mxu1 }
 0xfab   : > { %5366 = vst [vmem:[%s9736_s1 + $0x6c0] sm:$0xff] %v5103_v17  ;;  %v5105_v57 = vpop.f32.mrb[33].mxu1 }
 0xfac   : > { %5367 = vst [vmem:[%s9736_s1 + $0x6c8] sm:$0xff] %v5105_v57  ;;  %v5107_v51 = vpop.f32.mrb[34].mxu1 }
 0xfad   : > { %5368 = vst [vmem:[%s9736_s1 + $0x6d0] sm:$0xff] %v5107_v51  ;;  %v5109_v55 = vpop.f32.mrb[35].mxu1 }
 0xfae   : > { %5369 = vst [vmem:[%s9736_s1 + $0x6d8] sm:$0xff] %v5109_v55  ;;  %v5113_v36 = vpop.f32.mrb[36].mxu1 }
 0xfaf   : > { %5370 = vst [vmem:[%s9736_s1 + $0x6e0] sm:$0xff] %v5113_v36  ;;  %v5115_v35 = vpop.f32.mrb[37].mxu1 }
 0xfb0   : > { %5371 = vst [vmem:[%s9736_s1 + $0x6e8] sm:$0xff] %v5115_v35  ;;  %v5117_v12 = vpop.f32.mrb[38].mxu1 }
 0xfb1   : > { %5372 = vst [vmem:[%s9736_s1 + $0x6f0] sm:$0xff] %v5117_v12  ;;  %v5119_v9 = vpop.f32.mrb[39].mxu1 }
 0xfb2   : > { %5373 = vst [vmem:[%s9736_s1 + $0x6f8] sm:$0xff] %v5119_v9  ;;  %v5123_v25 = vpop.f32.mrb[40].mxu1 }
 0xfb3   : > { %5374 = vst [vmem:[%s9736_s1 + $0x700] sm:$0xff] %v5123_v25  ;;  %v5125_v21 = vpop.f32.mrb[41].mxu1 }
 0xfb4   : > { %5375 = vst [vmem:[%s9736_s1 + $0x708] sm:$0xff] %v5125_v21  ;;  %v5127_v40 = vpop.f32.mrb[42].mxu1 }
 0xfb5   : > { %5376 = vst [vmem:[%s9736_s1 + $0x710] sm:$0xff] %v5127_v40  ;;  %v5129_v56 = vpop.f32.mrb[43].mxu1 }
 0xfb6   : > { %5377 = vst [vmem:[%s9736_s1 + $0x718] sm:$0xff] %v5129_v56  ;;  %v5133_v34 = vpop.f32.mrb[44].mxu1 }
 0xfb7   : > { %5378 = vst [vmem:[%s9736_s1 + $0x720] sm:$0xff] %v5133_v34  ;;  %v5135_v10 = vpop.f32.mrb[45].mxu1 }
 0xfb8   : > { %5379 = vst [vmem:[%s9736_s1 + $0x728] sm:$0xff] %v5135_v10  ;;  %v5137_v26 = vpop.f32.mrb[46].mxu1 }
 0xfb9   : > { %5380 = vst [vmem:[%s9736_s1 + $0x730] sm:$0xff] %v5137_v26  ;;  %v5139_v5 = vpop.f32.mrb[47].mxu1 }
 0xfba   : > { %5381 = vst [vmem:[%s9736_s1 + $0x738] sm:$0xff] %v5139_v5  ;;  %v5143_v28 = vpop.f32.mrb[48].mxu1 }
 0xfbb   : > { %5382 = vst [vmem:[%s9736_s1 + $0x740] sm:$0xff] %v5143_v28  ;;  %v5145_v38 = vpop.f32.mrb[49].mxu1 }
 0xfbc   : > { %5383 = vst [vmem:[%s9736_s1 + $0x748] sm:$0xff] %v5145_v38  ;;  %v5147_v32 = vpop.f32.mrb[50].mxu1 }
 0xfbd   : > { %v5148_v23 = vpop.f32.mrb[51].mxu1 }
0x105e   : > { %v7073_v59 = vpop.f32.mrb[196].mxu0 }
0x105f   : > { %7095 = vst.msk [vmem:[%s1265_s2] sm:$0xff] %vm2829_vm6, %v7073_v59  ;;  %v8240_v62 = vpop.f32.mrb[197].mxu0 }
0x1060   : > { %v7076_v58 = vpop.f32.mrb[198].mxu0 }
0x1061   : > { %7096 = vst.msk [vmem:[%s1265_s2 + $0x8] sm:$0xff] %vm2829_vm6, %v7076_v58  ;;  %v8241_v31 = vpop.f32.mrb[199].mxu0 }
0x1066   : > { %v7081_v54 = vpop.f32.mrb[200].mxu0 }
0x1067   : > { %7097 = vst.msk [vmem:[%s1265_s2 + $0x10] sm:$0xff] %vm2829_vm6, %v7081_v54  ;;  %v8244_v63 = vpop.f32.mrb[201].mxu0 }
0x1068   : > { %v7084_v0 = vpop.f32.mrb[202].mxu0 }
0x1069   : > { %7098 = vst.msk [vmem:[%s1265_s2 + $0x18] sm:$0xff] %vm2829_vm6, %v7084_v0  ;;  %v8245_v2 = vpop.f32.mrb[203].mxu0 }
0x106e   : > { %v7089_v1 = vpop.f32.mrb[204].mxu0 }
0x106f   : > { %7100 = vst.msk [vmem:[%s1265_s2 + $0x20] sm:$0xf] %vm7099_vm10, %v7089_v1  ;;  %v8248_v50 = vpop.f32.mrb[205].mxu0 }
0x1070   : > { %v7092_v20 = vpop.f32.mrb[206].mxu0 }
0x1071   : > { %v8249_v42 = vpop.f32.mrb[207].mxu0 }
0x1072 PF: > { %s89_s15 = sadd.s32 1, %s8580_s15  }
0x1073   : > { %p86_p1 = scmp.ge.s32.totalorder %s89_s15, 4  }
0x1075   :  { %88 = sbr.rel (!%p86_p1) target bundleno = 64 (0x40), region = 278 }
0x107c   :  { %7170 = vsyncpa [#allocation3], 1 }
0x107d   :  { %7172 = vsyncpa [#allocation3 + $0x1], 1 }

</bundles_post_ra>
